<compile_context>
chip_gen: v7x
topology: tpu7x:2x2x1
jax: 0.10.0
libtpu: 0.0.40
codegen_flags: <defaults>
</compile_context>

<pallas_src>
import functools

import jax
import jax.numpy as jnp
from jax import lax
from jax.experimental import pallas as pl
from jax.experimental.pallas import tpu as pltpu

EPS = 1e-5
LANES = 128


def _round_up(x, m):
    return (x + m - 1) // m * m


# ----------------------------------------------------------------------------- kernels
def _conv3x3_into(out_ref, xpad, w_ref, H, W):
    """3x3 'same' conv as 9 shifted matmuls accumulated into out_ref.

    xpad:    (H+2, W+2, Ci) f32 value with the zero halo already in place.
    w_ref:   (3, 3, Ci, Co) bf16 ref (HWIO).
    out_ref: (H*W, Co) f32 ref (flattened spatial -> lane-dense output).
    """
    Ci = xpad.shape[-1]
    out_ref[...] = jnp.zeros_like(out_ref)
    for dx in range(3):
        # One W-shifted slab per dx; cast once to bf16 at the MXU boundary.
        slab = xpad[:, dx:dx + W, :].astype(jnp.bfloat16)          # (H+2, W, Ci)
        for dy in range(3):
            patch = slab[dy:dy + H].reshape(H * W, Ci)             # (H*W, Ci) bf16
            out_ref[...] += jnp.dot(patch, w_ref[dy, dx],
                                    preferred_element_type=jnp.float32)


def _conv1_stats_kernel(x_ref, w_ref, z_ref, st_ref):
    # x_ref: (H+2, W+2, Cin_p) f32   w_ref: (3,3,Cin_p,Cmid_p) bf16
    # z_ref: (H*W, Cmid_p) f32       st_ref: (2, Cmid_p) f32 [sum; sum_sq]
    Hp, Wp, _ = x_ref.shape
    H, W = Hp - 2, Wp - 2
    _conv3x3_into(z_ref, x_ref[...], w_ref, H, W)
    z = z_ref[...]
    st_ref[0:1, :] = jnp.sum(z, axis=0, keepdims=True)
    st_ref[1:2, :] = jnp.sum(z * z, axis=0, keepdims=True)


def _bn_relu_conv2_stats_kernel(z1_ref, ss_ref, w_ref, z2_ref, st_ref, ypad_ref):
    # z1_ref: (H*W, Cmid_p) f32      ss_ref: (2, Cmid_p) f32 [scale; shift]
    # w_ref:  (3,3,Cmid_p,Cout_p) bf16
    # z2_ref: (H*W, Cout_p) f32      st_ref: (2, Cout_p) f32
    # ypad_ref: VMEM scratch (H+2, W+2, Cmid_p) f32
    Hp, Wp, Cm = ypad_ref.shape
    H, W = Hp - 2, Wp - 2
    scale = ss_ref[0:1, :]
    shift = ss_ref[1:2, :]
    y = jnp.maximum(z1_ref[...] * scale + shift, 0.0)              # BN1 folded FMA + ReLU

    # Assemble the zero-padded conv2 input: zero only the 1-px halo strips,
    # then a single interior write (no full-buffer zero fill).
    zrow = jnp.zeros((1, Wp, Cm), jnp.float32)
    zcol = jnp.zeros((Hp, 1, Cm), jnp.float32)
    ypad_ref[0:1, :, :] = zrow
    ypad_ref[Hp - 1:Hp, :, :] = zrow
    ypad_ref[:, 0:1, :] = zcol
    ypad_ref[:, Wp - 1:Wp, :] = zcol
    ypad_ref[1:H + 1, 1:W + 1, :] = y.reshape(H, W, Cm)

    _conv3x3_into(z2_ref, ypad_ref[...], w_ref, H, W)
    z2 = z2_ref[...]
    st_ref[0:1, :] = jnp.sum(z2, axis=0, keepdims=True)
    st_ref[1:2, :] = jnp.sum(z2 * z2, axis=0, keepdims=True)


def _bn_relu_kernel(z_ref, ss_ref, o_ref):
    # z_ref: (H*W, Cout_p) f32   ss_ref: (2, Cout_p) f32   o_ref: (H*W, Cout_p) f32
    o_ref[...] = jnp.maximum(z_ref[...] * ss_ref[0:1, :] + ss_ref[1:2, :], 0.0)


# ----------------------------------------------------------------------------- wrapper
def _bn_scale_shift(stats, gamma, beta, c_pad, count):
    """Fold batch-norm into y = z*scale + shift (training mode, biased variance)."""
    s = jnp.sum(stats.astype(jnp.float32), axis=0)                  # (2, C_p)
    mean = s[0] / count
    var = jnp.maximum(s[1] / count - mean * mean, 0.0)              # biased, like torch BN
    g = jnp.pad(gamma.astype(jnp.float32), (0, c_pad - gamma.shape[0]))
    b = jnp.pad(beta.astype(jnp.float32), (0, c_pad - beta.shape[0]))
    scale = g * lax.rsqrt(var + EPS)
    shift = b - mean * scale
    return jnp.stack([scale, shift]).astype(jnp.float32)            # (2, C_p)


@functools.partial(jax.jit, static_argnames=())
def double_conv(x_nchw, params):
    """params = (w1, b1, g1, bt1, w2, b2, g2, bt2); conv weights in torch (O, I, 3, 3).

    Conv biases b1/b2 are accepted but unused: a per-channel bias added before
    training-mode BatchNorm is exactly cancelled by the batch-mean subtraction.
    """
    w1, _b1, g1, bt1, w2, _b2, g2, bt2 = params
    N, Cin, H, W = x_nchw.shape
    Cmid, Cout = w1.shape[0], w2.shape[0]
    Cin_p = _round_up(Cin, LANES)
    Cmid_p = _round_up(Cmid, LANES)
    Cout_p = _round_up(Cout, LANES)
    HW = H * W
    count = N * HW

    # NCHW -> NHWC (channels -> lanes), pad channels to 128 and spatial by 1.
    x = jnp.transpose(x_nchw, (0, 2, 3, 1)).astype(jnp.float32)
    xp = jnp.pad(x, ((0, 0), (1, 1), (1, 1), (0, Cin_p - Cin)))

    # torch OIHW -> HWIO, zero-pad channels, bf16 for the MXU.
    def prep_w(w, ci_p, co_p):
        whwio = jnp.transpose(w, (2, 3, 1, 0)).astype(jnp.float32)
        ci, co = whwio.shape[2], whwio.shape[3]
        return jnp.pad(whwio, ((0, 0), (0, 0), (0, ci_p - ci), (0, co_p - co))
                       ).astype(jnp.bfloat16)

    w1k = prep_w(w1, Cin_p, Cmid_p)
    w2k = prep_w(w2, Cmid_p, Cout_p)

    cparams = pltpu.CompilerParams(
        dimension_semantics=("parallel",),          # batch grid axis -> megacore on v7x
        vmem_limit_bytes=48 * 1024 * 1024,          # fits v7x's 64 MiB physical VMEM
    )

    # ---- pass 1: conv1 + per-sample sum / sum_sq -------------------------------------
    z1, st1 = pl.pallas_call(
        _conv1_stats_kernel,
        grid=(N,),
        in_specs=[
            pl.BlockSpec((None, H + 2, W + 2, Cin_p), lambda n: (n, 0, 0, 0)),
            pl.BlockSpec((3, 3, Cin_p, Cmid_p), lambda n: (0, 0, 0, 0)),
        ],
        out_specs=[
            pl.BlockSpec((None, HW, Cmid_p), lambda n: (n, 0, 0)),
            pl.BlockSpec((None, 2, Cmid_p), lambda n: (n, 0, 0)),
        ],
        out_shape=[
            jax.ShapeDtypeStruct((N, HW, Cmid_p), jnp.float32),
            jax.ShapeDtypeStruct((N, 2, Cmid_p), jnp.float32),
        ],
        compiler_params=cparams,
    )(xp, w1k)

    ss1 = _bn_scale_shift(st1, g1, bt1, Cmid_p, count)

    # ---- pass 2: BN1 + ReLU -> conv2 + per-sample sum / sum_sq -----------------------
    z2, st2 = pl.pallas_call(
        _bn_relu_conv2_stats_kernel,
        grid=(N,),
        in_specs=[
            pl.BlockSpec((None, HW, Cmid_p), lambda n: (n, 0, 0)),
            pl.BlockSpec((2, Cmid_p), lambda n: (0, 0)),
            pl.BlockSpec((3, 3, Cmid_p, Cout_p), lambda n: (0, 0, 0, 0)),
        ],
        out_specs=[
            pl.BlockSpec((None, HW, Cout_p), lambda n: (n, 0, 0)),
            pl.BlockSpec((None, 2, Cout_p), lambda n: (n, 0, 0)),
        ],
        out_shape=[
            jax.ShapeDtypeStruct((N, HW, Cout_p), jnp.float32),
            jax.ShapeDtypeStruct((N, 2, Cout_p), jnp.float32),
        ],
        scratch_shapes=[pltpu.VMEM((H + 2, W + 2, Cmid_p), jnp.float32)],
        compiler_params=cparams,
    )(z1, ss1, w2k)

    ss2 = _bn_scale_shift(st2, g2, bt2, Cout_p, count)

    # ---- pass 3: BN2 + ReLU ----------------------------------------------------------
    out_flat = pl.pallas_call(
        _bn_relu_kernel,
        grid=(N,),
        in_specs=[
            pl.BlockSpec((None, HW, Cout_p), lambda n: (n, 0, 0)),
            pl.BlockSpec((2, Cout_p), lambda n: (0, 0)),
        ],
        out_specs=pl.BlockSpec((None, HW, Cout_p), lambda n: (n, 0, 0)),
        out_shape=jax.ShapeDtypeStruct((N, HW, Cout_p), jnp.float32),
        compiler_params=cparams,
    )(z2, ss2)

    out = out_flat.reshape(N, H, W, Cout_p)[..., :Cout]
    return jnp.transpose(out, (0, 3, 1, 2))                         # back to NCHW


# ----------------------------------------------------------------------------- params
def init_params(key, in_channels, out_channels, mid_channels=None):
    if not mid_channels:
        mid_channels = out_channels
    k1, k2, k3, k4 = jax.random.split(key, 4)
    s1 = (2.0 / (in_channels * 9)) ** 0.5
    s2 = (2.0 / (mid_channels * 9)) ** 0.5
    # torch layout (O, I, 3, 3); biases kept for interface parity (cancelled by BN).
    w1 = s1 * jax.random.normal(k1, (mid_channels, in_channels, 3, 3), jnp.float32)
    b1 = 0.1 * jax.random.normal(k2, (mid_channels,), jnp.float32)
    w2 = s2 * jax.random.normal(k3, (out_channels, mid_channels, 3, 3), jnp.float32)
    b2 = 0.1 * jax.random.normal(k4, (out_channels,), jnp.float32)
    g1 = jnp.ones((mid_channels,), jnp.float32)
    bt1 = jnp.zeros((mid_channels,), jnp.float32)
    g2 = jnp.ones((out_channels,), jnp.float32)
    bt2 = jnp.zeros((out_channels,), jnp.float32)
    return (w1, b1, g1, bt1, w2, b2, g2, bt2)


if __name__ == "__main__":
    key = jax.random.PRNGKey(0)
    kx, kp = jax.random.split(key)

    N, Cin, H, W = 2, 4, 16, 16
    Cout = 8
    x = jax.random.normal(kx, (N, Cin, H, W), jnp.float32)
    params = init_params(kp, Cin, Cout)

    y = double_conv(x, params)
    y = jax.block_until_ready(y)
    assert y.shape == (N, Cout, H, W), y.shape
    assert bool(jnp.all(jnp.isfinite(y))), "non-finite output"
    print("KERNEL_OK")
</pallas_src>

<mosaic_0001>
module attributes {stable_mosaic.version = 11 : i64} {
  func.func @_conv1_stats_kernel(%arg0: i32, %arg1: memref<1x18x18x128xf32, #tpu.memory_space<vmem>>, %arg2: memref<3x3x128x128xbf16, #tpu.memory_space<vmem>>, %arg3: memref<1x256x128xf32, #tpu.memory_space<vmem>>, %arg4: memref<1x2x128xf32, #tpu.memory_space<vmem>>) attributes {dimension_semantics = [#tpu.dimension_semantics<parallel>], iteration_bounds = array<i64: 2>, scalar_prefetch = 0 : i64, scratch_operands = 0 : i64, tpu.core_type = #tpu.core_type<tc>, window_params = [{transform_indices = @transform_0, window_bounds = array<i64: 1, 18, 18, 128>}, {pipeline_mode = #tpu.pipeline_mode<synchronous>, transform_indices = @transform_1, window_bounds = array<i64: 3, 3, 128, 128>}, {transform_indices = @transform_2, window_bounds = array<i64: 1, 256, 128>}, {transform_indices = @transform_3, window_bounds = array<i64: 1, 2, 128>}]} {
    %c0 = arith.constant 0 : index
    %c0_0 = arith.constant 0 : index
    %c0_1 = arith.constant 0 : index
    %c0_2 = arith.constant 0 : index
    %0 = vector.load %arg1[%c0, %c0_0, %c0_1, %c0_2] : memref<1x18x18x128xf32, #tpu.memory_space<vmem>>, vector<1x18x18x128xf32>
    %1 = vector.shape_cast %0 : vector<1x18x18x128xf32> to vector<18x18x128xf32>
    %cst = arith.constant 0.000000e+00 : f32
    %2 = vector.broadcast %cst : f32 to vector<256x128xf32>
    %c0_3 = arith.constant 0 : index
    %c0_4 = arith.constant 0 : index
    %c0_5 = arith.constant 0 : index
    %3 = vector.load %arg3[%c0_3, %c0_4, %c0_5] : memref<1x256x128xf32, #tpu.memory_space<vmem>>, vector<1x256x128xf32>
    %4 = vector.shape_cast %3 : vector<1x256x128xf32> to vector<256x128xf32>
    %5 = vector.shape_cast %2 : vector<256x128xf32> to vector<1x256x128xf32>
    tpu.vector_store %arg3[%c0_3, %c0_4, %c0_5], %5 {strides = array<i32>} : memref<1x256x128xf32, #tpu.memory_space<vmem>>, vector<1x256x128xf32>,
    %6 = vector.extract_strided_slice %1 {offsets = [0, 0, 0], sizes = [18, 16, 128], strides = [1, 1, 1]} : vector<18x18x128xf32> to vector<18x16x128xf32>
    %7 = arith.truncf %6 : vector<18x16x128xf32> to vector<18x16x128xbf16>
    %8 = vector.extract_strided_slice %7 {offsets = [0, 0, 0], sizes = [16, 16, 128], strides = [1, 1, 1]} : vector<18x16x128xbf16> to vector<16x16x128xbf16>
    %9 = vector.shape_cast %8 : vector<16x16x128xbf16> to vector<256x128xbf16>
    %c0_6 = arith.constant 0 : index
    %c0_7 = arith.constant 0 : index
    %c0_8 = arith.constant 0 : index
    %10 = vector.load %arg3[%c0_6, %c0_7, %c0_8] : memref<1x256x128xf32, #tpu.memory_space<vmem>>, vector<1x256x128xf32>
    %11 = vector.shape_cast %10 : vector<1x256x128xf32> to vector<256x128xf32>
    %c0_9 = arith.constant 0 : index
    %c0_10 = arith.constant 0 : index
    %c0_11 = arith.constant 0 : index
    %c0_12 = arith.constant 0 : index
    %12 = vector.load %arg2[%c0_9, %c0_10, %c0_11, %c0_12] : memref<3x3x128x128xbf16, #tpu.memory_space<vmem>>, vector<1x1x128x128xbf16>
    %13 = vector.shape_cast %12 : vector<1x1x128x128xbf16> to vector<128x128xbf16>
    %cst_13 = arith.constant dense<0.000000e+00> : vector<256x128xf32>
    %14 = tpu.matmul %9, %13, %cst_13 {dimension_numbers = #tpu.dot_dimension_numbers<[1], [0], [0], [1], [0, 0, 1, 1], [], []>} : vector<256x128xbf16>, vector<128x128xbf16>, vector<256x128xf32> -> vector<256x128xf32>
    %15 = arith.addf %11, %14 : vector<256x128xf32>
    %c0_14 = arith.constant 0 : index
    %c0_15 = arith.constant 0 : index
    %c0_16 = arith.constant 0 : index
    %16 = vector.load %arg3[%c0_14, %c0_15, %c0_16] : memref<1x256x128xf32, #tpu.memory_space<vmem>>, vector<1x256x128xf32>
    %17 = vector.shape_cast %16 : vector<1x256x128xf32> to vector<256x128xf32>
    %18 = vector.shape_cast %15 : vector<256x128xf32> to vector<1x256x128xf32>
    tpu.vector_store %arg3[%c0_14, %c0_15, %c0_16], %18 {strides = array<i32>} : memref<1x256x128xf32, #tpu.memory_space<vmem>>, vector<1x256x128xf32>,
    %19 = vector.extract_strided_slice %7 {offsets = [1, 0, 0], sizes = [16, 16, 128], strides = [1, 1, 1]} : vector<18x16x128xbf16> to vector<16x16x128xbf16>
    %20 = vector.shape_cast %19 : vector<16x16x128xbf16> to vector<256x128xbf16>
    %c0_17 = arith.constant 0 : index
    %c0_18 = arith.constant 0 : index
    %c0_19 = arith.constant 0 : index
    %21 = vector.load %arg3[%c0_17, %c0_18, %c0_19] : memref<1x256x128xf32, #tpu.memory_space<vmem>>, vector<1x256x128xf32>
    %22 = vector.shape_cast %21 : vector<1x256x128xf32> to vector<256x128xf32>
    %c1 = arith.constant 1 : index
    %c0_20 = arith.constant 0 : index
    %c0_21 = arith.constant 0 : index
    %c0_22 = arith.constant 0 : index
    %23 = vector.load %arg2[%c1, %c0_20, %c0_21, %c0_22] : memref<3x3x128x128xbf16, #tpu.memory_space<vmem>>, vector<1x1x128x128xbf16>
    %24 = vector.shape_cast %23 : vector<1x1x128x128xbf16> to vector<128x128xbf16>
    %cst_23 = arith.constant dense<0.000000e+00> : vector<256x128xf32>
    %25 = tpu.matmul %20, %24, %cst_23 {dimension_numbers = #tpu.dot_dimension_numbers<[1], [0], [0], [1], [0, 0, 1, 1], [], []>} : vector<256x128xbf16>, vector<128x128xbf16>, vector<256x128xf32> -> vector<256x128xf32>
    %26 = arith.addf %22, %25 : vector<256x128xf32>
    %c0_24 = arith.constant 0 : index
    %c0_25 = arith.constant 0 : index
    %c0_26 = arith.constant 0 : index
    %27 = vector.load %arg3[%c0_24, %c0_25, %c0_26] : memref<1x256x128xf32, #tpu.memory_space<vmem>>, vector<1x256x128xf32>
    %28 = vector.shape_cast %27 : vector<1x256x128xf32> to vector<256x128xf32>
    %29 = vector.shape_cast %26 : vector<256x128xf32> to vector<1x256x128xf32>
    tpu.vector_store %arg3[%c0_24, %c0_25, %c0_26], %29 {strides = array<i32>} : memref<1x256x128xf32, #tpu.memory_space<vmem>>, vector<1x256x128xf32>,
    %30 = vector.extract_strided_slice %7 {offsets = [2, 0, 0], sizes = [16, 16, 128], strides = [1, 1, 1]} : vector<18x16x128xbf16> to vector<16x16x128xbf16>
    %31 = vector.shape_cast %30 : vector<16x16x128xbf16> to vector<256x128xbf16>
    %c0_27 = arith.constant 0 : index
    %c0_28 = arith.constant 0 : index
    %c0_29 = arith.constant 0 : index
    %32 = vector.load %arg3[%c0_27, %c0_28, %c0_29] : memref<1x256x128xf32, #tpu.memory_space<vmem>>, vector<1x256x128xf32>
    %33 = vector.shape_cast %32 : vector<1x256x128xf32> to vector<256x128xf32>
    %c2 = arith.constant 2 : index
    %c0_30 = arith.constant 0 : index
    %c0_31 = arith.constant 0 : index
    %c0_32 = arith.constant 0 : index
    %34 = vector.load %arg2[%c2, %c0_30, %c0_31, %c0_32] : memref<3x3x128x128xbf16, #tpu.memory_space<vmem>>, vector<1x1x128x128xbf16>
    %35 = vector.shape_cast %34 : vector<1x1x128x128xbf16> to vector<128x128xbf16>
    %cst_33 = arith.constant dense<0.000000e+00> : vector<256x128xf32>
    %36 = tpu.matmul %31, %35, %cst_33 {dimension_numbers = #tpu.dot_dimension_numbers<[1], [0], [0], [1], [0, 0, 1, 1], [], []>} : vector<256x128xbf16>, vector<128x128xbf16>, vector<256x128xf32> -> vector<256x128xf32>
    %37 = arith.addf %33, %36 : vector<256x128xf32>
    %c0_34 = arith.constant 0 : index
    %c0_35 = arith.constant 0 : index
    %c0_36 = arith.constant 0 : index
    %38 = vector.load %arg3[%c0_34, %c0_35, %c0_36] : memref<1x256x128xf32, #tpu.memory_space<vmem>>, vector<1x256x128xf32>
    %39 = vector.shape_cast %38 : vector<1x256x128xf32> to vector<256x128xf32>
    %40 = vector.shape_cast %37 : vector<256x128xf32> to vector<1x256x128xf32>
    tpu.vector_store %arg3[%c0_34, %c0_35, %c0_36], %40 {strides = array<i32>} : memref<1x256x128xf32, #tpu.memory_space<vmem>>, vector<1x256x128xf32>,
    %41 = vector.extract_strided_slice %1 {offsets = [0, 1, 0], sizes = [18, 16, 128], strides = [1, 1, 1]} : vector<18x18x128xf32> to vector<18x16x128xf32>
    %42 = arith.truncf %41 : vector<18x16x128xf32> to vector<18x16x128xbf16>
    %43 = vector.extract_strided_slice %42 {offsets = [0, 0, 0], sizes = [16, 16, 128], strides = [1, 1, 1]} : vector<18x16x128xbf16> to vector<16x16x128xbf16>
    %44 = vector.shape_cast %43 : vector<16x16x128xbf16> to vector<256x128xbf16>
    %c0_37 = arith.constant 0 : index
    %c0_38 = arith.constant 0 : index
    %c0_39 = arith.constant 0 : index
    %45 = vector.load %arg3[%c0_37, %c0_38, %c0_39] : memref<1x256x128xf32, #tpu.memory_space<vmem>>, vector<1x256x128xf32>
    %46 = vector.shape_cast %45 : vector<1x256x128xf32> to vector<256x128xf32>
    %c0_40 = arith.constant 0 : index
    %c1_41 = arith.constant 1 : index
    %c0_42 = arith.constant 0 : index
    %c0_43 = arith.constant 0 : index
    %47 = vector.load %arg2[%c0_40, %c1_41, %c0_42, %c0_43] : memref<3x3x128x128xbf16, #tpu.memory_space<vmem>>, vector<1x1x128x128xbf16>
    %48 = vector.shape_cast %47 : vector<1x1x128x128xbf16> to vector<128x128xbf16>
    %cst_44 = arith.constant dense<0.000000e+00> : vector<256x128xf32>
    %49 = tpu.matmul %44, %48, %cst_44 {dimension_numbers = #tpu.dot_dimension_numbers<[1], [0], [0], [1], [0, 0, 1, 1], [], []>} : vector<256x128xbf16>, vector<128x128xbf16>, vector<256x128xf32> -> vector<256x128xf32>
    %50 = arith.addf %46, %49 : vector<256x128xf32>
    %c0_45 = arith.constant 0 : index
    %c0_46 = arith.constant 0 : index
    %c0_47 = arith.constant 0 : index
    %51 = vector.load %arg3[%c0_45, %c0_46, %c0_47] : memref<1x256x128xf32, #tpu.memory_space<vmem>>, vector<1x256x128xf32>
    %52 = vector.shape_cast %51 : vector<1x256x128xf32> to vector<256x128xf32>
    %53 = vector.shape_cast %50 : vector<256x128xf32> to vector<1x256x128xf32>
    tpu.vector_store %arg3[%c0_45, %c0_46, %c0_47], %53 {strides = array<i32>} : memref<1x256x128xf32, #tpu.memory_space<vmem>>, vector<1x256x128xf32>,
    %54 = vector.extract_strided_slice %42 {offsets = [1, 0, 0], sizes = [16, 16, 128], strides = [1, 1, 1]} : vector<18x16x128xbf16> to vector<16x16x128xbf16>
    %55 = vector.shape_cast %54 : vector<16x16x128xbf16> to vector<256x128xbf16>
    %c0_48 = arith.constant 0 : index
    %c0_49 = arith.constant 0 : index
    %c0_50 = arith.constant 0 : index
    %56 = vector.load %arg3[%c0_48, %c0_49, %c0_50] : memref<1x256x128xf32, #tpu.memory_space<vmem>>, vector<1x256x128xf32>
    %57 = vector.shape_cast %56 : vector<1x256x128xf32> to vector<256x128xf32>
    %c1_51 = arith.constant 1 : index
    %c1_52 = arith.constant 1 : index
    %c0_53 = arith.constant 0 : index
    %c0_54 = arith.constant 0 : index
    %58 = vector.load %arg2[%c1_51, %c1_52, %c0_53, %c0_54] : memref<3x3x128x128xbf16, #tpu.memory_space<vmem>>, vector<1x1x128x128xbf16>
    %59 = vector.shape_cast %58 : vector<1x1x128x128xbf16> to vector<128x128xbf16>
    %cst_55 = arith.constant dense<0.000000e+00> : vector<256x128xf32>
    %60 = tpu.matmul %55, %59, %cst_55 {dimension_numbers = #tpu.dot_dimension_numbers<[1], [0], [0], [1], [0, 0, 1, 1], [], []>} : vector<256x128xbf16>, vector<128x128xbf16>, vector<256x128xf32> -> vector<256x128xf32>
    %61 = arith.addf %57, %60 : vector<256x128xf32>
    %c0_56 = arith.constant 0 : index
    %c0_57 = arith.constant 0 : index
    %c0_58 = arith.constant 0 : index
    %62 = vector.load %arg3[%c0_56, %c0_57, %c0_58] : memref<1x256x128xf32, #tpu.memory_space<vmem>>, vector<1x256x128xf32>
    %63 = vector.shape_cast %62 : vector<1x256x128xf32> to vector<256x128xf32>
    %64 = vector.shape_cast %61 : vector<256x128xf32> to vector<1x256x128xf32>
    tpu.vector_store %arg3[%c0_56, %c0_57, %c0_58], %64 {strides = array<i32>} : memref<1x256x128xf32, #tpu.memory_space<vmem>>, vector<1x256x128xf32>,
    %65 = vector.extract_strided_slice %42 {offsets = [2, 0, 0], sizes = [16, 16, 128], strides = [1, 1, 1]} : vector<18x16x128xbf16> to vector<16x16x128xbf16>
    %66 = vector.shape_cast %65 : vector<16x16x128xbf16> to vector<256x128xbf16>
    %c0_59 = arith.constant 0 : index
    %c0_60 = arith.constant 0 : index
    %c0_61 = arith.constant 0 : index
    %67 = vector.load %arg3[%c0_59, %c0_60, %c0_61] : memref<1x256x128xf32, #tpu.memory_space<vmem>>, vector<1x256x128xf32>
    %68 = vector.shape_cast %67 : vector<1x256x128xf32> to vector<256x128xf32>
    %c2_62 = arith.constant 2 : index
    %c1_63 = arith.constant 1 : index
    %c0_64 = arith.constant 0 : index
    %c0_65 = arith.constant 0 : index
    %69 = vector.load %arg2[%c2_62, %c1_63, %c0_64, %c0_65] : memref<3x3x128x128xbf16, #tpu.memory_space<vmem>>, vector<1x1x128x128xbf16>
    %70 = vector.shape_cast %69 : vector<1x1x128x128xbf16> to vector<128x128xbf16>
    %cst_66 = arith.constant dense<0.000000e+00> : vector<256x128xf32>
    %71 = tpu.matmul %66, %70, %cst_66 {dimension_numbers = #tpu.dot_dimension_numbers<[1], [0], [0], [1], [0, 0, 1, 1], [], []>} : vector<256x128xbf16>, vector<128x128xbf16>, vector<256x128xf32> -> vector<256x128xf32>
    %72 = arith.addf %68, %71 : vector<256x128xf32>
    %c0_67 = arith.constant 0 : index
    %c0_68 = arith.constant 0 : index
    %c0_69 = arith.constant 0 : index
    %73 = vector.load %arg3[%c0_67, %c0_68, %c0_69] : memref<1x256x128xf32, #tpu.memory_space<vmem>>, vector<1x256x128xf32>
    %74 = vector.shape_cast %73 : vector<1x256x128xf32> to vector<256x128xf32>
    %75 = vector.shape_cast %72 : vector<256x128xf32> to vector<1x256x128xf32>
    tpu.vector_store %arg3[%c0_67, %c0_68, %c0_69], %75 {strides = array<i32>} : memref<1x256x128xf32, #tpu.memory_space<vmem>>, vector<1x256x128xf32>,
    %76 = vector.extract_strided_slice %1 {offsets = [0, 2, 0], sizes = [18, 16, 128], strides = [1, 1, 1]} : vector<18x18x128xf32> to vector<18x16x128xf32>
    %77 = arith.truncf %76 : vector<18x16x128xf32> to vector<18x16x128xbf16>
    %78 = vector.extract_strided_slice %77 {offsets = [0, 0, 0], sizes = [16, 16, 128], strides = [1, 1, 1]} : vector<18x16x128xbf16> to vector<16x16x128xbf16>
    %79 = vector.shape_cast %78 : vector<16x16x128xbf16> to vector<256x128xbf16>
    %c0_70 = arith.constant 0 : index
    %c0_71 = arith.constant 0 : index
    %c0_72 = arith.constant 0 : index
    %80 = vector.load %arg3[%c0_70, %c0_71, %c0_72] : memref<1x256x128xf32, #tpu.memory_space<vmem>>, vector<1x256x128xf32>
    %81 = vector.shape_cast %80 : vector<1x256x128xf32> to vector<256x128xf32>
    %c0_73 = arith.constant 0 : index
    %c2_74 = arith.constant 2 : index
    %c0_75 = arith.constant 0 : index
    %c0_76 = arith.constant 0 : index
    %82 = vector.load %arg2[%c0_73, %c2_74, %c0_75, %c0_76] : memref<3x3x128x128xbf16, #tpu.memory_space<vmem>>, vector<1x1x128x128xbf16>
    %83 = vector.shape_cast %82 : vector<1x1x128x128xbf16> to vector<128x128xbf16>
    %cst_77 = arith.constant dense<0.000000e+00> : vector<256x128xf32>
    %84 = tpu.matmul %79, %83, %cst_77 {dimension_numbers = #tpu.dot_dimension_numbers<[1], [0], [0], [1], [0, 0, 1, 1], [], []>} : vector<256x128xbf16>, vector<128x128xbf16>, vector<256x128xf32> -> vector<256x128xf32>
    %85 = arith.addf %81, %84 : vector<256x128xf32>
    %c0_78 = arith.constant 0 : index
    %c0_79 = arith.constant 0 : index
    %c0_80 = arith.constant 0 : index
    %86 = vector.load %arg3[%c0_78, %c0_79, %c0_80] : memref<1x256x128xf32, #tpu.memory_space<vmem>>, vector<1x256x128xf32>
    %87 = vector.shape_cast %86 : vector<1x256x128xf32> to vector<256x128xf32>
    %88 = vector.shape_cast %85 : vector<256x128xf32> to vector<1x256x128xf32>
    tpu.vector_store %arg3[%c0_78, %c0_79, %c0_80], %88 {strides = array<i32>} : memref<1x256x128xf32, #tpu.memory_space<vmem>>, vector<1x256x128xf32>,
    %89 = vector.extract_strided_slice %77 {offsets = [1, 0, 0], sizes = [16, 16, 128], strides = [1, 1, 1]} : vector<18x16x128xbf16> to vector<16x16x128xbf16>
    %90 = vector.shape_cast %89 : vector<16x16x128xbf16> to vector<256x128xbf16>
    %c0_81 = arith.constant 0 : index
    %c0_82 = arith.constant 0 : index
    %c0_83 = arith.constant 0 : index
    %91 = vector.load %arg3[%c0_81, %c0_82, %c0_83] : memref<1x256x128xf32, #tpu.memory_space<vmem>>, vector<1x256x128xf32>
    %92 = vector.shape_cast %91 : vector<1x256x128xf32> to vector<256x128xf32>
    %c1_84 = arith.constant 1 : index
    %c2_85 = arith.constant 2 : index
    %c0_86 = arith.constant 0 : index
    %c0_87 = arith.constant 0 : index
    %93 = vector.load %arg2[%c1_84, %c2_85, %c0_86, %c0_87] : memref<3x3x128x128xbf16, #tpu.memory_space<vmem>>, vector<1x1x128x128xbf16>
    %94 = vector.shape_cast %93 : vector<1x1x128x128xbf16> to vector<128x128xbf16>
    %cst_88 = arith.constant dense<0.000000e+00> : vector<256x128xf32>
    %95 = tpu.matmul %90, %94, %cst_88 {dimension_numbers = #tpu.dot_dimension_numbers<[1], [0], [0], [1], [0, 0, 1, 1], [], []>} : vector<256x128xbf16>, vector<128x128xbf16>, vector<256x128xf32> -> vector<256x128xf32>
    %96 = arith.addf %92, %95 : vector<256x128xf32>
    %c0_89 = arith.constant 0 : index
    %c0_90 = arith.constant 0 : index
    %c0_91 = arith.constant 0 : index
    %97 = vector.load %arg3[%c0_89, %c0_90, %c0_91] : memref<1x256x128xf32, #tpu.memory_space<vmem>>, vector<1x256x128xf32>
    %98 = vector.shape_cast %97 : vector<1x256x128xf32> to vector<256x128xf32>
    %99 = vector.shape_cast %96 : vector<256x128xf32> to vector<1x256x128xf32>
    tpu.vector_store %arg3[%c0_89, %c0_90, %c0_91], %99 {strides = array<i32>} : memref<1x256x128xf32, #tpu.memory_space<vmem>>, vector<1x256x128xf32>,
    %100 = vector.extract_strided_slice %77 {offsets = [2, 0, 0], sizes = [16, 16, 128], strides = [1, 1, 1]} : vector<18x16x128xbf16> to vector<16x16x128xbf16>
    %101 = vector.shape_cast %100 : vector<16x16x128xbf16> to vector<256x128xbf16>
    %c0_92 = arith.constant 0 : index
    %c0_93 = arith.constant 0 : index
    %c0_94 = arith.constant 0 : index
    %102 = vector.load %arg3[%c0_92, %c0_93, %c0_94] : memref<1x256x128xf32, #tpu.memory_space<vmem>>, vector<1x256x128xf32>
    %103 = vector.shape_cast %102 : vector<1x256x128xf32> to vector<256x128xf32>
    %c2_95 = arith.constant 2 : index
    %c2_96 = arith.constant 2 : index
    %c0_97 = arith.constant 0 : index
    %c0_98 = arith.constant 0 : index
    %104 = vector.load %arg2[%c2_95, %c2_96, %c0_97, %c0_98] : memref<3x3x128x128xbf16, #tpu.memory_space<vmem>>, vector<1x1x128x128xbf16>
    %105 = vector.shape_cast %104 : vector<1x1x128x128xbf16> to vector<128x128xbf16>
    %cst_99 = arith.constant dense<0.000000e+00> : vector<256x128xf32>
    %106 = tpu.matmul %101, %105, %cst_99 {dimension_numbers = #tpu.dot_dimension_numbers<[1], [0], [0], [1], [0, 0, 1, 1], [], []>} : vector<256x128xbf16>, vector<128x128xbf16>, vector<256x128xf32> -> vector<256x128xf32>
    %107 = arith.addf %103, %106 : vector<256x128xf32>
    %c0_100 = arith.constant 0 : index
    %c0_101 = arith.constant 0 : index
    %c0_102 = arith.constant 0 : index
    %108 = vector.load %arg3[%c0_100, %c0_101, %c0_102] : memref<1x256x128xf32, #tpu.memory_space<vmem>>, vector<1x256x128xf32>
    %109 = vector.shape_cast %108 : vector<1x256x128xf32> to vector<256x128xf32>
    %110 = vector.shape_cast %107 : vector<256x128xf32> to vector<1x256x128xf32>
    tpu.vector_store %arg3[%c0_100, %c0_101, %c0_102], %110 {strides = array<i32>} : memref<1x256x128xf32, #tpu.memory_space<vmem>>, vector<1x256x128xf32>,
    %c0_103 = arith.constant 0 : index
    %c0_104 = arith.constant 0 : index
    %c0_105 = arith.constant 0 : index
    %111 = vector.load %arg3[%c0_103, %c0_104, %c0_105] : memref<1x256x128xf32, #tpu.memory_space<vmem>>, vector<1x256x128xf32>
    %112 = vector.shape_cast %111 : vector<1x256x128xf32> to vector<256x128xf32>
    %cst_106 = arith.constant dense<0.000000e+00> : vector<128xf32>
    %113 = vector.multi_reduction <add>, %112, %cst_106 [0] : vector<256x128xf32> to vector<128xf32>
    %114 = vector.shape_cast %113 : vector<128xf32> to vector<1x128xf32>
    %c0_107 = arith.constant 0 : index
    %c0_108 = arith.constant 0 : index
    %c0_109 = arith.constant 0 : index
    %115 = vector.load %arg4[%c0_107, %c0_108, %c0_109] : memref<1x2x128xf32, #tpu.memory_space<vmem>>, vector<1x1x128xf32>
    %116 = vector.shape_cast %115 : vector<1x1x128xf32> to vector<1x128xf32>
    %117 = vector.shape_cast %114 : vector<1x128xf32> to vector<1x1x128xf32>
    tpu.vector_store %arg4[%c0_107, %c0_108, %c0_109], %117 {strides = array<i32>} : memref<1x2x128xf32, #tpu.memory_space<vmem>>, vector<1x1x128xf32>,
    %118 = arith.mulf %112, %112 : vector<256x128xf32>
    %cst_110 = arith.constant dense<0.000000e+00> : vector<128xf32>
    %119 = vector.multi_reduction <add>, %118, %cst_110 [0] : vector<256x128xf32> to vector<128xf32>
    %120 = vector.shape_cast %119 : vector<128xf32> to vector<1x128xf32>
    %c0_111 = arith.constant 0 : index
    %c1_112 = arith.constant 1 : index
    %c0_113 = arith.constant 0 : index
    %121 = vector.load %arg4[%c0_111, %c1_112, %c0_113] : memref<1x2x128xf32, #tpu.memory_space<vmem>>, vector<1x1x128xf32>
    %122 = vector.shape_cast %121 : vector<1x1x128xf32> to vector<1x128xf32>
    %123 = vector.shape_cast %120 : vector<1x128xf32> to vector<1x1x128xf32>
    tpu.vector_store %arg4[%c0_111, %c1_112, %c0_113], %123 {strides = array<i32>} : memref<1x2x128xf32, #tpu.memory_space<vmem>>, vector<1x1x128xf32>,
    return
  }
  func.func @transform_0(%arg0: i32) -> (i32, i32, i32, i32) {
    %c0_i32 = arith.constant 0 : i32
    %c0_i32_0 = arith.constant 0 : i32
    %c0_i32_1 = arith.constant 0 : i32
    %c0_i32_2 = arith.constant 0 : i32
    return %arg0, %c0_i32, %c0_i32_0, %c0_i32_1 : i32, i32, i32, i32
  }
  func.func @transform_1(%arg0: i32) -> (i32, i32, i32, i32) {
    %c0_i32 = arith.constant 0 : i32
    %c0_i32_0 = arith.constant 0 : i32
    %c0_i32_1 = arith.constant 0 : i32
    %c0_i32_2 = arith.constant 0 : i32
    %c0_i32_3 = arith.constant 0 : i32
    return %c0_i32, %c0_i32_0, %c0_i32_1, %c0_i32_2 : i32, i32, i32, i32
  }
  func.func @transform_2(%arg0: i32) -> (i32, i32, i32) {
    %c0_i32 = arith.constant 0 : i32
    %c0_i32_0 = arith.constant 0 : i32
    %c0_i32_1 = arith.constant 0 : i32
    return %arg0, %c0_i32, %c0_i32_0 : i32, i32, i32
  }
  func.func @transform_3(%arg0: i32) -> (i32, i32, i32) {
    %c0_i32 = arith.constant 0 : i32
    %c0_i32_0 = arith.constant 0 : i32
    %c0_i32_1 = arith.constant 0 : i32
    return %arg0, %c0_i32, %c0_i32_0 : i32, i32, i32
  }
}

module attributes {stable_mosaic.version = 11 : i64} {
  func.func @_bn_relu_conv2_stats_kernel(%arg0: i32, %arg1: memref<1x256x128xf32, #tpu.memory_space<vmem>>, %arg2: memref<2x128xf32, #tpu.memory_space<vmem>>, %arg3: memref<3x3x128x128xbf16, #tpu.memory_space<vmem>>, %arg4: memref<1x256x128xf32, #tpu.memory_space<vmem>>, %arg5: memref<1x2x128xf32, #tpu.memory_space<vmem>>, %arg6: memref<18x18x128xf32, #tpu.memory_space<vmem>>) attributes {dimension_semantics = [#tpu.dimension_semantics<parallel>], iteration_bounds = array<i64: 2>, scalar_prefetch = 0 : i64, scratch_operands = 1 : i64, tpu.core_type = #tpu.core_type<tc>, window_params = [{transform_indices = @transform_0, window_bounds = array<i64: 1, 256, 128>}, {pipeline_mode = #tpu.pipeline_mode<synchronous>, transform_indices = @transform_1, window_bounds = array<i64: 2, 128>}, {pipeline_mode = #tpu.pipeline_mode<synchronous>, transform_indices = @transform_2, window_bounds = array<i64: 3, 3, 128, 128>}, {transform_indices = @transform_3, window_bounds = array<i64: 1, 256, 128>}, {transform_indices = @transform_4, window_bounds = array<i64: 1, 2, 128>}]} {
    %c0 = arith.constant 0 : index
    %c0_0 = arith.constant 0 : index
    %0 = vector.load %arg2[%c0, %c0_0] : memref<2x128xf32, #tpu.memory_space<vmem>>, vector<1x128xf32>
    %c1 = arith.constant 1 : index
    %c0_1 = arith.constant 0 : index
    %1 = vector.load %arg2[%c1, %c0_1] : memref<2x128xf32, #tpu.memory_space<vmem>>, vector<1x128xf32>
    %c0_2 = arith.constant 0 : index
    %c0_3 = arith.constant 0 : index
    %c0_4 = arith.constant 0 : index
    %2 = vector.load %arg1[%c0_2, %c0_3, %c0_4] : memref<1x256x128xf32, #tpu.memory_space<vmem>>, vector<1x256x128xf32>
    %3 = vector.shape_cast %2 : vector<1x256x128xf32> to vector<256x128xf32>
    %4 = vector.broadcast %0 : vector<1x128xf32> to vector<256x128xf32>
    %5 = arith.mulf %3, %4 : vector<256x128xf32>
    %6 = vector.broadcast %1 : vector<1x128xf32> to vector<256x128xf32>
    %7 = arith.addf %5, %6 : vector<256x128xf32>
    %cst = arith.constant 0.000000e+00 : f32
    %8 = vector.broadcast %cst : f32 to vector<256x128xf32>
    %9 = arith.maximumf %7, %8 : vector<256x128xf32>
    %cst_5 = arith.constant 0.000000e+00 : f32
    %10 = vector.broadcast %cst_5 : f32 to vector<1x18x128xf32>
    %cst_6 = arith.constant 0.000000e+00 : f32
    %11 = vector.broadcast %cst_6 : f32 to vector<18x1x128xf32>
    %c0_7 = arith.constant 0 : index
    %c0_8 = arith.constant 0 : index
    %c0_9 = arith.constant 0 : index
    %12 = vector.load %arg6[%c0_7, %c0_8, %c0_9] : memref<18x18x128xf32, #tpu.memory_space<vmem>>, vector<1x18x128xf32>
    tpu.vector_store %arg6[%c0_7, %c0_8, %c0_9], %10 {strides = array<i32>} : memref<18x18x128xf32, #tpu.memory_space<vmem>>, vector<1x18x128xf32>,
    %c17 = arith.constant 17 : index
    %c0_10 = arith.constant 0 : index
    %c0_11 = arith.constant 0 : index
    %13 = vector.load %arg6[%c17, %c0_10, %c0_11] : memref<18x18x128xf32, #tpu.memory_space<vmem>>, vector<1x18x128xf32>
    tpu.vector_store %arg6[%c17, %c0_10, %c0_11], %10 {strides = array<i32>} : memref<18x18x128xf32, #tpu.memory_space<vmem>>, vector<1x18x128xf32>,
    %c0_12 = arith.constant 0 : index
    %c0_13 = arith.constant 0 : index
    %c0_14 = arith.constant 0 : index
    %14 = vector.load %arg6[%c0_12, %c0_13, %c0_14] : memref<18x18x128xf32, #tpu.memory_space<vmem>>, vector<18x1x128xf32>
    tpu.vector_store %arg6[%c0_12, %c0_13, %c0_14], %11 {strides = array<i32>} : memref<18x18x128xf32, #tpu.memory_space<vmem>>, vector<18x1x128xf32>,
    %c0_15 = arith.constant 0 : index
    %c17_16 = arith.constant 17 : index
    %c0_17 = arith.constant 0 : index
    %15 = vector.load %arg6[%c0_15, %c17_16, %c0_17] : memref<18x18x128xf32, #tpu.memory_space<vmem>>, vector<18x1x128xf32>
    tpu.vector_store %arg6[%c0_15, %c17_16, %c0_17], %11 {strides = array<i32>} : memref<18x18x128xf32, #tpu.memory_space<vmem>>, vector<18x1x128xf32>,
    %16 = vector.shape_cast %9 : vector<256x128xf32> to vector<16x16x128xf32>
    %c1_18 = arith.constant 1 : index
    %c1_19 = arith.constant 1 : index
    %c0_20 = arith.constant 0 : index
    %17 = vector.load %arg6[%c1_18, %c1_19, %c0_20] : memref<18x18x128xf32, #tpu.memory_space<vmem>>, vector<16x16x128xf32>
    tpu.vector_store %arg6[%c1_18, %c1_19, %c0_20], %16 {strides = array<i32>} : memref<18x18x128xf32, #tpu.memory_space<vmem>>, vector<16x16x128xf32>,
    %c0_21 = arith.constant 0 : index
    %c0_22 = arith.constant 0 : index
    %c0_23 = arith.constant 0 : index
    %18 = vector.load %arg6[%c0_21, %c0_22, %c0_23] : memref<18x18x128xf32, #tpu.memory_space<vmem>>, vector<18x18x128xf32>
    %cst_24 = arith.constant 0.000000e+00 : f32
    %19 = vector.broadcast %cst_24 : f32 to vector<256x128xf32>
    %c0_25 = arith.constant 0 : index
    %c0_26 = arith.constant 0 : index
    %c0_27 = arith.constant 0 : index
    %20 = vector.load %arg4[%c0_25, %c0_26, %c0_27] : memref<1x256x128xf32, #tpu.memory_space<vmem>>, vector<1x256x128xf32>
    %21 = vector.shape_cast %20 : vector<1x256x128xf32> to vector<256x128xf32>
    %22 = vector.shape_cast %19 : vector<256x128xf32> to vector<1x256x128xf32>
    tpu.vector_store %arg4[%c0_25, %c0_26, %c0_27], %22 {strides = array<i32>} : memref<1x256x128xf32, #tpu.memory_space<vmem>>, vector<1x256x128xf32>,
    %23 = vector.extract_strided_slice %18 {offsets = [0, 0, 0], sizes = [18, 16, 128], strides = [1, 1, 1]} : vector<18x18x128xf32> to vector<18x16x128xf32>
    %24 = arith.truncf %23 : vector<18x16x128xf32> to vector<18x16x128xbf16>
    %25 = vector.extract_strided_slice %24 {offsets = [0, 0, 0], sizes = [16, 16, 128], strides = [1, 1, 1]} : vector<18x16x128xbf16> to vector<16x16x128xbf16>
    %26 = vector.shape_cast %25 : vector<16x16x128xbf16> to vector<256x128xbf16>
    %c0_28 = arith.constant 0 : index
    %c0_29 = arith.constant 0 : index
    %c0_30 = arith.constant 0 : index
    %27 = vector.load %arg4[%c0_28, %c0_29, %c0_30] : memref<1x256x128xf32, #tpu.memory_space<vmem>>, vector<1x256x128xf32>
    %28 = vector.shape_cast %27 : vector<1x256x128xf32> to vector<256x128xf32>
    %c0_31 = arith.constant 0 : index
    %c0_32 = arith.constant 0 : index
    %c0_33 = arith.constant 0 : index
    %c0_34 = arith.constant 0 : index
    %29 = vector.load %arg3[%c0_31, %c0_32, %c0_33, %c0_34] : memref<3x3x128x128xbf16, #tpu.memory_space<vmem>>, vector<1x1x128x128xbf16>
    %30 = vector.shape_cast %29 : vector<1x1x128x128xbf16> to vector<128x128xbf16>
    %cst_35 = arith.constant dense<0.000000e+00> : vector<256x128xf32>
    %31 = tpu.matmul %26, %30, %cst_35 {dimension_numbers = #tpu.dot_dimension_numbers<[1], [0], [0], [1], [0, 0, 1, 1], [], []>} : vector<256x128xbf16>, vector<128x128xbf16>, vector<256x128xf32> -> vector<256x128xf32>
    %32 = arith.addf %28, %31 : vector<256x128xf32>
    %c0_36 = arith.constant 0 : index
    %c0_37 = arith.constant 0 : index
    %c0_38 = arith.constant 0 : index
    %33 = vector.load %arg4[%c0_36, %c0_37, %c0_38] : memref<1x256x128xf32, #tpu.memory_space<vmem>>, vector<1x256x128xf32>
    %34 = vector.shape_cast %33 : vector<1x256x128xf32> to vector<256x128xf32>
    %35 = vector.shape_cast %32 : vector<256x128xf32> to vector<1x256x128xf32>
    tpu.vector_store %arg4[%c0_36, %c0_37, %c0_38], %35 {strides = array<i32>} : memref<1x256x128xf32, #tpu.memory_space<vmem>>, vector<1x256x128xf32>,
    %36 = vector.extract_strided_slice %24 {offsets = [1, 0, 0], sizes = [16, 16, 128], strides = [1, 1, 1]} : vector<18x16x128xbf16> to vector<16x16x128xbf16>
    %37 = vector.shape_cast %36 : vector<16x16x128xbf16> to vector<256x128xbf16>
    %c0_39 = arith.constant 0 : index
    %c0_40 = arith.constant 0 : index
    %c0_41 = arith.constant 0 : index
    %38 = vector.load %arg4[%c0_39, %c0_40, %c0_41] : memref<1x256x128xf32, #tpu.memory_space<vmem>>, vector<1x256x128xf32>
    %39 = vector.shape_cast %38 : vector<1x256x128xf32> to vector<256x128xf32>
    %c1_42 = arith.constant 1 : index
    %c0_43 = arith.constant 0 : index
    %c0_44 = arith.constant 0 : index
    %c0_45 = arith.constant 0 : index
    %40 = vector.load %arg3[%c1_42, %c0_43, %c0_44, %c0_45] : memref<3x3x128x128xbf16, #tpu.memory_space<vmem>>, vector<1x1x128x128xbf16>
    %41 = vector.shape_cast %40 : vector<1x1x128x128xbf16> to vector<128x128xbf16>
    %cst_46 = arith.constant dense<0.000000e+00> : vector<256x128xf32>
    %42 = tpu.matmul %37, %41, %cst_46 {dimension_numbers = #tpu.dot_dimension_numbers<[1], [0], [0], [1], [0, 0, 1, 1], [], []>} : vector<256x128xbf16>, vector<128x128xbf16>, vector<256x128xf32> -> vector<256x128xf32>
    %43 = arith.addf %39, %42 : vector<256x128xf32>
    %c0_47 = arith.constant 0 : index
    %c0_48 = arith.constant 0 : index
    %c0_49 = arith.constant 0 : index
    %44 = vector.load %arg4[%c0_47, %c0_48, %c0_49] : memref<1x256x128xf32, #tpu.memory_space<vmem>>, vector<1x256x128xf32>
    %45 = vector.shape_cast %44 : vector<1x256x128xf32> to vector<256x128xf32>
    %46 = vector.shape_cast %43 : vector<256x128xf32> to vector<1x256x128xf32>
    tpu.vector_store %arg4[%c0_47, %c0_48, %c0_49], %46 {strides = array<i32>} : memref<1x256x128xf32, #tpu.memory_space<vmem>>, vector<1x256x128xf32>,
    %47 = vector.extract_strided_slice %24 {offsets = [2, 0, 0], sizes = [16, 16, 128], strides = [1, 1, 1]} : vector<18x16x128xbf16> to vector<16x16x128xbf16>
    %48 = vector.shape_cast %47 : vector<16x16x128xbf16> to vector<256x128xbf16>
    %c0_50 = arith.constant 0 : index
    %c0_51 = arith.constant 0 : index
    %c0_52 = arith.constant 0 : index
    %49 = vector.load %arg4[%c0_50, %c0_51, %c0_52] : memref<1x256x128xf32, #tpu.memory_space<vmem>>, vector<1x256x128xf32>
    %50 = vector.shape_cast %49 : vector<1x256x128xf32> to vector<256x128xf32>
    %c2 = arith.constant 2 : index
    %c0_53 = arith.constant 0 : index
    %c0_54 = arith.constant 0 : index
    %c0_55 = arith.constant 0 : index
    %51 = vector.load %arg3[%c2, %c0_53, %c0_54, %c0_55] : memref<3x3x128x128xbf16, #tpu.memory_space<vmem>>, vector<1x1x128x128xbf16>
    %52 = vector.shape_cast %51 : vector<1x1x128x128xbf16> to vector<128x128xbf16>
    %cst_56 = arith.constant dense<0.000000e+00> : vector<256x128xf32>
    %53 = tpu.matmul %48, %52, %cst_56 {dimension_numbers = #tpu.dot_dimension_numbers<[1], [0], [0], [1], [0, 0, 1, 1], [], []>} : vector<256x128xbf16>, vector<128x128xbf16>, vector<256x128xf32> -> vector<256x128xf32>
    %54 = arith.addf %50, %53 : vector<256x128xf32>
    %c0_57 = arith.constant 0 : index
    %c0_58 = arith.constant 0 : index
    %c0_59 = arith.constant 0 : index
    %55 = vector.load %arg4[%c0_57, %c0_58, %c0_59] : memref<1x256x128xf32, #tpu.memory_space<vmem>>, vector<1x256x128xf32>
    %56 = vector.shape_cast %55 : vector<1x256x128xf32> to vector<256x128xf32>
    %57 = vector.shape_cast %54 : vector<256x128xf32> to vector<1x256x128xf32>
    tpu.vector_store %arg4[%c0_57, %c0_58, %c0_59], %57 {strides = array<i32>} : memref<1x256x128xf32, #tpu.memory_space<vmem>>, vector<1x256x128xf32>,
    %58 = vector.extract_strided_slice %18 {offsets = [0, 1, 0], sizes = [18, 16, 128], strides = [1, 1, 1]} : vector<18x18x128xf32> to vector<18x16x128xf32>
    %59 = arith.truncf %58 : vector<18x16x128xf32> to vector<18x16x128xbf16>
    %60 = vector.extract_strided_slice %59 {offsets = [0, 0, 0], sizes = [16, 16, 128], strides = [1, 1, 1]} : vector<18x16x128xbf16> to vector<16x16x128xbf16>
    %61 = vector.shape_cast %60 : vector<16x16x128xbf16> to vector<256x128xbf16>
    %c0_60 = arith.constant 0 : index
    %c0_61 = arith.constant 0 : index
    %c0_62 = arith.constant 0 : index
    %62 = vector.load %arg4[%c0_60, %c0_61, %c0_62] : memref<1x256x128xf32, #tpu.memory_space<vmem>>, vector<1x256x128xf32>
    %63 = vector.shape_cast %62 : vector<1x256x128xf32> to vector<256x128xf32>
    %c0_63 = arith.constant 0 : index
    %c1_64 = arith.constant 1 : index
    %c0_65 = arith.constant 0 : index
    %c0_66 = arith.constant 0 : index
    %64 = vector.load %arg3[%c0_63, %c1_64, %c0_65, %c0_66] : memref<3x3x128x128xbf16, #tpu.memory_space<vmem>>, vector<1x1x128x128xbf16>
    %65 = vector.shape_cast %64 : vector<1x1x128x128xbf16> to vector<128x128xbf16>
    %cst_67 = arith.constant dense<0.000000e+00> : vector<256x128xf32>
    %66 = tpu.matmul %61, %65, %cst_67 {dimension_numbers = #tpu.dot_dimension_numbers<[1], [0], [0], [1], [0, 0, 1, 1], [], []>} : vector<256x128xbf16>, vector<128x128xbf16>, vector<256x128xf32> -> vector<256x128xf32>
    %67 = arith.addf %63, %66 : vector<256x128xf32>
    %c0_68 = arith.constant 0 : index
    %c0_69 = arith.constant 0 : index
    %c0_70 = arith.constant 0 : index
    %68 = vector.load %arg4[%c0_68, %c0_69, %c0_70] : memref<1x256x128xf32, #tpu.memory_space<vmem>>, vector<1x256x128xf32>
    %69 = vector.shape_cast %68 : vector<1x256x128xf32> to vector<256x128xf32>
    %70 = vector.shape_cast %67 : vector<256x128xf32> to vector<1x256x128xf32>
    tpu.vector_store %arg4[%c0_68, %c0_69, %c0_70], %70 {strides = array<i32>} : memref<1x256x128xf32, #tpu.memory_space<vmem>>, vector<1x256x128xf32>,
    %71 = vector.extract_strided_slice %59 {offsets = [1, 0, 0], sizes = [16, 16, 128], strides = [1, 1, 1]} : vector<18x16x128xbf16> to vector<16x16x128xbf16>
    %72 = vector.shape_cast %71 : vector<16x16x128xbf16> to vector<256x128xbf16>
    %c0_71 = arith.constant 0 : index
    %c0_72 = arith.constant 0 : index
    %c0_73 = arith.constant 0 : index
    %73 = vector.load %arg4[%c0_71, %c0_72, %c0_73] : memref<1x256x128xf32, #tpu.memory_space<vmem>>, vector<1x256x128xf32>
    %74 = vector.shape_cast %73 : vector<1x256x128xf32> to vector<256x128xf32>
    %c1_74 = arith.constant 1 : index
    %c1_75 = arith.constant 1 : index
    %c0_76 = arith.constant 0 : index
    %c0_77 = arith.constant 0 : index
    %75 = vector.load %arg3[%c1_74, %c1_75, %c0_76, %c0_77] : memref<3x3x128x128xbf16, #tpu.memory_space<vmem>>, vector<1x1x128x128xbf16>
    %76 = vector.shape_cast %75 : vector<1x1x128x128xbf16> to vector<128x128xbf16>
    %cst_78 = arith.constant dense<0.000000e+00> : vector<256x128xf32>
    %77 = tpu.matmul %72, %76, %cst_78 {dimension_numbers = #tpu.dot_dimension_numbers<[1], [0], [0], [1], [0, 0, 1, 1], [], []>} : vector<256x128xbf16>, vector<128x128xbf16>, vector<256x128xf32> -> vector<256x128xf32>
    %78 = arith.addf %74, %77 : vector<256x128xf32>
    %c0_79 = arith.constant 0 : index
    %c0_80 = arith.constant 0 : index
    %c0_81 = arith.constant 0 : index
    %79 = vector.load %arg4[%c0_79, %c0_80, %c0_81] : memref<1x256x128xf32, #tpu.memory_space<vmem>>, vector<1x256x128xf32>
    %80 = vector.shape_cast %79 : vector<1x256x128xf32> to vector<256x128xf32>
    %81 = vector.shape_cast %78 : vector<256x128xf32> to vector<1x256x128xf32>
    tpu.vector_store %arg4[%c0_79, %c0_80, %c0_81], %81 {strides = array<i32>} : memref<1x256x128xf32, #tpu.memory_space<vmem>>, vector<1x256x128xf32>,
    %82 = vector.extract_strided_slice %59 {offsets = [2, 0, 0], sizes = [16, 16, 128], strides = [1, 1, 1]} : vector<18x16x128xbf16> to vector<16x16x128xbf16>
    %83 = vector.shape_cast %82 : vector<16x16x128xbf16> to vector<256x128xbf16>
    %c0_82 = arith.constant 0 : index
    %c0_83 = arith.constant 0 : index
    %c0_84 = arith.constant 0 : index
    %84 = vector.load %arg4[%c0_82, %c0_83, %c0_84] : memref<1x256x128xf32, #tpu.memory_space<vmem>>, vector<1x256x128xf32>
    %85 = vector.shape_cast %84 : vector<1x256x128xf32> to vector<256x128xf32>
    %c2_85 = arith.constant 2 : index
    %c1_86 = arith.constant 1 : index
    %c0_87 = arith.constant 0 : index
    %c0_88 = arith.constant 0 : index
    %86 = vector.load %arg3[%c2_85, %c1_86, %c0_87, %c0_88] : memref<3x3x128x128xbf16, #tpu.memory_space<vmem>>, vector<1x1x128x128xbf16>
    %87 = vector.shape_cast %86 : vector<1x1x128x128xbf16> to vector<128x128xbf16>
    %cst_89 = arith.constant dense<0.000000e+00> : vector<256x128xf32>
    %88 = tpu.matmul %83, %87, %cst_89 {dimension_numbers = #tpu.dot_dimension_numbers<[1], [0], [0], [1], [0, 0, 1, 1], [], []>} : vector<256x128xbf16>, vector<128x128xbf16>, vector<256x128xf32> -> vector<256x128xf32>
    %89 = arith.addf %85, %88 : vector<256x128xf32>
    %c0_90 = arith.constant 0 : index
    %c0_91 = arith.constant 0 : index
    %c0_92 = arith.constant 0 : index
    %90 = vector.load %arg4[%c0_90, %c0_91, %c0_92] : memref<1x256x128xf32, #tpu.memory_space<vmem>>, vector<1x256x128xf32>
    %91 = vector.shape_cast %90 : vector<1x256x128xf32> to vector<256x128xf32>
    %92 = vector.shape_cast %89 : vector<256x128xf32> to vector<1x256x128xf32>
    tpu.vector_store %arg4[%c0_90, %c0_91, %c0_92], %92 {strides = array<i32>} : memref<1x256x128xf32, #tpu.memory_space<vmem>>, vector<1x256x128xf32>,
    %93 = vector.extract_strided_slice %18 {offsets = [0, 2, 0], sizes = [18, 16, 128], strides = [1, 1, 1]} : vector<18x18x128xf32> to vector<18x16x128xf32>
    %94 = arith.truncf %93 : vector<18x16x128xf32> to vector<18x16x128xbf16>
    %95 = vector.extract_strided_slice %94 {offsets = [0, 0, 0], sizes = [16, 16, 128], strides = [1, 1, 1]} : vector<18x16x128xbf16> to vector<16x16x128xbf16>
    %96 = vector.shape_cast %95 : vector<16x16x128xbf16> to vector<256x128xbf16>
    %c0_93 = arith.constant 0 : index
    %c0_94 = arith.constant 0 : index
    %c0_95 = arith.constant 0 : index
    %97 = vector.load %arg4[%c0_93, %c0_94, %c0_95] : memref<1x256x128xf32, #tpu.memory_space<vmem>>, vector<1x256x128xf32>
    %98 = vector.shape_cast %97 : vector<1x256x128xf32> to vector<256x128xf32>
    %c0_96 = arith.constant 0 : index
    %c2_97 = arith.constant 2 : index
    %c0_98 = arith.constant 0 : index
    %c0_99 = arith.constant 0 : index
    %99 = vector.load %arg3[%c0_96, %c2_97, %c0_98, %c0_99] : memref<3x3x128x128xbf16, #tpu.memory_space<vmem>>, vector<1x1x128x128xbf16>
    %100 = vector.shape_cast %99 : vector<1x1x128x128xbf16> to vector<128x128xbf16>
    %cst_100 = arith.constant dense<0.000000e+00> : vector<256x128xf32>
    %101 = tpu.matmul %96, %100, %cst_100 {dimension_numbers = #tpu.dot_dimension_numbers<[1], [0], [0], [1], [0, 0, 1, 1], [], []>} : vector<256x128xbf16>, vector<128x128xbf16>, vector<256x128xf32> -> vector<256x128xf32>
    %102 = arith.addf %98, %101 : vector<256x128xf32>
    %c0_101 = arith.constant 0 : index
    %c0_102 = arith.constant 0 : index
    %c0_103 = arith.constant 0 : index
    %103 = vector.load %arg4[%c0_101, %c0_102, %c0_103] : memref<1x256x128xf32, #tpu.memory_space<vmem>>, vector<1x256x128xf32>
    %104 = vector.shape_cast %103 : vector<1x256x128xf32> to vector<256x128xf32>
    %105 = vector.shape_cast %102 : vector<256x128xf32> to vector<1x256x128xf32>
    tpu.vector_store %arg4[%c0_101, %c0_102, %c0_103], %105 {strides = array<i32>} : memref<1x256x128xf32, #tpu.memory_space<vmem>>, vector<1x256x128xf32>,
    %106 = vector.extract_strided_slice %94 {offsets = [1, 0, 0], sizes = [16, 16, 128], strides = [1, 1, 1]} : vector<18x16x128xbf16> to vector<16x16x128xbf16>
    %107 = vector.shape_cast %106 : vector<16x16x128xbf16> to vector<256x128xbf16>
    %c0_104 = arith.constant 0 : index
    %c0_105 = arith.constant 0 : index
    %c0_106 = arith.constant 0 : index
    %108 = vector.load %arg4[%c0_104, %c0_105, %c0_106] : memref<1x256x128xf32, #tpu.memory_space<vmem>>, vector<1x256x128xf32>
    %109 = vector.shape_cast %108 : vector<1x256x128xf32> to vector<256x128xf32>
    %c1_107 = arith.constant 1 : index
    %c2_108 = arith.constant 2 : index
    %c0_109 = arith.constant 0 : index
    %c0_110 = arith.constant 0 : index
    %110 = vector.load %arg3[%c1_107, %c2_108, %c0_109, %c0_110] : memref<3x3x128x128xbf16, #tpu.memory_space<vmem>>, vector<1x1x128x128xbf16>
    %111 = vector.shape_cast %110 : vector<1x1x128x128xbf16> to vector<128x128xbf16>
    %cst_111 = arith.constant dense<0.000000e+00> : vector<256x128xf32>
    %112 = tpu.matmul %107, %111, %cst_111 {dimension_numbers = #tpu.dot_dimension_numbers<[1], [0], [0], [1], [0, 0, 1, 1], [], []>} : vector<256x128xbf16>, vector<128x128xbf16>, vector<256x128xf32> -> vector<256x128xf32>
    %113 = arith.addf %109, %112 : vector<256x128xf32>
    %c0_112 = arith.constant 0 : index
    %c0_113 = arith.constant 0 : index
    %c0_114 = arith.constant 0 : index
    %114 = vector.load %arg4[%c0_112, %c0_113, %c0_114] : memref<1x256x128xf32, #tpu.memory_space<vmem>>, vector<1x256x128xf32>
    %115 = vector.shape_cast %114 : vector<1x256x128xf32> to vector<256x128xf32>
    %116 = vector.shape_cast %113 : vector<256x128xf32> to vector<1x256x128xf32>
    tpu.vector_store %arg4[%c0_112, %c0_113, %c0_114], %116 {strides = array<i32>} : memref<1x256x128xf32, #tpu.memory_space<vmem>>, vector<1x256x128xf32>,
    %117 = vector.extract_strided_slice %94 {offsets = [2, 0, 0], sizes = [16, 16, 128], strides = [1, 1, 1]} : vector<18x16x128xbf16> to vector<16x16x128xbf16>
    %118 = vector.shape_cast %117 : vector<16x16x128xbf16> to vector<256x128xbf16>
    %c0_115 = arith.constant 0 : index
    %c0_116 = arith.constant 0 : index
    %c0_117 = arith.constant 0 : index
    %119 = vector.load %arg4[%c0_115, %c0_116, %c0_117] : memref<1x256x128xf32, #tpu.memory_space<vmem>>, vector<1x256x128xf32>
    %120 = vector.shape_cast %119 : vector<1x256x128xf32> to vector<256x128xf32>
    %c2_118 = arith.constant 2 : index
    %c2_119 = arith.constant 2 : index
    %c0_120 = arith.constant 0 : index
    %c0_121 = arith.constant 0 : index
    %121 = vector.load %arg3[%c2_118, %c2_119, %c0_120, %c0_121] : memref<3x3x128x128xbf16, #tpu.memory_space<vmem>>, vector<1x1x128x128xbf16>
    %122 = vector.shape_cast %121 : vector<1x1x128x128xbf16> to vector<128x128xbf16>
    %cst_122 = arith.constant dense<0.000000e+00> : vector<256x128xf32>
    %123 = tpu.matmul %118, %122, %cst_122 {dimension_numbers = #tpu.dot_dimension_numbers<[1], [0], [0], [1], [0, 0, 1, 1], [], []>} : vector<256x128xbf16>, vector<128x128xbf16>, vector<256x128xf32> -> vector<256x128xf32>
    %124 = arith.addf %120, %123 : vector<256x128xf32>
    %c0_123 = arith.constant 0 : index
    %c0_124 = arith.constant 0 : index
    %c0_125 = arith.constant 0 : index
    %125 = vector.load %arg4[%c0_123, %c0_124, %c0_125] : memref<1x256x128xf32, #tpu.memory_space<vmem>>, vector<1x256x128xf32>
    %126 = vector.shape_cast %125 : vector<1x256x128xf32> to vector<256x128xf32>
    %127 = vector.shape_cast %124 : vector<256x128xf32> to vector<1x256x128xf32>
    tpu.vector_store %arg4[%c0_123, %c0_124, %c0_125], %127 {strides = array<i32>} : memref<1x256x128xf32, #tpu.memory_space<vmem>>, vector<1x256x128xf32>,
    %c0_126 = arith.constant 0 : index
    %c0_127 = arith.constant 0 : index
    %c0_128 = arith.constant 0 : index
    %128 = vector.load %arg4[%c0_126, %c0_127, %c0_128] : memref<1x256x128xf32, #tpu.memory_space<vmem>>, vector<1x256x128xf32>
    %129 = vector.shape_cast %128 : vector<1x256x128xf32> to vector<256x128xf32>
    %cst_129 = arith.constant dense<0.000000e+00> : vector<128xf32>
    %130 = vector.multi_reduction <add>, %129, %cst_129 [0] : vector<256x128xf32> to vector<128xf32>
    %131 = vector.shape_cast %130 : vector<128xf32> to vector<1x128xf32>
    %c0_130 = arith.constant 0 : index
    %c0_131 = arith.constant 0 : index
    %c0_132 = arith.constant 0 : index
    %132 = vector.load %arg5[%c0_130, %c0_131, %c0_132] : memref<1x2x128xf32, #tpu.memory_space<vmem>>, vector<1x1x128xf32>
    %133 = vector.shape_cast %132 : vector<1x1x128xf32> to vector<1x128xf32>
    %134 = vector.shape_cast %131 : vector<1x128xf32> to vector<1x1x128xf32>
    tpu.vector_store %arg5[%c0_130, %c0_131, %c0_132], %134 {strides = array<i32>} : memref<1x2x128xf32, #tpu.memory_space<vmem>>, vector<1x1x128xf32>,
    %135 = arith.mulf %129, %129 : vector<256x128xf32>
    %cst_133 = arith.constant dense<0.000000e+00> : vector<128xf32>
    %136 = vector.multi_reduction <add>, %135, %cst_133 [0] : vector<256x128xf32> to vector<128xf32>
    %137 = vector.shape_cast %136 : vector<128xf32> to vector<1x128xf32>
    %c0_134 = arith.constant 0 : index
    %c1_135 = arith.constant 1 : index
    %c0_136 = arith.constant 0 : index
    %138 = vector.load %arg5[%c0_134, %c1_135, %c0_136] : memref<1x2x128xf32, #tpu.memory_space<vmem>>, vector<1x1x128xf32>
    %139 = vector.shape_cast %138 : vector<1x1x128xf32> to vector<1x128xf32>
    %140 = vector.shape_cast %137 : vector<1x128xf32> to vector<1x1x128xf32>
    tpu.vector_store %arg5[%c0_134, %c1_135, %c0_136], %140 {strides = array<i32>} : memref<1x2x128xf32, #tpu.memory_space<vmem>>, vector<1x1x128xf32>,
    return
  }
  func.func @transform_0(%arg0: i32) -> (i32, i32, i32) {
    %c0_i32 = arith.constant 0 : i32
    %c0_i32_0 = arith.constant 0 : i32
    %c0_i32_1 = arith.constant 0 : i32
    return %arg0, %c0_i32, %c0_i32_0 : i32, i32, i32
  }
  func.func @transform_1(%arg0: i32) -> (i32, i32) {
    %c0_i32 = arith.constant 0 : i32
    %c0_i32_0 = arith.constant 0 : i32
    %c0_i32_1 = arith.constant 0 : i32
    return %c0_i32, %c0_i32_0 : i32, i32
  }
  func.func @transform_2(%arg0: i32) -> (i32, i32, i32, i32) {
    %c0_i32 = arith.constant 0 : i32
    %c0_i32_0 = arith.constant 0 : i32
    %c0_i32_1 = arith.constant 0 : i32
    %c0_i32_2 = arith.constant 0 : i32
    %c0_i32_3 = arith.constant 0 : i32
    return %c0_i32, %c0_i32_0, %c0_i32_1, %c0_i32_2 : i32, i32, i32, i32
  }
  func.func @transform_3(%arg0: i32) -> (i32, i32, i32) {
    %c0_i32 = arith.constant 0 : i32
    %c0_i32_0 = arith.constant 0 : i32
    %c0_i32_1 = arith.constant 0 : i32
    return %arg0, %c0_i32, %c0_i32_0 : i32, i32, i32
  }
  func.func @transform_4(%arg0: i32) -> (i32, i32, i32) {
    %c0_i32 = arith.constant 0 : i32
    %c0_i32_0 = arith.constant 0 : i32
    %c0_i32_1 = arith.constant 0 : i32
    return %arg0, %c0_i32, %c0_i32_0 : i32, i32, i32
  }
}

module attributes {stable_mosaic.version = 11 : i64} {
  func.func @_bn_relu_kernel(%arg0: i32, %arg1: memref<1x256x128xf32, #tpu.memory_space<vmem>>, %arg2: memref<2x128xf32, #tpu.memory_space<vmem>>, %arg3: memref<1x256x128xf32, #tpu.memory_space<vmem>>) attributes {dimension_semantics = [#tpu.dimension_semantics<parallel>], iteration_bounds = array<i64: 2>, scalar_prefetch = 0 : i64, scratch_operands = 0 : i64, tpu.core_type = #tpu.core_type<tc>, window_params = [{transform_indices = @transform_0, window_bounds = array<i64: 1, 256, 128>}, {pipeline_mode = #tpu.pipeline_mode<synchronous>, transform_indices = @transform_1, window_bounds = array<i64: 2, 128>}, {transform_indices = @transform_2, window_bounds = array<i64: 1, 256, 128>}]} {
    %c0 = arith.constant 0 : index
    %c0_0 = arith.constant 0 : index
    %c0_1 = arith.constant 0 : index
    %0 = vector.load %arg1[%c0, %c0_0, %c0_1] : memref<1x256x128xf32, #tpu.memory_space<vmem>>, vector<1x256x128xf32>
    %1 = vector.shape_cast %0 : vector<1x256x128xf32> to vector<256x128xf32>
    %c0_2 = arith.constant 0 : index
    %c0_3 = arith.constant 0 : index
    %2 = vector.load %arg2[%c0_2, %c0_3] : memref<2x128xf32, #tpu.memory_space<vmem>>, vector<1x128xf32>
    %3 = vector.broadcast %2 : vector<1x128xf32> to vector<256x128xf32>
    %4 = arith.mulf %1, %3 : vector<256x128xf32>
    %c1 = arith.constant 1 : index
    %c0_4 = arith.constant 0 : index
    %5 = vector.load %arg2[%c1, %c0_4] : memref<2x128xf32, #tpu.memory_space<vmem>>, vector<1x128xf32>
    %6 = vector.broadcast %5 : vector<1x128xf32> to vector<256x128xf32>
    %7 = arith.addf %4, %6 : vector<256x128xf32>
    %cst = arith.constant 0.000000e+00 : f32
    %8 = vector.broadcast %cst : f32 to vector<256x128xf32>
    %9 = arith.maximumf %7, %8 : vector<256x128xf32>
    %c0_5 = arith.constant 0 : index
    %c0_6 = arith.constant 0 : index
    %c0_7 = arith.constant 0 : index
    %10 = vector.load %arg3[%c0_5, %c0_6, %c0_7] : memref<1x256x128xf32, #tpu.memory_space<vmem>>, vector<1x256x128xf32>
    %11 = vector.shape_cast %10 : vector<1x256x128xf32> to vector<256x128xf32>
    %12 = vector.shape_cast %9 : vector<256x128xf32> to vector<1x256x128xf32>
    tpu.vector_store %arg3[%c0_5, %c0_6, %c0_7], %12 {strides = array<i32>} : memref<1x256x128xf32, #tpu.memory_space<vmem>>, vector<1x256x128xf32>,
    return
  }
  func.func @transform_0(%arg0: i32) -> (i32, i32, i32) {
    %c0_i32 = arith.constant 0 : i32
    %c0_i32_0 = arith.constant 0 : i32
    %c0_i32_1 = arith.constant 0 : i32
    return %arg0, %c0_i32, %c0_i32_0 : i32, i32, i32
  }
  func.func @transform_1(%arg0: i32) -> (i32, i32) {
    %c0_i32 = arith.constant 0 : i32
    %c0_i32_0 = arith.constant 0 : i32
    %c0_i32_1 = arith.constant 0 : i32
    return %c0_i32, %c0_i32_0 : i32, i32
  }
  func.func @transform_2(%arg0: i32) -> (i32, i32, i32) {
    %c0_i32 = arith.constant 0 : i32
    %c0_i32_0 = arith.constant 0 : i32
    %c0_i32_1 = arith.constant 0 : i32
    return %arg0, %c0_i32, %c0_i32_0 : i32, i32, i32
  }
}

</mosaic_0001>

<bundles_post_ra>
// kernel: double_conv.5
= control target key start
LH: loop header
LB: loop body
LE: loop exit
PB: predicated region body
PF: predicated region fallthrough
CT: control target
= control target key end

     0   :  { %s415_s9 = smov 0   ;;  %s574_s0 = inlined_call_operand.vmem [shape: f32[2,256,128], index: 0, kind: input, shape index: {}]   ;;  %s575_s1 = inlined_call_operand.vmem [shape: f32[2,128], index: 1, kind: input, shape index: {}]   ;;  %s576_s2 = inlined_call_operand.vmem [shape: f32[2,256,128], index: 2, kind: output, shape index: {}]  }
   0x1 LB: > { %s369_s10 = sadd.s32 4294967295, %s398_s9   ;;  %p373_p0 = scmp.ge.s32.totalorder %s398_s9, 1  ;;  %s398_s9 = sphi %s415_s9, %s12_s9  }
   0x2   : > { %p112_p1 = scmp.lt.s32.totalorder %s398_s9, 3 }
   0x4   : > { %p113_p2 = pnand %p373_p0, %p112_p1 }
   0x5   : > { %p134_p3 = scmp.lt.s32.totalorder (!%p113_p2), %s369_s10, 1  ;;  %v426_v0 = vld [vmem:[%s575_s1] ss:$0 sm:$0xff] (!%p113_p2)  ;;  %v436_v1 = vld [vmem:[%s575_s1 + $0x1] ss:$0 sm:$0xff] (!%p113_p2) }
   0x6   : > { %116 = sbr.rel (%p113_p2) target bundleno = 46 (0x2e), region = 28 }
   0xd   : > { %s578_s10 = smov (!%p134_p3, %s369_s10), 1 }
   0xe   : > { %s382_s11 = sshll.u32 %s578_s10, 8 }
   0xf   : > { %s431_s16 = scalar_lea.vmem %s574_s0, %s382_s11  ;;  %s459_s21 = scalar_lea.vmem %s576_s2, %s382_s11 }
  0x10   : > { %v144_v2 = vld [vmem:[%s431_s16] sm:$0xff]  ;;  %v145_v3 = vld [vmem:[%s431_s16 + $0x8] sm:$0xff]  ;;  %v146_v4 = vld [vmem:[%s431_s16 + $0x10] sm:$0xff] }
  0x11   : > { %v181_v5 = vmul.f32 %v426_v0, %v144_v2  ;;  %v182_v6 = vmul.f32 %v426_v0, %v145_v3  ;;  %v183_v7 = vmul.f32 %v426_v0, %v146_v4  ;;  %v147_v8 = vld [vmem:[%s431_s16 + $0x18] sm:$0xff]  ;;  %v148_v9 = vld [vmem:[%s431_s16 + $0x20] sm:$0xff]  ;;  %v149_v10 = vld [vmem:[%s431_s16 + $0x28] sm:$0xff] }
  0x12   : > { %v184_v11 = vmul.f32 %v426_v0, %v147_v8  ;;  %v185_v12 = vmul.f32 %v426_v0, %v148_v9  ;;  %v186_v13 = vmul.f32 %v426_v0, %v149_v10  ;;  %v150_v14 = vld [vmem:[%s431_s16 + $0x30] sm:$0xff]  ;;  %v151_v15 = vld [vmem:[%s431_s16 + $0x38] sm:$0xff]  ;;  %v152_v24 = vld [vmem:[%s431_s16 + $0x40] sm:$0xff] }
  0x13   : > { %v218_v16 = vadd.f32 %v436_v1, %v181_v5  ;;  %v219_v17 = vadd.f32 %v436_v1, %v182_v6  ;;  %v220_v18 = vadd.f32 %v436_v1, %v183_v7  ;;  %v187_v19 = vmul.f32 %v426_v0, %v150_v14  ;;  %v153_v25 = vld [vmem:[%s431_s16 + $0x48] sm:$0xff]  ;;  %v154_v26 = vld [vmem:[%s431_s16 + $0x50] sm:$0xff]  ;;  %v155_v31 = vld [vmem:[%s431_s16 + $0x58] sm:$0xff] }
  0x14   : > { %v221_v20 = vadd.f32 %v436_v1, %v184_v11  ;;  %v222_v21 = vadd.f32 %v436_v1, %v185_v12  ;;  %v223_v22 = vadd.f32 %v436_v1, %v186_v13  ;;  %v188_v23 = vmul.f32 %v426_v0, %v151_v15  ;;  %v156_v32 = vld [vmem:[%s431_s16 + $0x60] sm:$0xff]  ;;  %v157_v33 = vld [vmem:[%s431_s16 + $0x68] sm:$0xff]  ;;  %v158_v38 = vld [vmem:[%s431_s16 + $0x70] sm:$0xff] }
  0x15   : > { %v250_v27 = vmax.f32 %v218_v16, 0.0  ;;  %v251_v28 = vmax.f32 %v219_v17, 0.0  ;;  %v252_v29 = vmax.f32 %v220_v18, 0.0  ;;  %v224_v30 = vadd.f32 %v436_v1, %v187_v19  ;;  %v159_v43 = vld [vmem:[%s431_s16 + $0x78] sm:$0xff]  ;;  %v160_v56 = vld [vmem:[%s431_s16 + $0x80] sm:$0xff]  ;;  %v161_v57 = vld [vmem:[%s431_s16 + $0x88] sm:$0xff] }
  0x16   : > { %v253_v34 = vmax.f32 %v221_v20, 0.0  ;;  %v254_v35 = vmax.f32 %v222_v21, 0.0  ;;  %v255_v36 = vmax.f32 %v223_v22, 0.0  ;;  %v225_v37 = vadd.f32 %v436_v1, %v188_v23  ;;  %v162_v58 = vld [vmem:[%s431_s16 + $0x90] sm:$0xff]  ;;  %v163_v63 = vld [vmem:[%s431_s16 + $0x98] sm:$0xff]  ;;  %v164_v2 = vld [vmem:[%s431_s16 + $0xa0] sm:$0xff] }
  0x17   : > { %282 = vst [vmem:[%s459_s21] sm:$0xff] %v250_v27  ;;  %283 = vst [vmem:[%s459_s21 + $0x8] sm:$0xff] %v251_v28  ;;  %v256_v39 = vmax.f32 %v224_v30, 0.0  ;;  %v189_v40 = vmul.f32 %v426_v0, %v152_v24  ;;  %v190_v41 = vmul.f32 %v426_v0, %v153_v25  ;;  %v191_v42 = vmul.f32 %v426_v0, %v154_v26  ;;  %v165_v3 = vld [vmem:[%s431_s16 + $0xa8] sm:$0xff]  ;;  %v166_v8 = vld [vmem:[%s431_s16 + $0xb0] sm:$0xff] }
  0x18   : > { %284 = vst [vmem:[%s459_s21 + $0x10] sm:$0xff] %v252_v29  ;;  %285 = vst [vmem:[%s459_s21 + $0x18] sm:$0xff] %v253_v34  ;;  %v257_v44 = vmax.f32 %v225_v37, 0.0  ;;  %v192_v45 = vmul.f32 %v426_v0, %v155_v31  ;;  %v193_v46 = vmul.f32 %v426_v0, %v156_v32  ;;  %v194_v47 = vmul.f32 %v426_v0, %v157_v33  ;;  %v167_v13 = vld [vmem:[%s431_s16 + $0xb8] sm:$0xff]  ;;  %v168_v26 = vld [vmem:[%s431_s16 + $0xc0] sm:$0xff] }
  0x19   : > { %286 = vst [vmem:[%s459_s21 + $0x20] sm:$0xff] %v254_v35  ;;  %287 = vst [vmem:[%s459_s21 + $0x28] sm:$0xff] %v255_v36  ;;  %v226_v48 = vadd.f32 %v436_v1, %v189_v40  ;;  %v227_v49 = vadd.f32 %v436_v1, %v190_v41  ;;  %v228_v50 = vadd.f32 %v436_v1, %v191_v42  ;;  %v169_v27 = vld [vmem:[%s431_s16 + $0xc8] sm:$0xff]  ;;  %v170_v28 = vld [vmem:[%s431_s16 + $0xd0] sm:$0xff] }
  0x1a   : > { %288 = vst [vmem:[%s459_s21 + $0x30] sm:$0xff] %v256_v39  ;;  %v195_v51 = vmul.f32 %v426_v0, %v158_v38  ;;  %289 = vst [vmem:[%s459_s21 + $0x38] sm:$0xff] %v257_v44  ;;  %v229_v52 = vadd.f32 %v436_v1, %v192_v45  ;;  %v230_v53 = vadd.f32 %v436_v1, %v193_v46  ;;  %v171_v33 = vld [vmem:[%s431_s16 + $0xd8] sm:$0xff]  ;;  %v172_v34 = vld [vmem:[%s431_s16 + $0xe0] sm:$0xff] }
  0x1b   : > { %v231_v54 = vadd.f32 %v436_v1, %v194_v47  ;;  %v196_v55 = vmul.f32 %v426_v0, %v159_v43  ;;  %v258_v59 = vmax.f32 %v226_v48, 0.0  ;;  %v259_v60 = vmax.f32 %v227_v49, 0.0  ;;  %v173_v35 = vld [vmem:[%s431_s16 + $0xe8] sm:$0xff]  ;;  %v174_v40 = vld [vmem:[%s431_s16 + $0xf0] sm:$0xff]  ;;  %v175_v45 = vld [vmem:[%s431_s16 + $0xf8] sm:$0xff] }
  0x1c   : > { %v260_v61 = vmax.f32 %v228_v50, 0.0  ;;  %v232_v62 = vadd.f32 %v436_v1, %v195_v51  ;;  %v261_v4 = vmax.f32 %v229_v52, 0.0  ;;  %v262_v5 = vmax.f32 %v230_v53, 0.0 }
  0x1d   : > { %v263_v6 = vmax.f32 %v231_v54, 0.0  ;;  %v233_v7 = vadd.f32 %v436_v1, %v196_v55  ;;  %290 = vst [vmem:[%s459_s21 + $0x40] sm:$0xff] %v258_v59  ;;  %291 = vst [vmem:[%s459_s21 + $0x48] sm:$0xff] %v259_v60  ;;  %v197_v10 = vmul.f32 %v426_v0, %v160_v56  ;;  %v198_v11 = vmul.f32 %v426_v0, %v161_v57 }
  0x1e   : > { %292 = vst [vmem:[%s459_s21 + $0x50] sm:$0xff] %v260_v61  ;;  %v264_v9 = vmax.f32 %v232_v62, 0.0  ;;  %v199_v12 = vmul.f32 %v426_v0, %v162_v58  ;;  %293 = vst [vmem:[%s459_s21 + $0x58] sm:$0xff] %v261_v4  ;;  %v200_v15 = vmul.f32 %v426_v0, %v163_v63  ;;  %v201_v16 = vmul.f32 %v426_v0, %v164_v2 }
  0x1f   : > { %294 = vst [vmem:[%s459_s21 + $0x60] sm:$0xff] %v262_v5  ;;  %295 = vst [vmem:[%s459_s21 + $0x68] sm:$0xff] %v263_v6  ;;  %v265_v14 = vmax.f32 %v233_v7, 0.0  ;;  %v202_v17 = vmul.f32 %v426_v0, %v165_v3  ;;  %v234_v18 = vadd.f32 %v436_v1, %v197_v10  ;;  %v235_v19 = vadd.f32 %v436_v1, %v198_v11 }
  0x20   : > { %296 = vst [vmem:[%s459_s21 + $0x70] sm:$0xff] %v264_v9  ;;  %v236_v20 = vadd.f32 %v436_v1, %v199_v12  ;;  %v203_v21 = vmul.f32 %v426_v0, %v166_v8  ;;  %v237_v22 = vadd.f32 %v436_v1, %v200_v15  ;;  %v238_v23 = vadd.f32 %v436_v1, %v201_v16 }
  0x21   : > { %297 = vst [vmem:[%s459_s21 + $0x78] sm:$0xff] %v265_v14  ;;  %v239_v24 = vadd.f32 %v436_v1, %v202_v17  ;;  %v204_v25 = vmul.f32 %v426_v0, %v167_v13  ;;  %v266_v29 = vmax.f32 %v234_v18, 0.0  ;;  %v267_v30 = vmax.f32 %v235_v19, 0.0 }
  0x22   : > { %v268_v31 = vmax.f32 %v236_v20, 0.0  ;;  %v240_v32 = vadd.f32 %v436_v1, %v203_v21  ;;  %v269_v36 = vmax.f32 %v237_v22, 0.0  ;;  %v270_v37 = vmax.f32 %v238_v23, 0.0 }
  0x23   : > { %v271_v38 = vmax.f32 %v239_v24, 0.0  ;;  %v241_v39 = vadd.f32 %v436_v1, %v204_v25  ;;  %298 = vst [vmem:[%s459_s21 + $0x80] sm:$0xff] %v266_v29  ;;  %299 = vst [vmem:[%s459_s21 + $0x88] sm:$0xff] %v267_v30  ;;  %v205_v42 = vmul.f32 %v426_v0, %v168_v26  ;;  %v206_v43 = vmul.f32 %v426_v0, %v169_v27 }
  0x24   : > { %300 = vst [vmem:[%s459_s21 + $0x90] sm:$0xff] %v268_v31  ;;  %v272_v41 = vmax.f32 %v240_v32, 0.0  ;;  %v207_v44 = vmul.f32 %v426_v0, %v170_v28  ;;  %301 = vst [vmem:[%s459_s21 + $0x98] sm:$0xff] %v269_v36  ;;  %v208_v47 = vmul.f32 %v426_v0, %v171_v33  ;;  %v209_v48 = vmul.f32 %v426_v0, %v172_v34 }
  0x25   : > { %302 = vst [vmem:[%s459_s21 + $0xa0] sm:$0xff] %v270_v37  ;;  %303 = vst [vmem:[%s459_s21 + $0xa8] sm:$0xff] %v271_v38  ;;  %v273_v46 = vmax.f32 %v241_v39, 0.0  ;;  %v210_v49 = vmul.f32 %v426_v0, %v173_v35  ;;  %v242_v50 = vadd.f32 %v436_v1, %v205_v42  ;;  %v243_v51 = vadd.f32 %v436_v1, %v206_v43 }
  0x26   : > { %304 = vst [vmem:[%s459_s21 + $0xb0] sm:$0xff] %v272_v41  ;;  %v244_v52 = vadd.f32 %v436_v1, %v207_v44  ;;  %v211_v53 = vmul.f32 %v426_v0, %v174_v40  ;;  %v245_v54 = vadd.f32 %v436_v1, %v208_v47  ;;  %v246_v55 = vadd.f32 %v436_v1, %v209_v48 }
  0x27   : > { %305 = vst [vmem:[%s459_s21 + $0xb8] sm:$0xff] %v273_v46  ;;  %v247_v56 = vadd.f32 %v436_v1, %v210_v49  ;;  %v212_v57 = vmul.f32 %v426_v0, %v175_v45  ;;  %v274_v58 = vmax.f32 %v242_v50, 0.0  ;;  %v275_v59 = vmax.f32 %v243_v51, 0.0 }
  0x28   : > { %v276_v60 = vmax.f32 %v244_v52, 0.0  ;;  %v248_v61 = vadd.f32 %v436_v1, %v211_v53  ;;  %v277_v62 = vmax.f32 %v245_v54, 0.0  ;;  %v278_v63 = vmax.f32 %v246_v55, 0.0 }
  0x29   : > { %v279_v2 = vmax.f32 %v247_v56, 0.0  ;;  %v249_v3 = vadd.f32 %v436_v1, %v212_v57  ;;  %306 = vst [vmem:[%s459_s21 + $0xc0] sm:$0xff] %v274_v58  ;;  %307 = vst [vmem:[%s459_s21 + $0xc8] sm:$0xff] %v275_v59 }
  0x2a   : > { %308 = vst [vmem:[%s459_s21 + $0xd0] sm:$0xff] %v276_v60  ;;  %v280_v4 = vmax.f32 %v248_v61, 0.0  ;;  %309 = vst [vmem:[%s459_s21 + $0xd8] sm:$0xff] %v277_v62 }
  0x2b   : > { %310 = vst [vmem:[%s459_s21 + $0xe0] sm:$0xff] %v278_v63  ;;  %311 = vst [vmem:[%s459_s21 + $0xe8] sm:$0xff] %v279_v2  ;;  %v281_v0 = vmax.f32 %v249_v3, 0.0 }
  0x2c   : > { %312 = vst [vmem:[%s459_s21 + $0xf0] sm:$0xff] %v280_v4 }
  0x2d   : > { %313 = vst [vmem:[%s459_s21 + $0xf8] sm:$0xff] %v281_v0 }
  0x2e PF: > { %s12_s9 = sadd.s32 1, %s398_s9  }
  0x2f   : > { %p9_p4 = scmp.ge.s32.totalorder %s12_s9, 4  }
  0x31   :  { %11 = sbr.rel (!%p9_p4) target bundleno = 1 (0x1), region = 58 }

// kernel: double_conv.3
= control target key start
LH: loop header
LB: loop body
LE: loop exit
PB: predicated region body
PF: predicated region fallthrough
CT: control target
= control target key end

     0   :  { %s5182_s12 = smov 0   ;;  %s5966_s0 = inlined_call_operand.vmem [shape: f32[2,18,18,128], index: 0, kind: input, shape index: {}]   ;;  %s5967_s1 = inlined_call_operand.vmem [shape: bf16[3,3,128,128], index: 1, kind: input, shape index: {}]   ;;  %s5968_s2 = inlined_call_operand.vmem [shape: f32[2,256,128], index: 2, kind: output, shape index: {0}]   ;;  %s5969_s3 = inlined_call_operand.vmem [shape: f32[2,2,128], index: 3, kind: output, shape index: {1}]  }
   0x1 LB: > { %s3772_s13 = sadd.s32 4294967295, %s5160_s12   ;;  %p3776_p0 = scmp.ge.s32.totalorder %s5160_s12, 1  ;;  %s5160_s12 = sphi %s5182_s12, %s14_s12  }
   0x2   : > { %p140_p1 = scmp.lt.s32.totalorder %s5160_s12, 3 }
   0x4   : > { %p141_p2 = pnand %p3776_p0, %p140_p1 }
   0x6   : > { %144 = sbr.rel (%p141_p2) target bundleno = 565 (0x235), region = 28 }
   0xd   : > { %v5074_v0 = vld [vmem:[%s5967_s1] sm:$0xff]   ;;  %p168_p3 = scmp.lt.s32.totalorder %s3772_s13, 1  ;;  %v5076_v2 = vld [vmem:[%s5967_s1 + $0x8] sm:$0xff]   ;;  %v5078_v4 = vld [vmem:[%s5967_s1 + $0x10] sm:$0xff]   ;;  %vm1270_vm0 = vsmask.f32 7424 }
   0xe   : > { %v5075_v1 = vld [vmem:[%s5967_s1 + $0x100] sm:$0xff]   ;;  %4200 = vmatprep.subr.bf16.mxu1 %v5074_v0  ;;  %v5077_v3 = vld [vmem:[%s5967_s1 + $0x108] sm:$0xff]   ;;  %v5079_v5 = vld [vmem:[%s5967_s1 + $0x110] sm:$0xff]   ;;  %vm2503_vm1 = vcmask 1046528  }
   0xf   : > { %4392 = vmatprep.subr.bf16.mxu0 %v5075_v1  ;;  %4201 = vmatpush3.bf16.msra.mxu1 %v5074_v0  ;;  %s5987_s13 = smov (!%p168_p3, %s3772_s13), 1  ;;  %v5080_v6 = vld [vmem:[%s5967_s1 + $0x18] sm:$0xff]   ;;  %v5082_v8 = vld [vmem:[%s5967_s1 + $0x20] sm:$0xff]   ;;  %v5084_v10 = vld [vmem:[%s5967_s1 + $0x28] sm:$0xff]  }
  0x10   : > { %4393 = vmatpush3.bf16.msra.mxu0 %v5075_v1  ;;  %4202 = vmatprep.subr.bf16.mxu1 %v5076_v2  ;;  %v5081_v7 = vld [vmem:[%s5967_s1 + $0x118] sm:$0xff]   ;;  %s5064_s30 = smul.u32 432, %s5987_s13  ;;  %v5083_v9 = vld [vmem:[%s5967_s1 + $0x120] sm:$0xff]   ;;  %v5085_v11 = vld [vmem:[%s5967_s1 + $0x128] sm:$0xff]   ;;  %s3780_s7 = sshll.u32 %s5987_s13, 1 }
  0x11   : > { %4394 = vmatprep.subr.bf16.mxu0 %v5077_v3  ;;  %v5086_v23 = vld [vmem:[%s5967_s1 + $0x30] sm:$0xff]   ;;  %v5088_v30 = vld [vmem:[%s5967_s1 + $0x38] sm:$0xff]   ;;  %v5090_v55 = vld [vmem:[%s5967_s1 + $0xc0] sm:$0xff]   ;;  %s181_s11 = scalar_lea.vmem %s5969_s3, %s3780_s7 }
  0x12   : > { %s5226_s10 = scalar_lea.vmem %s5966_s0, %s5064_s30  ;;  %v5087_v27 = vld [vmem:[%s5967_s1 + $0x130] sm:$0xff]   ;;  %v5089_v43 = vld [vmem:[%s5967_s1 + $0x138] sm:$0xff]   ;;  %v5091_v60 = vld [vmem:[%s5967_s1 + $0x1c0] sm:$0xff]   ;;  %s3983_s30 = sshll.u32 %s5987_s13, 8 }
  0x13   : > { %4203 = vmatpush3.bf16.msra.mxu1 %v5076_v2  ;;  %v183_v12 = vld [vmem:[%s5226_s10] sm:$0xff]  ;;  %v184_v13 = vld [vmem:[%s5226_s10 + $0x8] sm:$0xff]  ;;  %v186_v14 = vld [vmem:[%s5226_s10 + $0x18] sm:$0xff]  ;;  %s5920_s6 = scalar_lea.vmem %s5968_s2, %s3983_s30 }
  0x14   : > { %4395 = vmatpush3.bf16.msra.mxu0 %v5077_v3  ;;  %4204 = vmatprep.subr.bf16.mxu1 %v5078_v4  ;;  %v5237_v15 = vpack.c.bf16 %v184_v13, %v183_v12  ;;  %v187_v16 = vld [vmem:[%s5226_s10 + $0x20] sm:$0xff]  ;;  %v188_v17 = vld [vmem:[%s5226_s10 + $0x28] sm:$0x3]  ;;  %v189_v20 = vld [vmem:[%s5226_s10 + $0x30] sm:$0xff] }
  0x15   : > { %4396 = vmatprep.subr.bf16.mxu0 %v5079_v5  ;;  %v5241_v18 = vpack.c.bf16 %v187_v16, %v186_v14  ;;  %v5243_v19 = vpack.c.bf16 %v188_v17, %v188_v17  ;;  %v190_v21 = vld [vmem:[%s5226_s10 + $0x38] sm:$0xff]  ;;  %v191_v22 = vld [vmem:[%s5226_s10 + $0x40] sm:$0x3]  ;;  %v192_v33 = vld [vmem:[%s5226_s10 + $0x48] sm:$0xff] }
  0x16   : > { %4216 = vmatprep.mubr.bf16.mxu1 %v5237_v15  ;;  %v5258_v28 = vpack.c.bf16 %v190_v21, %v189_v20  ;;  %v5260_v29 = vpack.c.bf16 %v191_v22, %v191_v22  ;;  %v193_v34 = vld [vmem:[%s5226_s10 + $0x50] sm:$0xff]  ;;  %v194_v37 = vld [vmem:[%s5226_s10 + $0x58] sm:$0x3]  ;;  %v195_v42 = vld [vmem:[%s5226_s10 + $0x60] sm:$0xff] }
  0x17   : > { %4205 = vmatpush3.bf16.msra.mxu1 %v5078_v4  ;;  %v1284_v24 = vshrl.u32 %v5241_v18, 16  ;;  %v1286_v25 = vshll.u32 %v5241_v18, 16  ;;  %v1291_v26 = vshll.u32 %v5243_v19, 16  ;;  %v5270_v38 = vpack.c.bf16 %v193_v34, %v192_v33  ;;  %v196_v46 = vld [vmem:[%s5226_s10 + $0x68] sm:$0xff]  ;;  %v197_v50 = vld [vmem:[%s5226_s10 + $0x70] sm:$0x3] }
  0x18   : > { %4397 = vmatpush3.bf16.msra.mxu0 %v5079_v5  ;;  %4206 = vmatprep.subr.bf16.mxu1 %v5080_v6  ;;  %v1296_v35 = vshrl.u32 %v5258_v28, 16  ;;  %v1298_v36 = vshll.u32 %v5258_v28, 16  ;;  %v1303_v40 = vshll.u32 %v5260_v29, 16  ;;  %v5273_v41 = vpack.c.bf16 %v194_v37, %v194_v37  ;;  %v198_v54 = vld [vmem:[%s5226_s10 + $0x78] sm:$0xff]  ;;  %v199_v59 = vld [vmem:[%s5226_s10 + $0x80] sm:$0xff]  ;;  %v201_v2 = vld [vmem:[%s5226_s10 + $0x90] sm:$0xff] }
  0x19   : > { %4398 = vmatprep.subr.bf16.mxu0 %v5081_v7  ;;  %v1288_v31 = vrot.slane %v1286_v25, 1  ;;  %v1293_v32 = vrot.slane %v1291_v26, 1  ;;  %v1310_v45 = vshll.u32 %v5270_v38, 16  ;;  %v1308_v48 = vshrl.u32 %v5270_v38, 16  ;;  %v200_v61 = vld [vmem:[%s5226_s10 + $0x88] sm:$0x3] }
  0x1a   : > { %v1300_v44 = vrot.slane %v1298_v36, 1  ;;  %v1315_v49 = vshll.u32 %v5273_v41, 16  ;;  %v5287_v51 = vpack.c.bf16 %v196_v46, %v195_v42  ;;  %v5290_v53 = vpack.c.bf16 %v197_v50, %v197_v50  ;;  %v202_v3 = vld [vmem:[%s5226_s10 + $0x98] sm:$0xff]  ;;  %v5092_v4 = vld [vmem:[%s5967_s1 + $0x1c8] sm:$0xff]   ;;  %v205_v21 = vld [vmem:[%s5226_s10 + $0xb0] sm:$0xff] }
  0x1b   : > { %4207 = vmatpush3.bf16.msra.mxu1 %v5080_v6  ;;  %v1289_v39 = vor.u32 %v1288_v31, %v1284_v24  ;;  %v1312_v52 = vrot.slane %v1310_v45, 1  ;;  %v1305_v57 = vrot.slane %v1303_v40, 1  ;;  %v5302_v62 = vpack.c.bf16 %v199_v59, %v198_v54  ;;  %v204_v16 = vld [vmem:[%s5226_s10 + $0xa8] sm:$0xff]  ;;  %v206_v22 = vld [vmem:[%s5226_s10 + $0xb8] sm:$0x3]  ;;  %v5094_v26 = vld [vmem:[%s5967_s1 + $0x1d0] sm:$0xff]  }
  0x1c   : > { %4399 = vmatpush3.bf16.msra.mxu0 %v5081_v7  ;;  %4208 = vmatprep.subr.bf16.mxu1 %v5082_v8  ;;  %v1301_v56 = vor.u32 %v1300_v44, %v1296_v35  ;;  %v1322_v58 = vshll.u32 %v5287_v51, 16  ;;  %v1317_v0 = vrot.slane %v1315_v49, 1  ;;  %v5304_v1 = vpack.c.bf16 %v200_v61, %v200_v61  ;;  %v5093_v20 = vld [vmem:[%s5967_s1 + $0xc8] sm:$0xff]   ;;  %v207_v36 = vld [vmem:[%s5226_s10 + $0xc0] sm:$0xff]  ;;  %v209_v44 = vld [vmem:[%s5226_s10 + $0xd0] sm:$0x3] }
  0x1d   : > { %4400 = vmatprep.subr.bf16.mxu0 %v5083_v9  ;;  %v5282_v47 = vsel %vm1270_vm0, %v1289_v39, %v1293_v32  ;;  %v1313_v63 = vor.u32 %v1312_v52, %v1308_v48  ;;  %v1320_v5 = vshrl.u32 %v5287_v51, 16  ;;  %v1327_v7 = vshll.u32 %v5290_v53, 16  ;;  %v208_v37 = vld [vmem:[%s5226_s10 + $0xc8] sm:$0xff]  ;;  %v5095_v46 = vld [vmem:[%s5967_s1 + $0x1d8] sm:$0xff]   ;;  %v5097_v59 = vld [vmem:[%s5967_s1 + $0x1e0] sm:$0xff]  }
  0x1e   : > { %4408 = vmatprep.mubr.bf16.mxu0 %v5282_v47  ;;  %v1324_v6 = vrot.slane %v1322_v58, 1  ;;  %v1339_v12 = vshll.u32 %v5304_v1, 16  ;;  %v5320_v13 = vpack.c.bf16 %v202_v3, %v201_v2  ;;  %v5346_v34 = vpack.c.bf16 %v206_v22, %v206_v22  ;;  %v5099_v54 = vld [vmem:[%s5967_s1 + $0xd8] sm:$0xff]   ;;  %v211_v22 = vld [vmem:[%s5226_s10 + $0xe0] sm:$0xff] }
  0x1f   : > { %4209 = vmatpush3.bf16.msra.mxu1 %v5082_v8  ;;  %v1334_v8 = vshll.u32 %v5302_v62, 16  ;;  %v5325_v17 = vsel %vm1270_vm0, %v1313_v63, %v1317_v0  ;;  %v1329_v25 = vrot.slane %v1327_v7, 1  ;;  %v5357_v45 = vpack.c.bf16 %v208_v37, %v207_v36  ;;  %v5102_v63 = vld [vmem:[%s5967_s1 + $0xe0] sm:$0xff]   ;;  %v5103_v7 = vld [vmem:[%s5967_s1 + $0xe8] sm:$0xff]   ;;  %v217_v36 = vld [vmem:[%s5226_s10 + $0x110] sm:$0xff] }
  0x20   : > { %4401 = vmatpush3.bf16.msra.mxu0 %v5083_v9  ;;  %4210 = vmatprep.subr.bf16.mxu1 %v5084_v10  ;;  %v203_v9 = vld [vmem:[%s5226_s10 + $0xa0] sm:$0x3]  ;;  %v1325_v24 = vor.u32 %v1324_v6, %v1320_v5  ;;  %v1346_v31 = vshll.u32 %v5320_v13, 16  ;;  %v1341_v33 = vrot.slane %v1339_v12, 1  ;;  %v1344_v39 = vshrl.u32 %v5320_v13, 16  ;;  %v5098_v5 = vld [vmem:[%s5967_s1 + $0x1e8] sm:$0xff]  }
  0x21   : > { %4402 = vmatprep.subr.bf16.mxu0 %v5085_v11  ;;  %v1336_v14 = vrot.slane %v1334_v8, 1  ;;  %v1363_v52 = vshll.u32 %v5346_v34, 16  ;;  %v1370_v58 = vshll.u32 %v5357_v45, 16  ;;  %v1368_v2 = vshrl.u32 %v5357_v45, 16  ;;  %v5105_v12 = vld [vmem:[%s5967_s1 + $0xf0] sm:$0xff]   ;;  %v219_v37 = vld [vmem:[%s5226_s10 + $0x120] sm:$0xff] }
  0x22   : > { %v5353_v40 = vsel %vm1270_vm0, %v1325_v24, %v1329_v25  ;;  %v1348_v42 = vrot.slane %v1346_v31, 1  ;;  %v213_v24 = vld [vmem:[%s5226_s10 + $0xf0] sm:$0xff]  ;;  %v214_v25 = vld [vmem:[%s5226_s10 + $0xf8] sm:$0xff]  ;;  %v5432_v31 = vld [vmem:[%s5967_s1 + $0x180] sm:$0xff]  }
  0x23   : > { %4211 = vmatpush3.bf16.msra.mxu1 %v5084_v10  ;;  %v5316_v10 = vsel %vm1270_vm0, %v1301_v56, %v1305_v57  ;;  %v5374_v57 = vpack.c.bf16 %v209_v44, %v209_v44  ;;  %v1365_v61 = vrot.slane %v1363_v52, 1  ;;  %v1372_v3 = vrot.slane %v1370_v58, 1  ;;  %v5110_v52 = vld [vmem:[%s5967_s1 + $0x98] sm:$0xff]  }
  0x24   : > { %4403 = vmatpush3.bf16.msra.mxu0 %v5085_v11  ;;  %4212 = vmatprep.subr.bf16.mxu1 %v5086_v23  ;;  %v1332_v11 = vshrl.u32 %v5302_v62, 16  ;;  %v226_v58 = vld [vmem:[%s5226_s10 + $0x158] sm:$0xff] }
  0x25   : > { %4404 = vmatprep.subr.bf16.mxu0 %v5087_v27  ;;  %v1373_v8 = vor.u32 %v1372_v3, %v1368_v2  ;;  %v5112_v2 = vld [vmem:[%s5967_s1 + $0xa0] sm:$0xff]  }
  0x26   : > { %v1337_v32 = vor.u32 %v1336_v14, %v1332_v11  ;;  %v5100_v11 = vld [vmem:[%s5967_s1 + $0x1f0] sm:$0xff]  }
  0x27   : > { %4213 = vmatpush3.bf16.msra.mxu1 %v5086_v23  ;;  %v5333_v23 = vpack.c.bf16 %v205_v21, %v204_v16  ;;  %v5101_v16 = vld [vmem:[%s5967_s1 + $0x1f8] sm:$0xff]  }
  0x28   : > { %4405 = vmatpush3.bf16.msra.mxu0 %v5087_v27  ;;  %4214 = vmatprep.subr.bf16.mxu1 %v5088_v30  ;;  %v5096_v27 = vld [vmem:[%s5967_s1 + $0xd0] sm:$0xff]   ;;  %v5363_v48 = vsel %vm1270_vm0, %v1337_v32, %v1341_v33  ;;  %v210_v21 = vld [vmem:[%s5226_s10 + $0xd8] sm:$0xff]  ;;  %v5434_v32 = vpack.c.bf16 %v214_v25, %v213_v24  ;;  %v5106_v33 = vld [vmem:[%s5967_s1 + $0x88] sm:$0xff]  }
  0x29   : > { %4406 = vmatprep.subr.bf16.mxu0 %v5089_v43  ;;  %v1358_v35 = vshll.u32 %v5333_v23, 16  ;;  %v1356_v49 = vshrl.u32 %v5333_v23, 16 }
  0x2b   : > { %4215 = vmatpush3.bf16.msra.mxu1 %v5088_v30  ;;  %v5342_v30 = vpack.c.bf16 %v203_v9, %v203_v9  ;;  %v1360_v50 = vrot.slane %v1358_v35, 1  ;;  %v216_v35 = vld [vmem:[%s5226_s10 + $0x108] sm:$0xff] }
  0x2c   : > { %4407 = vmatpush3.bf16.msra.mxu0 %v5089_v43  ;;  %4248 = vmatprep.subr.bf16.mxu1 %v5090_v55 }
  0x2d   : > { %4440 = vmatprep.subr.bf16.mxu0 %v5091_v60  ;;  %v1351_v43 = vshll.u32 %v5342_v30, 16 }
  0x2e   : > { %4217 = vmatmul.mubr.bf16.vlgmr.msra.gmra.mrb[0].mxu1 %v5241_v18 }
  0x2f   : > { %4409 = vmatmul.mubr.bf16.vlgmr.msra.gmra.mrb[0].mxu0 %v5316_v10  ;;  %4249 = vmatpush3.bf16.msra.mxu1 %v5090_v55  ;;  %v1349_v55 = vor.u32 %v1348_v42, %v1344_v39  ;;  %v1353_v56 = vrot.slane %v1351_v43, 1  ;;  %v220_v39 = vld [vmem:[%s5226_s10 + $0x128] sm:$0xff]  ;;  %v5108_v42 = vld [vmem:[%s5967_s1 + $0x90] sm:$0xff]   ;;  %v5451_v43 = vpack.c.bf16 %v217_v36, %v216_v35 }
  0x30   : > { %4441 = vmatpush3.bf16.msra.mxu0 %v5091_v60  ;;  %4220 = vmatprep.mubr.bf16.mxu1 %v5258_v28  ;;  %v1361_v60 = vor.u32 %v1360_v50, %v1356_v49  ;;  %v5453_v44 = vpack.c.bf16 %v220_v39, %v219_v37  ;;  %v212_v49 = vld [vmem:[%s5226_s10 + $0xe8] sm:$0x3] }
  0x31   : > { %4442 = vmatprep.subr.bf16.mxu0 %v5092_v4  ;;  %4412 = vmatprep.mubr.bf16.mxu0 %v5325_v17  ;;  %v5384_v0 = vsel %vm1270_vm0, %v1349_v55, %v1353_v56  ;;  %v223_v55 = vld [vmem:[%s5226_s10 + $0x140] sm:$0xff]  ;;  %v225_v56 = vld [vmem:[%s5226_s10 + $0x150] sm:$0xff]  ;;  %v1404_v24 = vshrl.u32 %v5451_v43, 16  ;;  %v1406_v25 = vshll.u32 %v5451_v43, 16 }
  0x32   : > { %4250 = vmatprep.subr.bf16.mxu1 %v5093_v20  ;;  %v5392_v6 = vsel %vm1270_vm0, %v1361_v60, %v1365_v61  ;;  %v1394_v60 = vshll.u32 %v5434_v32, 16  ;;  %v1418_v39 = vshll.u32 %v5453_v44, 16 }
  0x33   : > { %4251 = vmatpush3.bf16.msra.mxu1 %v5093_v20  ;;  %v5107_v20 = vld [vmem:[%s5967_s1 + $0xf8] sm:$0xff]  }
  0x34   : > { %4443 = vmatpush3.bf16.msra.mxu0 %v5092_v4  ;;  %4252 = vmatprep.subr.bf16.mxu1 %v5096_v27  ;;  %v1375_v4 = vshll.u32 %v5374_v57, 16 }
  0x35   : > { %4444 = vmatprep.subr.bf16.mxu0 %v5094_v26 }
  0x36   : > { %4221 = vmatmul.mubr.bf16.gmra.mrb[4].mxu1 %v5270_v38  ;;  %v1377_v9 = vrot.slane %v1375_v4, 1 }
  0x37   : > { %4413 = vmatmul.mubr.bf16.gmra.mrb[4].mxu0 %v5353_v40  ;;  %4224 = vmatprep.mubr.bf16.mxu1 %v5287_v51 }
  0x38   : > { %4445 = vmatpush3.bf16.msra.mxu0 %v5094_v26  ;;  %4416 = vmatprep.mubr.bf16.mxu0 %v5363_v48  ;;  %v5408_v14 = vsel %vm1270_vm0, %v1373_v8, %v1377_v9  ;;  %v5104_v26 = vld [vmem:[%s5967_s1 + $0x80] sm:$0xff]   ;;  %v218_v8 = vld [vmem:[%s5226_s10 + $0x118] sm:$0x3] }
  0x39   : > { %4446 = vmatprep.subr.bf16.mxu0 %v5095_v46  ;;  %4253 = vmatpush3.bf16.msra.mxu1 %v5096_v27  ;;  %v5427_v27 = vpack.c.bf16 %v211_v22, %v210_v21  ;;  %v228_v21 = vld [vmem:[%s5226_s10 + $0x168] sm:$0xff]  ;;  %v5492_v22 = vpack.c.bf16 %v218_v8, %v218_v8 }
  0x3a   : > { %4254 = vmatprep.subr.bf16.mxu1 %v5099_v54 }
  0x3b   : > { %v1382_v50 = vshll.u32 %v5427_v27, 16  ;;  %v1380_v61 = vshrl.u32 %v5427_v27, 16 }
  0x3c   : > { %4447 = vmatpush3.bf16.msra.mxu0 %v5095_v46  ;;  %v222_v46 = vld [vmem:[%s5226_s10 + $0x138] sm:$0xff] }
  0x3d   : > { %4448 = vmatprep.subr.bf16.mxu0 %v5097_v59  ;;  %4255 = vmatpush3.bf16.msra.mxu1 %v5099_v54  ;;  %v215_v54 = vld [vmem:[%s5226_s10 + $0x100] sm:$0x3]  ;;  %v5478_v3 = vpack.c.bf16 %v223_v55, %v222_v46  ;;  %v1384_v4 = vrot.slane %v1382_v50, 1  ;;  %v224_v55 = vld [vmem:[%s5226_s10 + $0x148] sm:$0x3] }
  0x3e   : > { %4225 = vmatmul.mubr.bf16.gmra.mrb[8].mxu1 %v5302_v62  ;;  %4256 = vmatprep.subr.bf16.mxu1 %v5102_v63 }
  0x3f   : > { %4417 = vmatmul.mubr.bf16.gmra.mrb[8].mxu0 %v5384_v0  ;;  %4228 = vmatprep.mubr.bf16.mxu1 %v5320_v13  ;;  %v1385_v35 = vor.u32 %v1384_v4, %v1380_v61  ;;  %v5117_v4 = vld [vmem:[%s5967_s1 + $0xb8] sm:$0xff]  }
  0x40   : > { %4449 = vmatpush3.bf16.msra.mxu0 %v5097_v59  ;;  %4420 = vmatprep.mubr.bf16.mxu0 %v5392_v6  ;;  %v5469_v59 = vpack.c.bf16 %v212_v49, %v212_v49  ;;  %v5116_v49 = vld [vmem:[%s5967_s1 + $0xb0] sm:$0xff]  }
  0x41   : > { %4450 = vmatprep.subr.bf16.mxu0 %v5098_v5  ;;  %4257 = vmatpush3.bf16.msra.mxu1 %v5102_v63  ;;  %v5473_v63 = vpack.c.bf16 %v215_v54, %v215_v54  ;;  %v1411_v54 = vshll.u32 %v5492_v22, 16 }
  0x42   : > { %4258 = vmatprep.subr.bf16.mxu1 %v5103_v7  ;;  %v1387_v9 = vshll.u32 %v5469_v59, 16 }
  0x43   : > { %v1413_v8 = vrot.slane %v1411_v54, 1 }
  0x44   : > { %4451 = vmatpush3.bf16.msra.mxu0 %v5098_v5  ;;  %v1392_v5 = vshrl.u32 %v5434_v32, 16  ;;  %v1389_v36 = vrot.slane %v1387_v9, 1  ;;  %v5526_v9 = vpack.c.bf16 %v224_v55, %v224_v55  ;;  %v230_v55 = vld [vmem:[%s5226_s10 + $0x178] sm:$0x3] }
  0x45   : > { %4452 = vmatprep.subr.bf16.mxu0 %v5100_v11  ;;  %4259 = vmatpush3.bf16.msra.mxu1 %v5103_v7  ;;  %v5481_v7 = vpack.c.bf16 %v226_v58, %v225_v56  ;;  %v1420_v58 = vrot.slane %v1418_v39, 1  ;;  %v232_v39 = vld [vmem:[%s5226_s10 + $0x188] sm:$0xff] }
  0x46   : > { %4229 = vmatmul.mubr.bf16.gmra.mrb[12].mxu1 %v5333_v23  ;;  %4260 = vmatprep.subr.bf16.mxu1 %v5105_v12  ;;  %v5512_v56 = vsel %vm1270_vm0, %v1385_v35, %v1389_v36  ;;  %v5537_v35 = vld [vmem:[%s5967_s1 + $0x140] sm:$0xff]  }
  0x47   : > { %4421 = vmatmul.mubr.bf16.gmra.mrb[12].mxu0 %v5408_v14  ;;  %4232 = vmatprep.mubr.bf16.mxu1 %v5357_v45 }
  0x48   : > { %4453 = vmatpush3.bf16.msra.mxu0 %v5100_v11  ;;  %4456 = vmatprep.mubr.bf16.mxu0 %v5316_v10  ;;  %v1396_v11 = vrot.slane %v1394_v60, 1 }
  0x49   : > { %4454 = vmatprep.subr.bf16.mxu0 %v5101_v16  ;;  %4261 = vmatpush3.bf16.msra.mxu1 %v5105_v12  ;;  %v221_v12 = vld [vmem:[%s5226_s10 + $0x130] sm:$0x3] }
  0x4a   : > { %4262 = vmatprep.subr.bf16.mxu1 %v5107_v20  ;;  %v5501_v37 = vpack.c.bf16 %v221_v12, %v221_v12 }
  0x4c   : > { %4455 = vmatpush3.bf16.msra.mxu0 %v5101_v16  ;;  %v1399_v16 = vshll.u32 %v5473_v63, 16  ;;  %v1423_v60 = vshll.u32 %v5501_v37, 16 }
  0x4d   : > { %4488 = vmatprep.subr.bf16.mxu0 %v5104_v26  ;;  %4263 = vmatpush3.bf16.msra.mxu1 %v5107_v20  ;;  %v5114_v20 = vld [vmem:[%s5967_s1 + $0xa8] sm:$0xff]  }
  0x4e   : > { %4233 = vmatmul.mubr.bf16.gmra.mrb[16].mxu1 %v5427_v27  ;;  %4296 = vmatprep.subr.bf16.mxu1 %v5432_v31  ;;  %v1401_v46 = vrot.slane %v1399_v16, 1  ;;  %v1425_v16 = vrot.slane %v1423_v60, 1  ;;  %v233_v60 = vld [vmem:[%s5226_s10 + $0x190] sm:$0x3] }
  0x4f   : > { %4457 = vmatmul.mubr.bf16.vlgmr.msra.gmra.mrb[0].mxu0 %v5325_v17  ;;  %4236 = vmatprep.mubr.bf16.mxu1 %v5434_v32 }
  0x50   : > { %4460 = vmatprep.mubr.bf16.mxu0 %v5353_v40  ;;  %4489 = vmatpush3.bf16.msra.mxu0 %v5104_v26  ;;  %v229_v26 = vld [vmem:[%s5226_s10 + $0x170] sm:$0xff] }
  0x51   : > { %4490 = vmatprep.subr.bf16.mxu0 %v5106_v33  ;;  %v5507_v50 = vpack.c.bf16 %v229_v26, %v228_v21  ;;  %v1442_v26 = vshll.u32 %v5481_v7, 16 }
  0x54   : > { %4491 = vmatpush3.bf16.msra.mxu0 %v5106_v33  ;;  %v1416_v33 = vshrl.u32 %v5453_v44, 16 }
  0x55   : > { %4492 = vmatprep.subr.bf16.mxu0 %v5108_v42 }
  0x56   : > { %4237 = vmatmul.mubr.bf16.gmra.mrb[20].mxu1 %v5451_v43  ;;  %v1421_v21 = vor.u32 %v1420_v58, %v1416_v33  ;;  %v1440_v33 = vshrl.u32 %v5481_v7, 16 }
  0x57   : > { %4461 = vmatmul.mubr.bf16.gmra.mrb[4].mxu0 %v5363_v48  ;;  %4240 = vmatprep.mubr.bf16.mxu1 %v5453_v44 }
  0x58   : > { %4464 = vmatprep.mubr.bf16.mxu0 %v5384_v0  ;;  %4493 = vmatpush3.bf16.msra.mxu0 %v5108_v42  ;;  %v1397_v42 = vor.u32 %v1396_v11, %v1392_v5  ;;  %v227_v5 = vld [vmem:[%s5226_s10 + $0x160] sm:$0x3]  ;;  %v1428_v11 = vshrl.u32 %v5478_v3, 16 }
  0x59   : > { %4494 = vmatprep.subr.bf16.mxu0 %v5110_v52 }
  0x5a   : > { %v5516_v61 = vsel %vm1270_vm0, %v1397_v42, %v1401_v46  ;;  %v1435_v42 = vshll.u32 %v5526_v9, 16 }
  0x5c   : > { %4495 = vmatpush3.bf16.msra.mxu0 %v5110_v52  ;;  %v1408_v52 = vrot.slane %v1406_v25, 1  ;;  %v5531_v25 = vpack.c.bf16 %v227_v5, %v227_v5  ;;  %v5113_v5 = vld [vmem:[%s5967_s1 + $0x190] sm:$0xff]  }
  0x5d   : > { %4496 = vmatprep.subr.bf16.mxu0 %v5112_v2 }
  0x5e   : > { %4241 = vmatmul.mubr.bf16.gmra.mrb[24].mxu1 %v5478_v3  ;;  %v1409_v12 = vor.u32 %v1408_v52, %v1404_v24  ;;  %v5111_v24 = vld [vmem:[%s5967_s1 + $0x188] sm:$0xff]   ;;  %v1444_v52 = vrot.slane %v1442_v26, 1  ;;  %v1447_v54 = vshll.u32 %v5531_v25, 16  ;;  %v234_v26 = vld [vmem:[%s5226_s10 + $0x198] sm:$0xff] }
  0x5f   : > { %4465 = vmatmul.mubr.bf16.gmra.mrb[8].mxu0 %v5392_v6  ;;  %4244 = vmatprep.mubr.bf16.mxu1 %v5481_v7 }
  0x60   : > { %4468 = vmatprep.mubr.bf16.mxu0 %v5408_v14  ;;  %4497 = vmatpush3.bf16.msra.mxu0 %v5112_v2  ;;  %v1430_v2 = vshll.u32 %v5478_v3, 16  ;;  %v5546_v46 = vsel %vm1270_vm0, %v1409_v12, %v1413_v8  ;;  %v5565_v8 = vpack.c.bf16 %v230_v55, %v230_v55  ;;  %v1454_v12 = vshll.u32 %v5507_v50, 16 }
  0x61   : > { %4498 = vmatprep.subr.bf16.mxu0 %v5114_v20  ;;  %5978 = vst [vmem:[#allocation2_spill] sm:$0xff] %v5546_v46 }
  0x62   : > { %v1432_v36 = vrot.slane %v1430_v2, 1  ;;  %v1459_v55 = vshll.u32 %v5565_v8, 16 }
  0x64   : > { %4499 = vmatpush3.bf16.msra.mxu0 %v5114_v20  ;;  %v231_v20 = vld [vmem:[%s5226_s10 + $0x180] sm:$0xff]  ;;  %v1433_v2 = vor.u32 %v1432_v36, %v1428_v11  ;;  %v1452_v11 = vshrl.u32 %v5507_v50, 16 }
  0x65   : > { %4500 = vmatprep.subr.bf16.mxu0 %v5116_v49  ;;  %v5553_v58 = vpack.c.bf16 %v232_v39, %v231_v20  ;;  %v1449_v20 = vrot.slane %v1447_v54, 1  ;;  %v235_v39 = vld [vmem:[%s5226_s10 + $0x1a0] sm:$0xff] }
  0x66   : > { %4245 = vmatmul.mubr.bf16.gmra.mrb[28].mxu1 %v5507_v50 }
  0x67   : > { %4469 = vmatmul.mubr.bf16.gmra.mrb[12].mxu0 %v5512_v56  ;;  %4264 = vmatprep.mubr.bf16.mxu1 %v5241_v18 }
  0x68   : > { %4472 = vmatprep.mubr.bf16.mxu0 %v5516_v61  ;;  %4501 = vmatpush3.bf16.msra.mxu0 %v5116_v49  ;;  %v5549_v49 = vsel %vm1270_vm0, %v1421_v21, %v1425_v16  ;;  %v1445_v16 = vor.u32 %v1444_v52, %v1440_v33  ;;  %v5568_v21 = vpack.c.bf16 %v233_v60, %v233_v60  ;;  %v1802_v52 = vshrl.u32 %v5553_v58, 16 }
  0x69   : > { %4502 = vmatprep.subr.bf16.mxu0 %v5117_v4  ;;  %5979 = vst [vmem:[#allocation3_spill] sm:$0xff] %v5549_v49 }
  0x6a   : > { %v5581_v33 = vsel %vm1270_vm0, %v1445_v16, %v1449_v20  ;;  %v1809_v60 = vshll.u32 %v5568_v21, 16 }
  0x6b   : > { %5981 = vst [vmem:[#allocation5_spill] sm:$0xff] %v5581_v33 }
  0x6c   : > { %4503 = vmatpush3.bf16.msra.mxu0 %v5117_v4  ;;  %v1437_v4 = vrot.slane %v1435_v42, 1  ;;  %v1456_v42 = vrot.slane %v1454_v12, 1  ;;  %v1461_v12 = vrot.slane %v1459_v55, 1 }
  0x6d   : > { %4536 = vmatprep.subr.bf16.mxu0 %v5537_v35 }
  0x6e   : > { %4265 = vmatmul.mubr.bf16.vlgmr.msra.gmra.mrb[0].mxu1 %v5258_v28  ;;  %v5575_v36 = vsel %vm1270_vm0, %v1433_v2, %v1437_v4  ;;  %v236_v2 = vld [vmem:[%s5226_s10 + $0x1a8] sm:$0x3]  ;;  %v1457_v4 = vor.u32 %v1456_v42, %v1452_v11 }
  0x6f   : > { %4473 = vmatmul.mubr.bf16.gmra.mrb[16].mxu0 %v5546_v46  ;;  %4297 = vmatpush3.bf16.msra.mxu1 %v5432_v31  ;;  %v1804_v31 = vshll.u32 %v5553_v58, 16  ;;  %5980 = vst [vmem:[#allocation4_spill] sm:$0xff] %v5575_v36  ;;  %v5593_v16 = vpack.c.bf16 %v236_v2, %v236_v2  ;;  %v185_v46 = vld [vmem:[%s5226_s10 + $0x10] sm:$0x3] }
  0x70   : > { %4268 = vmatprep.mubr.bf16.mxu1 %v5270_v38  ;;  %4476 = vmatprep.mubr.bf16.mxu0 %v5549_v49  ;;  %v5578_v49 = vpack.c.bf16 %v235_v39, %v234_v26  ;;  %v1811_v26 = vrot.slane %v1809_v60, 1  ;;  %v5118_v39 = vld [vmem:[%s5967_s1 + $0x1a0] sm:$0xff]   ;;  %v5608_v55 = vpack.c.bf16 %v185_v46, %v185_v46  ;;  %v5121_v2 = vld [vmem:[%s5967_s1 + $0x1b0] sm:$0xff]  }
  0x71   : > { %4298 = vmatprep.subr.bf16.mxu1 %v5111_v24  ;;  %v1806_v54 = vrot.slane %v1804_v31, 1 }
  0x72   : > { %v2139_v20 = vshll.u32 %v5578_v49, 16  ;;  %v2505_v46 = vrot.slane %v5608_v55, 1 }
  0x73   : > { %4299 = vmatpush3.bf16.msra.mxu1 %v5111_v24  ;;  %v5115_v24 = vld [vmem:[%s5967_s1 + $0x198] sm:$0xff]   ;;  %v1807_v31 = vor.u32 %v1806_v54, %v1802_v52  ;;  %v5119_v52 = vld [vmem:[%s5967_s1 + $0x1a8] sm:$0xff]  }
  0x74   : > { %4300 = vmatprep.subr.bf16.mxu1 %v5113_v5  ;;  %v2141_v11 = vrot.slane %v2139_v20, 1  ;;  %v2508_v20 = vrot.slane %v5243_v19, 1 }
  0x75   : > { %v5606_v42 = vsel %vm1270_vm0, %v1807_v31, %v1811_v26  ;;  %v2507_v31 = vrot.slane %v5241_v18, 1  ;;  %v2510_v26 = vrot.slane %v5258_v28, 1  ;;  %v5122_v18 = vld [vmem:[%s5967_s1 + $0x148] sm:$0xff]  }
  0x76   : > { %4269 = vmatmul.mubr.bf16.gmra.mrb[4].mxu1 %v5287_v51 }
  0x77   : > { %4477 = vmatmul.mubr.bf16.gmra.mrb[20].mxu0 %v5575_v36  ;;  %4272 = vmatprep.mubr.bf16.mxu1 %v5302_v62  ;;  %v5601_v36 = vsel %vm1270_vm0, %v1457_v4, %v1461_v12 }
  0x78   : > { %4480 = vmatprep.mubr.bf16.mxu0 %v5581_v33  ;;  %4301 = vmatpush3.bf16.msra.mxu1 %v5113_v5  ;;  %v2137_v33 = vshrl.u32 %v5578_v49, 16  ;;  %v2144_v5 = vshll.u32 %v5593_v16, 16 }
  0x79   : > { %4302 = vmatprep.subr.bf16.mxu1 %v5115_v24 }
  0x7a   : > { %v2142_v54 = vor.u32 %v2141_v11, %v2137_v33  ;;  %v2146_v60 = vrot.slane %v2144_v5, 1  ;;  %v5123_v33 = vld [vmem:[%s5967_s1 + $0x1b8] sm:$0xff]   ;;  %v5636_v11 = vld [vmem:[%s5967_s1 + $0x40] sm:$0xff]   ;;  %v5639_v5 = vsel %vm2503_vm1, %v2507_v31, %v2508_v20 }
  0x7c   : > { %4303 = vmatpush3.bf16.msra.mxu1 %v5115_v24  ;;  %v2504_v24 = vrot.slane %v5237_v15, 1  ;;  %v2147_v4 = vsel %vm1270_vm0, %v2142_v54, %v2146_v60  ;;  %v2516_v54 = vrot.slane %v5287_v51, 1  ;;  %v2517_v60 = vrot.slane %v5290_v53, 1 }
  0x7d   : > { %4304 = vmatprep.subr.bf16.mxu1 %v5118_v39  ;;  %v2519_v53 = vrot.slane %v5302_v62, 1 }
  0x7e   : > { %4273 = vmatmul.mubr.bf16.gmra.mrb[8].mxu1 %v5320_v13  ;;  %v2506_v12 = vsel %vm2503_vm1, %v2504_v24, %v2505_v46  ;;  %v5124_v24 = vld [vmem:[%s5967_s1 + $0x150] sm:$0xff]  }
  0x7f   : > { %4481 = vmatmul.mubr.bf16.gmra.mrb[24].mxu0 %v5601_v36  ;;  %4276 = vmatprep.mubr.bf16.mxu1 %v5333_v23 }
  0x80   : > { %4484 = vmatprep.mubr.bf16.mxu0 %v5606_v42  ;;  %4305 = vmatpush3.bf16.msra.mxu1 %v5118_v39  ;;  %v2511_v39 = vrot.slane %v5260_v29, 1  ;;  %v2513_v29 = vrot.slane %v5270_v38, 1 }
  0x81   : > { %4306 = vmatprep.subr.bf16.mxu1 %v5119_v52 }
  0x82   : > { %v5642_v19 = vsel %vm2503_vm1, %v2510_v26, %v2511_v39  ;;  %v2526_v26 = vrot.slane %v5346_v34, 1  ;;  %v2528_v39 = vrot.slane %v5357_v45, 1  ;;  %v5133_v34 = vld [vmem:[%s5967_s1 + $0x178] sm:$0xff]  }
  0x84   : > { %4307 = vmatpush3.bf16.msra.mxu1 %v5119_v52  ;;  %v2514_v52 = vrot.slane %v5273_v41, 1  ;;  %v5126_v41 = vld [vmem:[%s5967_s1 + $0x158] sm:$0xff]  }
  0x85   : > { %4308 = vmatprep.subr.bf16.mxu1 %v5121_v2 }
  0x86   : > { %4277 = vmatmul.mubr.bf16.gmra.mrb[12].mxu1 %v5357_v45  ;;  %v5661_v46 = vsel %vm2503_vm1, %v2513_v29, %v2514_v52  ;;  %v5132_v29 = vld [vmem:[%s5967_s1 + $0x170] sm:$0xff]  }
  0x87   : > { %4485 = vmatmul.mubr.bf16.gmra.mrb[28].mxu0 %v2147_v4  ;;  %4280 = vmatprep.mubr.bf16.mxu1 %v5427_v27  ;;  %v2522_v4 = vrot.slane %v5320_v13, 1 }
  0x88   : > { %4504 = vmatprep.mubr.bf16.mxu0 %v2506_v12  ;;  %4309 = vmatpush3.bf16.msra.mxu1 %v5121_v2  ;;  %v5664_v2 = vsel %vm2503_vm1, %v2516_v54, %v2517_v60  ;;  %v2523_v12 = vrot.slane %v5342_v30, 1  ;;  %v2525_v30 = vrot.slane %v5333_v23, 1  ;;  %v2532_v60 = vrot.slane %v5469_v59, 1  ;;  %v5127_v59 = vld [vmem:[%s5967_s1 + $0x48] sm:$0xff]  }
  0x89   : > { %4310 = vmatprep.subr.bf16.mxu1 %v5123_v33 }
  0x8a   : > { %v5684_v31 = vsel %vm2503_vm1, %v2522_v4, %v2523_v12  ;;  %v5701_v52 = vsel %vm2503_vm1, %v2525_v30, %v2526_v26  ;;  %v2538_v4 = vrot.slane %v5492_v22, 1  ;;  %v5129_v12 = vld [vmem:[%s5967_s1 + $0x50] sm:$0xff]   ;;  %v5131_v22 = vld [vmem:[%s5967_s1 + $0x58] sm:$0xff]   ;;  %v2546_v30 = vrot.slane %v5481_v7, 1 }
  0x8b   : > { %v2547_v26 = vrot.slane %v5531_v25, 1  ;;  %v2549_v25 = vrot.slane %v5507_v50, 1 }
  0x8c   : > { %4311 = vmatpush3.bf16.msra.mxu1 %v5123_v33  ;;  %v5128_v33 = vld [vmem:[%s5967_s1 + $0x160] sm:$0xff]  }
  0x8d   : > { %4344 = vmatprep.subr.bf16.mxu1 %v5636_v11 }
  0x8e   : > { %4281 = vmatmul.mubr.bf16.gmra.mrb[16].mxu1 %v5434_v32 }
  0x8f   : > { %4505 = vmatmul.mubr.bf16.vlgmr.msra.gmra.mrb[0].mxu0 %v5639_v5  ;;  %4284 = vmatprep.mubr.bf16.mxu1 %v5451_v43 }
  0x90   : > { %4508 = vmatprep.mubr.bf16.mxu0 %v5642_v19  ;;  %4537 = vmatpush3.bf16.msra.mxu0 %v5537_v35  ;;  %v2520_v35 = vrot.slane %v5304_v1, 1  ;;  %v5130_v1 = vld [vmem:[%s5967_s1 + $0x168] sm:$0xff]  }
  0x91   : > { %4538 = vmatprep.subr.bf16.mxu0 %v5122_v18 }
  0x92   : > { %v5681_v20 = vsel %vm2503_vm1, %v2519_v53, %v2520_v35  ;;  %v5720_v53 = vld [vmem:[%s5967_s1 + $0x200] sm:$0xff]  }
  0x94   : > { %4539 = vmatpush3.bf16.msra.mxu0 %v5122_v18  ;;  %v2529_v18 = vrot.slane %v5374_v57, 1  ;;  %v2531_v57 = vrot.slane %v5427_v27, 1 }
  0x95   : > { %4540 = vmatprep.subr.bf16.mxu0 %v5124_v24 }
  0x96   : > { %4285 = vmatmul.mubr.bf16.gmra.mrb[20].mxu1 %v5453_v44  ;;  %v5704_v54 = vsel %vm2503_vm1, %v2528_v39, %v2529_v18  ;;  %v5723_v35 = vsel %vm2503_vm1, %v2531_v57, %v2532_v60  ;;  %v2550_v18 = vrot.slane %v5565_v8, 1  ;;  %v5146_v8 = vld [vmem:[%s5967_s1 + $0x100] sm:$0xff]   ;;  %v1279_v60 = vshll.u32 %v5608_v55, 16 }
  0x97   : > { %4509 = vmatmul.mubr.bf16.gmra.mrb[4].mxu0 %v5661_v46  ;;  %4288 = vmatprep.mubr.bf16.mxu1 %v5478_v3 }
  0x98   : > { %4512 = vmatprep.mubr.bf16.mxu0 %v5664_v2  ;;  %4541 = vmatpush3.bf16.msra.mxu0 %v5124_v24  ;;  %v2534_v24 = vrot.slane %v5434_v32, 1 }
  0x99   : > { %4542 = vmatprep.subr.bf16.mxu0 %v5126_v41 }
  0x9c   : > { %4543 = vmatpush3.bf16.msra.mxu0 %v5126_v41  ;;  %v2535_v41 = vrot.slane %v5473_v63, 1  ;;  %v2537_v63 = vrot.slane %v5451_v43, 1 }
  0x9d   : > { %4544 = vmatprep.subr.bf16.mxu0 %v5128_v33 }
  0x9e   : > { %4289 = vmatmul.mubr.bf16.gmra.mrb[24].mxu1 %v5481_v7 }
  0x9f   : > { %4513 = vmatmul.mubr.bf16.gmra.mrb[8].mxu0 %v5681_v20  ;;  %4292 = vmatprep.mubr.bf16.mxu1 %v5507_v50 }
  0xa0   : > { %4516 = vmatprep.mubr.bf16.mxu0 %v5684_v31  ;;  %4545 = vmatpush3.bf16.msra.mxu0 %v5128_v33  ;;  %v2540_v33 = vrot.slane %v5453_v44, 1 }
  0xa1   : > { %4546 = vmatprep.subr.bf16.mxu0 %v5130_v1 }
  0xa4   : > { %4547 = vmatpush3.bf16.msra.mxu0 %v5130_v1  ;;  %v2544_v1 = vrot.slane %v5526_v9, 1  ;;  %v5135_v9 = vld [vmem:[%s5967_s1 + $0x68] sm:$0xff]  }
  0xa5   : > { %4548 = vmatprep.subr.bf16.mxu0 %v5132_v29 }
  0xa6   : > { %4293 = vmatmul.mubr.bf16.gmra.mrb[28].mxu1 %v5553_v58 }
  0xa7   : > { %4517 = vmatmul.mubr.bf16.gmra.mrb[12].mxu0 %v5701_v52  ;;  %4312 = vmatprep.mubr.bf16.mxu1 %v5258_v28  ;;  %v5726_v28 = vsel %vm2503_vm1, %v2534_v24, %v2535_v41  ;;  %v1281_v24 = vrot.slane %v1279_v60, 1  ;;  %v5147_v41 = vld [vmem:[%s5967_s1 + $0x108] sm:$0xff]  }
  0xa8   : > { %4520 = vmatprep.mubr.bf16.mxu0 %v5704_v54  ;;  %4549 = vmatpush3.bf16.msra.mxu0 %v5132_v29  ;;  %v5137_v29 = vld [vmem:[%s5967_s1 + $0x70] sm:$0xff]  }
  0xa9   : > { %4550 = vmatprep.subr.bf16.mxu0 %v5133_v34 }
  0xac   : > { %4551 = vmatpush3.bf16.msra.mxu0 %v5133_v34  ;;  %v5783_v34 = vsel %vm2503_vm1, %v2549_v25, %v2550_v18 }
  0xad   : > { %4584 = vmatprep.subr.bf16.mxu0 %v5720_v53 }
  0xae   : > { %4313 = vmatmul.mubr.bf16.vlgmr.msra.gmra.mrb[0].mxu1 %v5270_v38  ;;  %v2541_v38 = vrot.slane %v5501_v37, 1  ;;  %v2543_v37 = vrot.slane %v5478_v3, 1 }
  0xaf   : > { %4521 = vmatmul.mubr.bf16.gmra.mrb[16].mxu0 %v5723_v35  ;;  %4345 = vmatpush3.bf16.msra.mxu1 %v5636_v11  ;;  %v5745_v11 = vsel %vm2503_vm1, %v2537_v63, %v2538_v4 }
  0xb0   : > { %4316 = vmatprep.mubr.bf16.mxu1 %v5287_v51  ;;  %4524 = vmatprep.mubr.bf16.mxu0 %v5726_v28  ;;  %v5748_v51 = vsel %vm2503_vm1, %v2540_v33, %v2541_v38  ;;  %v5765_v39 = vsel %vm2503_vm1, %v2543_v37, %v2544_v1 }
  0xb1   : > { %4346 = vmatprep.subr.bf16.mxu1 %v5127_v59 }
  0xb3   : > { %4347 = vmatpush3.bf16.msra.mxu1 %v5127_v59  ;;  %v5151_v59 = vld [vmem:[%s5967_s1 + $0x128] sm:$0xff]  }
  0xb4   : > { %4348 = vmatprep.subr.bf16.mxu1 %v5129_v12 }
  0xb6   : > { %4317 = vmatmul.mubr.bf16.gmra.mrb[4].mxu1 %v5302_v62  ;;  %v5134_v62 = vld [vmem:[%s5967_s1 + $0x60] sm:$0xff]  }
  0xb7   : > { %4525 = vmatmul.mubr.bf16.gmra.mrb[20].mxu0 %v5745_v11  ;;  %4320 = vmatprep.mubr.bf16.mxu1 %v5320_v13  ;;  %v5768_v13 = vsel %vm2503_vm1, %v2546_v30, %v2547_v26 }
  0xb8   : > { %4528 = vmatprep.mubr.bf16.mxu0 %v5748_v51  ;;  %4349 = vmatpush3.bf16.msra.mxu1 %v5129_v12 }
  0xb9   : > { %4350 = vmatprep.subr.bf16.mxu1 %v5131_v22 }
  0xbc   : > { %4351 = vmatpush3.bf16.msra.mxu1 %v5131_v22 }
  0xbd   : > { %4352 = vmatprep.subr.bf16.mxu1 %v5134_v62 }
  0xbe   : > { %4321 = vmatmul.mubr.bf16.gmra.mrb[8].mxu1 %v5333_v23  ;;  %v5139_v23 = vld [vmem:[%s5967_s1 + $0x78] sm:$0xff]  }
  0xbf   : > { %4529 = vmatmul.mubr.bf16.gmra.mrb[24].mxu0 %v5765_v39  ;;  %4324 = vmatprep.mubr.bf16.mxu1 %v5357_v45  ;;  %v5138_v45 = vld [vmem:[%s5967_s1 + $0x208] sm:$0xff]  }
  0xc0   : > { %4532 = vmatprep.mubr.bf16.mxu0 %v5768_v13  ;;  %4353 = vmatpush3.bf16.msra.mxu1 %v5134_v62 }
  0xc1   : > { %4354 = vmatprep.subr.bf16.mxu1 %v5135_v9 }
  0xc4   : > { %4355 = vmatpush3.bf16.msra.mxu1 %v5135_v9 }
  0xc5   : > { %4356 = vmatprep.subr.bf16.mxu1 %v5137_v29 }
  0xc6   : > { %4325 = vmatmul.mubr.bf16.gmra.mrb[12].mxu1 %v5427_v27  ;;  %v5140_v27 = vld [vmem:[%s5967_s1 + $0x210] sm:$0xff]  }
  0xc7   : > { %4533 = vmatmul.mubr.bf16.gmra.mrb[28].mxu0 %v5783_v34  ;;  %4328 = vmatprep.mubr.bf16.mxu1 %v5434_v32  ;;  %v5141_v32 = vld [vmem:[%s5967_s1 + $0x218] sm:$0xff]  }
  0xc8   : > { %4552 = vmatprep.mubr.bf16.mxu0 %v5639_v5  ;;  %4357 = vmatpush3.bf16.msra.mxu1 %v5137_v29  ;;  %v1272_v5 = vshrl.u32 %v5237_v15, 16 }
  0xc9   : > { %4358 = vmatprep.subr.bf16.mxu1 %v5139_v23 }
  0xcc   : > { %4359 = vmatpush3.bf16.msra.mxu1 %v5139_v23 }
  0xcd   : > { %4632 = vmatprep.subr.bf16.mxu1 %v5146_v8 }
  0xce   : > { %4329 = vmatmul.mubr.bf16.gmra.mrb[16].mxu1 %v5451_v43  ;;  %v1274_v43 = vshll.u32 %v5237_v15, 16  ;;  %v5144_v15 = vld [vmem:[%s5967_s1 + $0x230] sm:$0xff]  }
  0xcf   : > { %4553 = vmatmul.mubr.bf16.vlgmr.msra.gmra.mrb[0].mxu0 %v5642_v19  ;;  %4332 = vmatprep.mubr.bf16.mxu1 %v5453_v44  ;;  %v5142_v44 = vld [vmem:[%s5967_s1 + $0x220] sm:$0xff]  }
  0xd0   : > { %4556 = vmatprep.mubr.bf16.mxu0 %v5661_v46  ;;  %4585 = vmatpush3.bf16.msra.mxu0 %v5720_v53  ;;  %v1276_v57 = vrot.slane %v1274_v43, 1  ;;  %v5148_v53 = vld [vmem:[%s5967_s1 + $0x110] sm:$0xff]  }
  0xd1   : > { %4586 = vmatprep.subr.bf16.mxu0 %v5138_v45 }
  0xd4   : > { %4587 = vmatpush3.bf16.msra.mxu0 %v5138_v45 }
  0xd5   : > { %4588 = vmatprep.subr.bf16.mxu0 %v5140_v27 }
  0xd6   : > { %4333 = vmatmul.mubr.bf16.gmra.mrb[20].mxu1 %v5478_v3  ;;  %v5143_v3 = vld [vmem:[%s5967_s1 + $0x228] sm:$0xff]  }
  0xd7   : > { %4557 = vmatmul.mubr.bf16.gmra.mrb[4].mxu0 %v5664_v2  ;;  %4336 = vmatprep.mubr.bf16.mxu1 %v5481_v7  ;;  %v1277_v7 = vor.u32 %v1276_v57, %v1272_v5 }
  0xd8   : > { %4560 = vmatprep.mubr.bf16.mxu0 %v5681_v20  ;;  %4589 = vmatpush3.bf16.msra.mxu0 %v5140_v27 }
  0xd9   : > { %4590 = vmatprep.subr.bf16.mxu0 %v5141_v32  ;;  %v1282_v55 = vsel %vm1270_vm0, %v1277_v7, %v1281_v24 }
  0xdc   : > { %4591 = vmatpush3.bf16.msra.mxu0 %v5141_v32 }
  0xdd   : > { %4592 = vmatprep.subr.bf16.mxu0 %v5142_v44 }
  0xde   : > { %4337 = vmatmul.mubr.bf16.gmra.mrb[24].mxu1 %v5507_v50  ;;  %v5145_v50 = vld [vmem:[%s5967_s1 + $0x238] sm:$0xff]  }
  0xdf   : > { %4561 = vmatmul.mubr.bf16.gmra.mrb[8].mxu0 %v5684_v31  ;;  %4340 = vmatprep.mubr.bf16.mxu1 %v5553_v58 }
  0xe0   : > { %4564 = vmatprep.mubr.bf16.mxu0 %v5701_v52  ;;  %4593 = vmatpush3.bf16.msra.mxu0 %v5142_v44 }
  0xe1   : > { %4594 = vmatprep.subr.bf16.mxu0 %v5143_v3 }
  0xe4   : > { %4595 = vmatpush3.bf16.msra.mxu0 %v5143_v3 }
  0xe5   : > { %4596 = vmatprep.subr.bf16.mxu0 %v5144_v15 }
  0xe6   : > { %4341 = vmatmul.mubr.bf16.gmra.mrb[28].mxu1 %v5578_v49 }
  0xe7   : > { %4565 = vmatmul.mubr.bf16.gmra.mrb[12].mxu0 %v5704_v54  ;;  %4360 = vmatprep.mubr.bf16.mxu1 %v1282_v55 }
  0xe8   : > { %4568 = vmatprep.mubr.bf16.mxu0 %v5723_v35  ;;  %4597 = vmatpush3.bf16.msra.mxu0 %v5144_v15 }
  0xe9   : > { %4598 = vmatprep.subr.bf16.mxu0 %v5145_v50 }
  0xec   : > { %4599 = vmatpush3.bf16.msra.mxu0 %v5145_v50 }
  0xee   : > { %4361 = vmatmul.mubr.bf16.vlgmr.msra.gmra.mrb[0].mxu1 %v5282_v47  ;;  %v5149_v47 = vld [vmem:[%s5967_s1 + $0x118] sm:$0xff]  }
  0xef   : > { %4569 = vmatmul.mubr.bf16.gmra.mrb[16].mxu0 %v5726_v28  ;;  %4640 = vmatpush3.bf16.msra.mxu1 %v5146_v8 }
  0xf0   : > { %4364 = vmatprep.mubr.bf16.mxu1 %v5316_v10  ;;  %4572 = vmatprep.mubr.bf16.mxu0 %v5745_v11  ;;  %v5150_v10 = vld [vmem:[%s5967_s1 + $0x120] sm:$0xff]  }
  0xf1   : > { %4633 = vmatprep.subr.bf16.mxu1 %v5147_v41 }
  0xf3   : > { %4641 = vmatpush3.bf16.msra.mxu1 %v5147_v41 }
  0xf4   : > { %4634 = vmatprep.subr.bf16.mxu1 %v5148_v53 }
  0xf6   : > { %4365 = vmatmul.mubr.bf16.gmra.mrb[4].mxu1 %v5325_v17  ;;  %v2892_v17 = vrot.slane %v5553_v58, 1  ;;  %v5984_v58 = vld [vmem:[#allocation4_spill] sm:$0xff] }
  0xf7   : > { %4573 = vmatmul.mubr.bf16.gmra.mrb[20].mxu0 %v5748_v51  ;;  %4368 = vmatprep.mubr.bf16.mxu1 %v5353_v40  ;;  %v2893_v40 = vrot.slane %v5568_v21, 1  ;;  %v5985_v21 = vld [vmem:[#allocation5_spill] sm:$0xff] }
  0xf8   : > { %4576 = vmatprep.mubr.bf16.mxu0 %v5765_v39  ;;  %4642 = vmatpush3.bf16.msra.mxu1 %v5148_v53 }
  0xf9   : > { %4635 = vmatprep.subr.bf16.mxu1 %v5149_v47  ;;  %v2894_v63 = vsel %vm2503_vm1, %v2892_v17, %v2893_v40 }
  0xfc   : > { %4643 = vmatpush3.bf16.msra.mxu1 %v5149_v47 }
  0xfd   : > { %4636 = vmatprep.subr.bf16.mxu1 %v5150_v10 }
  0xfe   : > { %4369 = vmatmul.mubr.bf16.gmra.mrb[8].mxu1 %v5363_v48  ;;  %v5152_v48 = vld [vmem:[%s5967_s1 + $0x130] sm:$0xff]  }
  0xff   : > { %4577 = vmatmul.mubr.bf16.gmra.mrb[24].mxu0 %v5768_v13  ;;  %4372 = vmatprep.mubr.bf16.mxu1 %v5384_v0  ;;  %v5153_v0 = vld [vmem:[%s5967_s1 + $0x138] sm:$0xff]  }
 0x100   : > { %4580 = vmatprep.mubr.bf16.mxu0 %v5783_v34  ;;  %4644 = vmatpush3.bf16.msra.mxu1 %v5150_v10 }
 0x101   : > { %4637 = vmatprep.subr.bf16.mxu1 %v5151_v59 }
 0x104   : > { %4645 = vmatpush3.bf16.msra.mxu1 %v5151_v59 }
 0x105   : > { %4638 = vmatprep.subr.bf16.mxu1 %v5152_v48 }
 0x106   : > { %4373 = vmatmul.mubr.bf16.gmra.mrb[12].mxu1 %v5392_v6  ;;  %v5982_v6 = vld [vmem:[#allocation2_spill] sm:$0xff] }
 0x107   : > { %4581 = vmatmul.mubr.bf16.gmra.mrb[28].mxu0 %v2894_v63  ;;  %4376 = vmatprep.mubr.bf16.mxu1 %v5408_v14  ;;  %v5983_v14 = vld [vmem:[#allocation3_spill] sm:$0xff] }
 0x108   : > { %4600 = vmatprep.mubr.bf16.mxu0 %v5642_v19  ;;  %4646 = vmatpush3.bf16.msra.mxu1 %v5152_v48 }
 0x109   : > { %4639 = vmatprep.subr.bf16.mxu1 %v5153_v0 }
 0x10c   : > { %4647 = vmatpush3.bf16.msra.mxu1 %v5153_v0 }
 0x10e   : > { %4377 = vmatmul.mubr.bf16.gmra.mrb[16].mxu1 %v5512_v56 }
 0x10f   : > { %4601 = vmatmul.mubr.bf16.vlgmr.msra.gmra.mrb[0].mxu0 %v5661_v46  ;;  %4380 = vmatprep.mubr.bf16.mxu1 %v5516_v61 }
 0x110   : > { %4604 = vmatprep.mubr.bf16.mxu0 %v5664_v2 }
 0x116   : > { %4381 = vmatmul.mubr.bf16.gmra.mrb[20].mxu1 %v5982_v6 }
 0x117   : > { %4605 = vmatmul.mubr.bf16.gmra.mrb[4].mxu0 %v5681_v20  ;;  %4384 = vmatprep.mubr.bf16.mxu1 %v5983_v14 }
 0x118   : > { %4608 = vmatprep.mubr.bf16.mxu0 %v5684_v31 }
 0x11e   : > { %4385 = vmatmul.mubr.bf16.gmra.mrb[24].mxu1 %v5984_v58 }
 0x11f   : > { %4609 = vmatmul.mubr.bf16.gmra.mrb[8].mxu0 %v5701_v52  ;;  %4388 = vmatprep.mubr.bf16.mxu1 %v5985_v21 }
 0x120   : > { %4612 = vmatprep.mubr.bf16.mxu0 %v5704_v54 }
 0x126   : > { %4389 = vmatmul.mubr.bf16.gmra.mrb[28].mxu1 %v5601_v36 }
 0x127   : > { %4613 = vmatmul.mubr.bf16.gmra.mrb[12].mxu0 %v5723_v35  ;;  %4424 = vmatprep.mubr.bf16.mxu1 %v5512_v56  ;;  %v3220_v56 = vrot.slane %v5578_v49, 1 }
 0x128   : > { %4616 = vmatprep.mubr.bf16.mxu0 %v5726_v28 }
 0x12e   : > { %4425 = vmatmul.mubr.bf16.vlgmr.msra.gmra.mrb[16].mxu1 %v5516_v61  ;;  %v3221_v61 = vrot.slane %v5593_v16, 1 }
 0x12f   : > { %4617 = vmatmul.mubr.bf16.gmra.mrb[16].mxu0 %v5745_v11  ;;  %4428 = vmatprep.mubr.bf16.mxu1 %v5982_v6 }
 0x130   : > { %4620 = vmatprep.mubr.bf16.mxu0 %v5748_v51  ;;  %v3222_v19 = vsel %vm2503_vm1, %v3220_v56, %v3221_v61 }
 0x136   : > { %4429 = vmatmul.mubr.bf16.gmra.mrb[20].mxu1 %v5983_v14 }
 0x137   : > { %4621 = vmatmul.mubr.bf16.gmra.mrb[20].mxu0 %v5765_v39  ;;  %4432 = vmatprep.mubr.bf16.mxu1 %v5984_v58 }
 0x138   : > { %4624 = vmatprep.mubr.bf16.mxu0 %v5768_v13 }
 0x13e   : > { %4433 = vmatmul.mubr.bf16.gmra.mrb[24].mxu1 %v5985_v21 }
 0x13f   : > { %4625 = vmatmul.mubr.bf16.gmra.mrb[24].mxu0 %v5783_v34  ;;  %4436 = vmatprep.mubr.bf16.mxu1 %v5601_v36 }
 0x140   : > { %4628 = vmatprep.mubr.bf16.mxu0 %v2894_v63 }
 0x146   : > { %4437 = vmatmul.mubr.bf16.gmra.mrb[28].mxu1 %v5606_v42 }
 0x147   : > { %4629 = vmatmul.mubr.bf16.gmra.mrb[28].mxu0 %v3222_v19 }
 0x1c1   : > { %v4362_v46 = vpop.f32.mrb[0].mxu1 }
 0x1c2   : > { %v1610_v2 = vpop.f32.mrb[1].mxu1 }
 0x1c3   : > { %v4363_v20 = vpop.f32.mrb[2].mxu1 }
 0x1c4   : > { %v1613_v31 = vpop.f32.mrb[3].mxu1 }
 0x1c9   : > { %v4366_v52 = vpop.f32.mrb[4].mxu1 }
 0x1ca   : > { %v1626_v54 = vpop.f32.mrb[5].mxu1 }
 0x1cb   : > { %v4367_v35 = vpop.f32.mrb[6].mxu1 }
 0x1cc   : > { %v1629_v28 = vpop.f32.mrb[7].mxu1 }
 0x1d1   : > { %v4370_v36 = vpop.f32.mrb[8].mxu1 }
 0x1d2   : > { %v1642_v4 = vpop.f32.mrb[9].mxu1 }
 0x1d3   : > { %v4371_v12 = vpop.f32.mrb[10].mxu1 }
 0x1d4   : > { %v5906_v49 = vpop.f32.mrb[11].mxu1 }
 0x1d9   : > { %v5908_v16 = vpop.f32.mrb[12].mxu1 }
 0x1da   : > { %v5910_v33 = vpop.f32.mrb[13].mxu1 }
 0x1db   : > { %v5912_v42 = vpop.f32.mrb[14].mxu1 }
 0x1dc   : > { %v5914_v38 = vpop.f32.mrb[15].mxu1 }
 0x1e2   : > { %v4602_v11 = vpop.f32.mrb[0].mxu0 }
 0x1e3   : > { %v4653_v51 = vadd.f32 %v4602_v11, %v4362_v46  ;;  %v3355_v22 = vpop.f32.mrb[1].mxu0 }
 0x1e4   : > { %v4659_v37 = vadd.f32 %v3355_v22, %v1610_v2  ;;  %v4603_v1 = vpop.f32.mrb[2].mxu0 }
 0x1e5   : > { %3516 = vst [vmem:[%s5920_s6 + $0x10] sm:$0xff] %v4653_v51  ;;  %v4665_v30 = vadd.f32 %v4603_v1, %v4363_v20  ;;  %v3358_v26 = vpop.f32.mrb[3].mxu0  ;;  %v3618_v25 = vmul.f32 %v4653_v51, %v4653_v51 }
 0x1e6   : > { %3514 = vst [vmem:[%s5920_s6] sm:$0xff] %v4659_v37  ;;  %v4671_v62 = vadd.f32 %v3358_v26, %v1613_v31  ;;  %v3616_v39 = vmul.f32 %v4659_v37, %v4659_v37 }
 0x1e7   : > { %3517 = vst [vmem:[%s5920_s6 + $0x18] sm:$0xff] %v4665_v30  ;;  %v3619_v8 = vmul.f32 %v4665_v30, %v4665_v30 }
 0x1e8   : > { %3515 = vst [vmem:[%s5920_s6 + $0x8] sm:$0xff] %v4671_v62  ;;  %v3578_v13 = vadd.f32 %v4671_v62, %v4659_v37  ;;  %v3617_v9 = vmul.f32 %v4671_v62, %v4671_v62 }
 0x1ea   : > { %v3579_v18 = vadd.f32 %v4653_v51, %v3578_v13  ;;  %v3648_v29 = vadd.f32 %v3617_v9, %v3616_v39  ;;  %v4606_v34 = vpop.f32.mrb[4].mxu0 }
 0x1eb   : > { %v4677_v23 = vadd.f32 %v4606_v34, %v4366_v52  ;;  %v3371_v45 = vpop.f32.mrb[5].mxu0 }
 0x1ec   : > { %v3649_v27 = vadd.f32 %v3648_v29, %v3618_v25  ;;  %v4683_v32 = vadd.f32 %v3371_v45, %v1626_v54  ;;  %v3580_v43 = vadd.f32 %v4665_v30, %v3579_v18  ;;  %v4607_v44 = vpop.f32.mrb[6].mxu0 }
 0x1ed   : > { %3520 = vst [vmem:[%s5920_s6 + $0x30] sm:$0xff] %v4677_v23  ;;  %v4689_v5 = vadd.f32 %v4607_v44, %v4367_v35  ;;  %v3374_v57 = vpop.f32.mrb[7].mxu0  ;;  %v3622_v41 = vmul.f32 %v4677_v23, %v4677_v23 }
 0x1ee   : > { %3518 = vst [vmem:[%s5920_s6 + $0x20] sm:$0xff] %v4683_v32  ;;  %v3581_v60 = vadd.f32 %v4683_v32, %v3580_v43  ;;  %v3620_v3 = vmul.f32 %v4683_v32, %v4683_v32  ;;  %v3650_v7 = vadd.f32 %v3649_v27, %v3619_v8  ;;  %v4695_v24 = vadd.f32 %v3374_v57, %v1629_v28 }
 0x1ef   : > { %3521 = vst [vmem:[%s5920_s6 + $0x38] sm:$0xff] %v4689_v5  ;;  %v3623_v59 = vmul.f32 %v4689_v5, %v4689_v5 }
 0x1f0   : > { %v3651_v15 = vadd.f32 %v3650_v7, %v3620_v3  ;;  %3519 = vst [vmem:[%s5920_s6 + $0x28] sm:$0xff] %v4695_v24  ;;  %v3582_v55 = vadd.f32 %v4695_v24, %v3581_v60  ;;  %v3621_v50 = vmul.f32 %v4695_v24, %v4695_v24 }
 0x1f2   : > { %v3583_v53 = vadd.f32 %v4677_v23, %v3582_v55  ;;  %v3652_v47 = vadd.f32 %v3651_v15, %v3621_v50  ;;  %v4610_v10 = vpop.f32.mrb[8].mxu0 }
 0x1f3   : > { %v4701_v17 = vadd.f32 %v4610_v10, %v4370_v36  ;;  %v3387_v40 = vpop.f32.mrb[9].mxu0 }
 0x1f4   : > { %v3653_v63 = vadd.f32 %v3652_v47, %v3622_v41  ;;  %v4707_v48 = vadd.f32 %v3387_v40, %v1642_v4  ;;  %v3584_v0 = vadd.f32 %v4689_v5, %v3583_v53  ;;  %v4611_v6 = vpop.f32.mrb[10].mxu0 }
 0x1f5   : > { %3524 = vst [vmem:[%s5920_s6 + $0x50] sm:$0xff] %v4701_v17  ;;  %v4713_v14 = vadd.f32 %v4611_v6, %v4371_v12  ;;  %v3390_v58 = vpop.f32.mrb[11].mxu0  ;;  %v3626_v31 = vmul.f32 %v4701_v17, %v4701_v17 }
 0x1f6   : > { %3522 = vst [vmem:[%s5920_s6 + $0x40] sm:$0xff] %v4707_v48  ;;  %v3585_v21 = vadd.f32 %v4707_v48, %v3584_v0  ;;  %v3624_v56 = vmul.f32 %v4707_v48, %v4707_v48  ;;  %v3654_v61 = vadd.f32 %v3653_v63, %v3623_v59  ;;  %v4719_v19 = vadd.f32 %v3390_v58, %v5906_v49 }
 0x1f7   : > { %3525 = vst [vmem:[%s5920_s6 + $0x58] sm:$0xff] %v4713_v14  ;;  %v3627_v4 = vmul.f32 %v4713_v14, %v4713_v14 }
 0x1f8   : > { %v3655_v46 = vadd.f32 %v3654_v61, %v3624_v56  ;;  %3523 = vst [vmem:[%s5920_s6 + $0x48] sm:$0xff] %v4719_v19  ;;  %v3586_v2 = vadd.f32 %v4719_v19, %v3585_v21  ;;  %v3625_v20 = vmul.f32 %v4719_v19, %v4719_v19 }
 0x1fa   : > { %v3587_v52 = vadd.f32 %v4701_v17, %v3586_v2  ;;  %v3656_v54 = vadd.f32 %v3655_v46, %v3625_v20  ;;  %v4614_v35 = vpop.f32.mrb[12].mxu0 }
 0x1fb   : > { %v4725_v28 = vadd.f32 %v4614_v35, %v5908_v16  ;;  %v3403_v36 = vpop.f32.mrb[13].mxu0 }
 0x1fc   : > { %v3657_v12 = vadd.f32 %v3656_v54, %v3626_v31  ;;  %v4731_v49 = vadd.f32 %v3403_v36, %v5910_v33  ;;  %v3588_v11 = vadd.f32 %v4713_v14, %v3587_v52  ;;  %v4615_v51 = vpop.f32.mrb[14].mxu0 }
 0x1fd   : > { %3528 = vst [vmem:[%s5920_s6 + $0x70] sm:$0xff] %v4725_v28  ;;  %v4737_v22 = vadd.f32 %v4615_v51, %v5912_v42  ;;  %v3406_v37 = vpop.f32.mrb[15].mxu0  ;;  %v3630_v33 = vmul.f32 %v4725_v28, %v4725_v28 }
 0x1fe   : > { %3526 = vst [vmem:[%s5920_s6 + $0x60] sm:$0xff] %v4731_v49  ;;  %v3589_v1 = vadd.f32 %v4731_v49, %v3588_v11  ;;  %v3628_v30 = vmul.f32 %v4731_v49, %v4731_v49  ;;  %v3658_v26 = vadd.f32 %v3657_v12, %v3627_v4  ;;  %v4743_v62 = vadd.f32 %v3406_v37, %v5914_v38 }
 0x1ff   : > { %3529 = vst [vmem:[%s5920_s6 + $0x78] sm:$0xff] %v4737_v22  ;;  %v3631_v34 = vmul.f32 %v4737_v22, %v4737_v22 }
 0x200   : > { %v3659_v16 = vadd.f32 %v3658_v26, %v3628_v30  ;;  %3527 = vst [vmem:[%s5920_s6 + $0x68] sm:$0xff] %v4743_v62  ;;  %v3590_v39 = vadd.f32 %v4743_v62, %v3589_v1  ;;  %v3629_v13 = vmul.f32 %v4743_v62, %v4743_v62 }
 0x201   : > { %v4426_v9 = vpop.f32.mrb[16].mxu1 }
 0x202   : > { %v3591_v25 = vadd.f32 %v4725_v28, %v3590_v39  ;;  %v3660_v18 = vadd.f32 %v3659_v16, %v3629_v13  ;;  %v4618_v29 = vpop.f32.mrb[16].mxu0  ;;  %v2009_v42 = vpop.f32.mrb[17].mxu1 }
 0x203   : > { %v3419_v23 = vpop.f32.mrb[17].mxu0  ;;  %v4427_v45 = vpop.f32.mrb[18].mxu1  ;;  %v4749_v38 = vadd.f32 %v4618_v29, %v4426_v9 }
 0x204   : > { %v3661_v8 = vadd.f32 %v3660_v18, %v3630_v33  ;;  %v3592_v27 = vadd.f32 %v4737_v22, %v3591_v25  ;;  %v4619_v32 = vpop.f32.mrb[18].mxu0  ;;  %v2012_v43 = vpop.f32.mrb[19].mxu1  ;;  %v4755_v44 = vadd.f32 %v3419_v23, %v2009_v42 }
 0x205   : > { %v3422_v5 = vpop.f32.mrb[19].mxu0  ;;  %3532 = vst [vmem:[%s5920_s6 + $0x90] sm:$0xff] %v4749_v38  ;;  %v4761_v60 = vadd.f32 %v4619_v32, %v4427_v45  ;;  %v3634_v10 = vmul.f32 %v4749_v38, %v4749_v38 }
 0x206   : > { %v3662_v57 = vadd.f32 %v3661_v8, %v3631_v34  ;;  %3530 = vst [vmem:[%s5920_s6 + $0x80] sm:$0xff] %v4755_v44  ;;  %v3593_v3 = vadd.f32 %v4755_v44, %v3592_v27  ;;  %v3632_v7 = vmul.f32 %v4755_v44, %v4755_v44  ;;  %v4767_v24 = vadd.f32 %v3422_v5, %v2012_v43 }
 0x207   : > { %3533 = vst [vmem:[%s5920_s6 + $0x98] sm:$0xff] %v4761_v60  ;;  %v3635_v48 = vmul.f32 %v4761_v60, %v4761_v60 }
 0x208   : > { %v3663_v15 = vadd.f32 %v3662_v57, %v3632_v7  ;;  %3531 = vst [vmem:[%s5920_s6 + $0x88] sm:$0xff] %v4767_v24  ;;  %v3594_v55 = vadd.f32 %v4767_v24, %v3593_v3  ;;  %v3633_v50 = vmul.f32 %v4767_v24, %v4767_v24 }
 0x209   : > { %v4430_v41 = vpop.f32.mrb[20].mxu1 }
 0x20a   : > { %v4622_v53 = vpop.f32.mrb[20].mxu0  ;;  %v2025_v47 = vpop.f32.mrb[21].mxu1  ;;  %v3595_v17 = vadd.f32 %v4749_v38, %v3594_v55  ;;  %v3664_v40 = vadd.f32 %v3663_v15, %v3633_v50 }
 0x20b   : > { %v3435_v59 = vpop.f32.mrb[21].mxu0  ;;  %v4431_v63 = vpop.f32.mrb[22].mxu1  ;;  %v4773_v0 = vadd.f32 %v4622_v53, %v4430_v41 }
 0x20c   : > { %v4623_v6 = vpop.f32.mrb[22].mxu0  ;;  %v2028_v14 = vpop.f32.mrb[23].mxu1  ;;  %v3665_v58 = vadd.f32 %v3664_v40, %v3634_v10  ;;  %v4779_v21 = vadd.f32 %v3435_v59, %v2025_v47  ;;  %v3596_v56 = vadd.f32 %v4761_v60, %v3595_v17 }
 0x20d   : > { %v3438_v61 = vpop.f32.mrb[23].mxu0  ;;  %3536 = vst [vmem:[%s5920_s6 + $0xb0] sm:$0xff] %v4773_v0  ;;  %v4785_v19 = vadd.f32 %v4623_v6, %v4431_v63  ;;  %v3638_v12 = vmul.f32 %v4773_v0, %v4773_v0 }
 0x20e   : > { %3534 = vst [vmem:[%s5920_s6 + $0xa0] sm:$0xff] %v4779_v21  ;;  %v3597_v46 = vadd.f32 %v4779_v21, %v3596_v56  ;;  %v3636_v2 = vmul.f32 %v4779_v21, %v4779_v21  ;;  %v3666_v20 = vadd.f32 %v3665_v58, %v3635_v48  ;;  %v4791_v31 = vadd.f32 %v3438_v61, %v2028_v14 }
 0x20f   : > { %3537 = vst [vmem:[%s5920_s6 + $0xb8] sm:$0xff] %v4785_v19  ;;  %v3639_v37 = vmul.f32 %v4785_v19, %v4785_v19 }
 0x210   : > { %v3667_v52 = vadd.f32 %v3666_v20, %v3636_v2  ;;  %3535 = vst [vmem:[%s5920_s6 + $0xa8] sm:$0xff] %v4791_v31  ;;  %v3598_v54 = vadd.f32 %v4791_v31, %v3597_v46  ;;  %v3637_v35 = vmul.f32 %v4791_v31, %v4791_v31 }
 0x211   : > { %v4434_v28 = vpop.f32.mrb[24].mxu1 }
 0x212   : > { %v4626_v36 = vpop.f32.mrb[24].mxu0  ;;  %v2041_v4 = vpop.f32.mrb[25].mxu1  ;;  %v3599_v49 = vadd.f32 %v4773_v0, %v3598_v54  ;;  %v3668_v11 = vadd.f32 %v3667_v52, %v3637_v35 }
 0x213   : > { %v3451_v51 = vpop.f32.mrb[25].mxu0  ;;  %v4435_v22 = vpop.f32.mrb[26].mxu1  ;;  %v4797_v1 = vadd.f32 %v4626_v36, %v4434_v28 }
 0x214   : > { %v4627_v30 = vpop.f32.mrb[26].mxu0  ;;  %v2044_v26 = vpop.f32.mrb[27].mxu1  ;;  %v3669_v62 = vadd.f32 %v3668_v11, %v3638_v12  ;;  %v4803_v16 = vadd.f32 %v3451_v51, %v2041_v4  ;;  %v3600_v39 = vadd.f32 %v4785_v19, %v3599_v49 }
 0x215   : > { %v3454_v13 = vpop.f32.mrb[27].mxu0  ;;  %3540 = vst [vmem:[%s5920_s6 + $0xd0] sm:$0xff] %v4797_v1  ;;  %v4809_v9 = vadd.f32 %v4627_v30, %v4435_v22  ;;  %v3642_v27 = vmul.f32 %v4797_v1, %v4797_v1 }
 0x216   : > { %3538 = vst [vmem:[%s5920_s6 + $0xc0] sm:$0xff] %v4803_v16  ;;  %v3601_v33 = vadd.f32 %v4803_v16, %v3600_v39  ;;  %v3640_v25 = vmul.f32 %v4803_v16, %v4803_v16  ;;  %v3670_v18 = vadd.f32 %v3669_v62, %v3639_v37  ;;  %v4815_v29 = vadd.f32 %v3454_v13, %v2044_v26 }
 0x217   : > { %3541 = vst [vmem:[%s5920_s6 + $0xd8] sm:$0xff] %v4809_v9  ;;  %v3643_v57 = vmul.f32 %v4809_v9, %v4809_v9 }
 0x218   : > { %v3671_v42 = vadd.f32 %v3670_v18, %v3640_v25  ;;  %3539 = vst [vmem:[%s5920_s6 + $0xc8] sm:$0xff] %v4815_v29  ;;  %v3602_v34 = vadd.f32 %v4815_v29, %v3601_v33  ;;  %v3641_v23 = vmul.f32 %v4815_v29, %v4815_v29 }
 0x219   : > { %v4438_v45 = vpop.f32.mrb[28].mxu1 }
 0x21a   : > { %v4630_v8 = vpop.f32.mrb[28].mxu0  ;;  %v2057_v38 = vpop.f32.mrb[29].mxu1  ;;  %v3603_v32 = vadd.f32 %v4797_v1, %v3602_v34  ;;  %v3672_v43 = vadd.f32 %v3671_v42, %v3641_v23 }
 0x21b   : > { %v3467_v44 = vpop.f32.mrb[29].mxu0  ;;  %v4439_v5 = vpop.f32.mrb[30].mxu1  ;;  %v4821_v60 = vadd.f32 %v4630_v8, %v4438_v45 }
 0x21c   : > { %v4631_v3 = vpop.f32.mrb[30].mxu0  ;;  %v2060_v7 = vpop.f32.mrb[31].mxu1  ;;  %v3673_v24 = vadd.f32 %v3672_v43, %v3642_v27  ;;  %v4827_v15 = vadd.f32 %v3467_v44, %v2057_v38  ;;  %v3604_v55 = vadd.f32 %v4809_v9, %v3603_v32 }
 0x21d   : > { %v3470_v50 = vpop.f32.mrb[31].mxu0  ;;  %3544 = vst [vmem:[%s5920_s6 + $0xf0] sm:$0xff] %v4821_v60  ;;  %v4833_v41 = vadd.f32 %v4631_v3, %v4439_v5  ;;  %v3646_v48 = vmul.f32 %v4821_v60, %v4821_v60 }
 0x21e   : > { %3542 = vst [vmem:[%s5920_s6 + $0xe0] sm:$0xff] %v4827_v15  ;;  %v3605_v53 = vadd.f32 %v4827_v15, %v3604_v55  ;;  %v3644_v47 = vmul.f32 %v4827_v15, %v4827_v15  ;;  %v3674_v10 = vadd.f32 %v3673_v24, %v3643_v57  ;;  %v4839_v17 = vadd.f32 %v3470_v50, %v2060_v7 }
 0x21f   : > { %3545 = vst [vmem:[%s5920_s6 + $0xf8] sm:$0xff] %v4833_v41  ;;  %v3647_v14 = vmul.f32 %v4833_v41, %v4833_v41 }
 0x220   : > { %v3675_v40 = vadd.f32 %v3674_v10, %v3644_v47  ;;  %3543 = vst [vmem:[%s5920_s6 + $0xe8] sm:$0xff] %v4839_v17  ;;  %v3606_v59 = vadd.f32 %v4839_v17, %v3605_v53  ;;  %v3645_v63 = vmul.f32 %v4839_v17, %v4839_v17 }
 0x222   : > { %v3607_v0 = vadd.f32 %v4821_v60, %v3606_v59  ;;  %v3676_v6 = vadd.f32 %v3675_v40, %v3645_v63 }
 0x224   : > { %v3608_v58 = vadd.f32 %v4833_v41, %v3607_v0  ;;  %v3677_v21 = vadd.f32 %v3676_v6, %v3646_v48 }
 0x226   : > { %v3609_v56 = vrot.slane %v3608_v58, 4  ;;  %v3678_v61 = vadd.f32 %v3677_v21, %v3647_v14 }
 0x228   : > { %v3610_v19 = vadd.f32 %v3609_v56, %v3608_v58  ;;  %v3679_v46 = vrot.slane %v3678_v61, 4 }
 0x22a   : > { %v3611_v2 = vrot.slane %v3610_v19, 2  ;;  %v3680_v20 = vadd.f32 %v3679_v46, %v3678_v61 }
 0x22c   : > { %v3612_v31 = vadd.f32 %v3611_v2, %v3610_v19  ;;  %v3681_v52 = vrot.slane %v3680_v20, 2 }
 0x22e   : > { %v3613_v54 = vrot.slane %v3612_v31, 1  ;;  %v3682_v35 = vadd.f32 %v3681_v52, %v3680_v20 }
 0x230   : > { %v3614_v28 = vadd.f32 %v3613_v54, %v3612_v31  ;;  %v3683_v36 = vrot.slane %v3682_v35, 1 }
 0x232   : > { %3615 = vst [vmem:[%s181_s11] sm:$0x1] %v3614_v28  ;;  %v3684_v4 = vadd.f32 %v3683_v36, %v3682_v35 }
 0x234   : > { %3685 = vst [vmem:[%s181_s11 + $0x1] sm:$0x1] %v3684_v4 }
 0x235 PF: > { %s14_s12 = sadd.s32 1, %s5160_s12  }
 0x236   : > { %p11_p4 = scmp.ge.s32.totalorder %s14_s12, 4  }
 0x238   :  { %13 = sbr.rel (!%p11_p4) target bundleno = 1 (0x1), region = 78 }

// kernel: double_conv.4
= control target key start
LH: loop header
LB: loop body
LE: loop exit
PB: predicated region body
PF: predicated region fallthrough
CT: control target
= control target key end

     0   :  { %s5433_s15 = smov 0   ;;  %s6375_s0 = inlined_call_operand.vmem [shape: f32[2,256,128], index: 0, kind: input, shape index: {}]   ;;  %s6376_s1 = inlined_call_operand.vmem [shape: f32[2,128], index: 1, kind: input, shape index: {}]   ;;  %s6377_s2 = inlined_call_operand.vmem [shape: bf16[3,3,128,128], index: 2, kind: input, shape index: {}]   ;;  %s6378_s3 = inlined_call_operand.vmem [shape: f32[2,256,128], index: 3, kind: output, shape index: {0}]   ;;  %s6379_s4 = inlined_call_operand.vmem [shape: f32[2,2,128], index: 4, kind: output, shape index: {1}]  }
   0x1 LB: > { %s4013_s16 = sadd.s32 4294967295, %s5405_s15   ;;  %p4017_p0 = scmp.ge.s32.totalorder %s5405_s15, 1  ;;  %s5405_s15 = sphi %s5433_s15, %s15_s15  }
   0x2   : > { %p165_p1 = scmp.lt.s32.totalorder %s5405_s15, 3 }
   0x4   : > { %p166_p2 = pnand %p4017_p0, %p165_p1 }
   0x6   : > { %169 = sbr.rel (%p166_p2) target bundleno = 571 (0x23b), region = 32 }
   0xd   : > { %v5318_v0 = vld [vmem:[%s6377_s2] sm:$0xff]   ;;  %v5407_v2 = vmov 0.0   ;;  %v5320_v3 = vld [vmem:[%s6377_s2 + $0x8] sm:$0xff]   ;;  %p195_p3 = scmp.lt.s32.totalorder %s4013_s16, 1  ;;  %v5322_v5 = vld [vmem:[%s6377_s2 + $0x10] sm:$0xff]   ;;  %vm2744_vm1 = vcmask 1046528  }
   0xe   : > { %v5319_v1 = vld [vmem:[%s6377_s2 + $0x100] sm:$0xff]   ;;  %348 = vst [vmem:[#allocation2] sm:$0xff] %v5407_v2  ;;  %349 = vst [vmem:[#allocation2 + $0x8] sm:$0xff] %v5407_v2  ;;  %4445 = vmatprep.subr.bf16.mxu1 %v5318_v0  ;;  %v5321_v4 = vld [vmem:[%s6377_s2 + $0x108] sm:$0xff]   ;;  %vm1511_vm0 = vsmask.f32 7424 }
   0xf   : > { %350 = vst [vmem:[#allocation2 + $0x10] sm:$0x3] %v5407_v2  ;;  %352 = vst [vmem:[#allocation2 + $0x198] sm:$0xff] %v5407_v2  ;;  %4637 = vmatprep.subr.bf16.mxu0 %v5319_v1  ;;  %4446 = vmatpush3.bf16.msra.mxu1 %v5318_v0  ;;  %v5323_v6 = vld [vmem:[%s6377_s2 + $0x110] sm:$0xff]   ;;  %s6397_s16 = smov (!%p195_p3, %s4013_s16), 1  ;;  %v5324_v7 = vld [vmem:[%s6377_s2 + $0x18] sm:$0xff]  }
  0x10   : > { %354 = vst [vmem:[#allocation2 + $0x1a8] sm:$0x3] %v5407_v2  ;;  %356 = vst [vmem:[#allocation2 + $0x18] sm:$0x1] %v5407_v2  ;;  %4638 = vmatpush3.bf16.msra.mxu0 %v5319_v1  ;;  %4447 = vmatprep.subr.bf16.mxu1 %v5320_v3  ;;  %v5325_v8 = vld [vmem:[%s6377_s2 + $0x118] sm:$0xff]   ;;  %s4227_s7 = sshll.u32 %s6397_s16, 8 }
  0x11   : > { %357 = vst [vmem:[#allocation2 + $0x30] sm:$0x1] %v5407_v2  ;;  %358 = vst [vmem:[#allocation2 + $0x48] sm:$0x1] %v5407_v2  ;;  %4639 = vmatprep.subr.bf16.mxu0 %v5321_v4  ;;  %v5326_v9 = vld [vmem:[%s6377_s2 + $0x20] sm:$0xff]   ;;  %v5328_v11 = vld [vmem:[%s6377_s2 + $0x28] sm:$0xff]   ;;  %s5527_s18 = scalar_lea.vmem %s6375_s0, %s4227_s7 }
  0x12   : > { %359 = vst [vmem:[#allocation2 + $0x60] sm:$0x1] %v5407_v2  ;;  %360 = vst [vmem:[#allocation2 + $0x78] sm:$0x1] %v5407_v2  ;;  %v5327_v10 = vld [vmem:[%s6377_s2 + $0x120] sm:$0xff]   ;;  %v5329_v12 = vld [vmem:[%s6377_s2 + $0x128] sm:$0xff]  }
  0x13   : > { %361 = vst [vmem:[#allocation2 + $0x90] sm:$0x1] %v5407_v2  ;;  %362 = vst [vmem:[#allocation2 + $0xa8] sm:$0x1] %v5407_v2  ;;  %4448 = vmatpush3.bf16.msra.mxu1 %v5320_v3  ;;  %v5535_v14 = vld [vmem:[%s6376_s1] ss:$0 sm:$0xff] }
  0x14   : > { %363 = vst [vmem:[#allocation2 + $0xc0] sm:$0x1] %v5407_v2  ;;  %364 = vst [vmem:[#allocation2 + $0xd8] sm:$0x1] %v5407_v2  ;;  %4640 = vmatpush3.bf16.msra.mxu0 %v5321_v4  ;;  %4449 = vmatprep.subr.bf16.mxu1 %v5322_v5  ;;  %v5540_v15 = vld [vmem:[%s6376_s1 + $0x1] ss:$0 sm:$0xff] }
  0x15   : > { %365 = vst [vmem:[#allocation2 + $0xf0] sm:$0x1] %v5407_v2  ;;  %366 = vst [vmem:[#allocation2 + $0x108] sm:$0x1] %v5407_v2  ;;  %4641 = vmatprep.subr.bf16.mxu0 %v5323_v6  ;;  %v212_v17 = vld [vmem:[%s5527_s18] sm:$0xff]  ;;  %v213_v18 = vld [vmem:[%s5527_s18 + $0x8] sm:$0xff] }
  0x16   : > { %367 = vst [vmem:[#allocation2 + $0x120] sm:$0x1] %v5407_v2  ;;  %368 = vst [vmem:[#allocation2 + $0x138] sm:$0x1] %v5407_v2  ;;  %v248_v19 = vmul.f32 %v5535_v14, %v212_v17  ;;  %v249_v20 = vmul.f32 %v5535_v14, %v213_v18  ;;  %v214_v21 = vld [vmem:[%s5527_s18 + $0x10] sm:$0xff]  ;;  %v215_v22 = vld [vmem:[%s5527_s18 + $0x18] sm:$0xff] }
  0x17   : > { %369 = vst [vmem:[#allocation2 + $0x150] sm:$0x1] %v5407_v2  ;;  %370 = vst [vmem:[#allocation2 + $0x168] sm:$0x1] %v5407_v2  ;;  %4450 = vmatpush3.bf16.msra.mxu1 %v5322_v5  ;;  %v250_v23 = vmul.f32 %v5535_v14, %v214_v21  ;;  %v5330_v24 = vld [vmem:[%s6377_s2 + $0x30] sm:$0xff]   ;;  %v251_v27 = vmul.f32 %v5535_v14, %v215_v22  ;;  %v216_v30 = vld [vmem:[%s5527_s18 + $0x20] sm:$0xff] }
  0x18   : > { %371 = vst [vmem:[#allocation2 + $0x180] sm:$0x1] %v5407_v2  ;;  %374 = vst [vmem:[#allocation2 + $0x29] sm:$0x1] %v5407_v2  ;;  %4642 = vmatpush3.bf16.msra.mxu0 %v5323_v6  ;;  %4451 = vmatprep.subr.bf16.mxu1 %v5324_v7  ;;  %v284_v25 = vadd.f32 %v5540_v15, %v248_v19  ;;  %v285_v26 = vadd.f32 %v5540_v15, %v249_v20  ;;  %v5331_v28 = vld [vmem:[%s6377_s2 + $0x130] sm:$0xff]   ;;  %v217_v31 = vld [vmem:[%s5527_s18 + $0x28] sm:$0xff] }
  0x19   : > { %375 = vst [vmem:[#allocation2 + $0x41] sm:$0x1] %v5407_v2  ;;  %376 = vst [vmem:[#allocation2 + $0x59] sm:$0x1] %v5407_v2  ;;  %4643 = vmatprep.subr.bf16.mxu0 %v5325_v8  ;;  %v286_v29 = vadd.f32 %v5540_v15, %v250_v23  ;;  %v287_v34 = vadd.f32 %v5540_v15, %v251_v27  ;;  %v252_v35 = vmul.f32 %v5535_v14, %v216_v30  ;;  %v218_v38 = vld [vmem:[%s5527_s18 + $0x30] sm:$0xff]  ;;  %v219_v39 = vld [vmem:[%s5527_s18 + $0x38] sm:$0xff] }
  0x1a   : > { %377 = vst [vmem:[#allocation2 + $0x71] sm:$0x1] %v5407_v2  ;;  %378 = vst [vmem:[#allocation2 + $0x89] sm:$0x1] %v5407_v2  ;;  %v316_v32 = vmax.f32 %v284_v25, 0.0  ;;  %v317_v33 = vmax.f32 %v285_v26, 0.0  ;;  %v253_v37 = vmul.f32 %v5535_v14, %v217_v31  ;;  %v254_v43 = vmul.f32 %v5535_v14, %v218_v38 }
  0x1b   : > { %379 = vst [vmem:[#allocation2 + $0xa1] sm:$0x1] %v5407_v2  ;;  %380 = vst [vmem:[#allocation2 + $0xb9] sm:$0x1] %v5407_v2  ;;  %4452 = vmatpush3.bf16.msra.mxu1 %v5324_v7  ;;  %v318_v36 = vmax.f32 %v286_v29, 0.0  ;;  %v5332_v40 = vld [vmem:[%s6377_s2 + $0x38] sm:$0xff]   ;;  %v288_v42 = vadd.f32 %v5540_v15, %v252_v35  ;;  %v255_v44 = vmul.f32 %v5535_v14, %v219_v39 }
  0x1c   : > { %381 = vst [vmem:[#allocation2 + $0xd1] sm:$0x1] %v5407_v2  ;;  %382 = vst [vmem:[#allocation2 + $0xe9] sm:$0x1] %v5407_v2  ;;  %4644 = vmatpush3.bf16.msra.mxu0 %v5325_v8  ;;  %4453 = vmatprep.subr.bf16.mxu1 %v5326_v9  ;;  %v319_v41 = vmax.f32 %v287_v34, 0.0  ;;  %v5333_v45 = vld [vmem:[%s6377_s2 + $0x138] sm:$0xff]   ;;  %v289_v46 = vadd.f32 %v5540_v15, %v253_v37  ;;  %v290_v48 = vadd.f32 %v5540_v15, %v254_v43 }
  0x1d   : > { %383 = vst [vmem:[#allocation2 + $0x101] sm:$0x1] %v5407_v2  ;;  %384 = vst [vmem:[#allocation2 + $0x119] sm:$0x1] %v5407_v2  ;;  %4645 = vmatprep.subr.bf16.mxu0 %v5327_v10  ;;  %v320_v47 = vmax.f32 %v288_v42, 0.0  ;;  %v291_v49 = vadd.f32 %v5540_v15, %v255_v44  ;;  %v220_v50 = vld [vmem:[%s5527_s18 + $0x40] sm:$0xff] }
  0x1e   : > { %385 = vst [vmem:[#allocation2 + $0x131] sm:$0x1] %v5407_v2  ;;  %386 = vst [vmem:[#allocation2 + $0x149] sm:$0x1] %v5407_v2  ;;  %v221_v51 = vld [vmem:[%s5527_s18 + $0x48] sm:$0xff]  ;;  %v5334_v52 = vld [vmem:[%s6377_s2 + $0xc0] sm:$0xff]   ;;  %v256_v54 = vmul.f32 %v5535_v14, %v220_v50 }
  0x1f   : > { %387 = vst [vmem:[#allocation2 + $0x161] sm:$0x1] %v5407_v2  ;;  %388 = vst [vmem:[#allocation2 + $0x179] sm:$0x1] %v5407_v2  ;;  %4454 = vmatpush3.bf16.msra.mxu1 %v5326_v9  ;;  %v321_v53 = vmax.f32 %v289_v46, 0.0  ;;  %v257_v55 = vmul.f32 %v5535_v14, %v221_v51  ;;  %v222_v56 = vld [vmem:[%s5527_s18 + $0x50] sm:$0xff] }
  0x20   : > { %389 = vst [vmem:[#allocation2 + $0x191] sm:$0x1] %v5407_v2  ;;  %355 = vst [vmem:[#allocation2] sm:$0x1] %v5407_v2  ;;  %4646 = vmatpush3.bf16.msra.mxu0 %v5327_v10  ;;  %4455 = vmatprep.subr.bf16.mxu1 %v5328_v11  ;;  %v5593_v57 = vld [vmem:[%s6377_s2 + $0x1c0] sm:$0xff]   ;;  %v322_v58 = vmax.f32 %v290_v48, 0.0  ;;  %v258_v61 = vmul.f32 %v5535_v14, %v222_v56  ;;  %v292_v62 = vadd.f32 %v5540_v15, %v256_v54 }
  0x21   : > { %372 = vst [vmem:[#allocation2 + $0x198] sm:$0x1] %v5407_v2  ;;  %373 = vst [vmem:[#allocation2 + $0x11] sm:$0x1] %v5407_v2  ;;  %4647 = vmatprep.subr.bf16.mxu0 %v5329_v12  ;;  %v323_v59 = vmax.f32 %v291_v49, 0.0  ;;  %v223_v60 = vld [vmem:[%s5527_s18 + $0x58] sm:$0xff]  ;;  %v293_v63 = vadd.f32 %v5540_v15, %v257_v55 }
  0x22   : > { %390 = vst [vmem:[#allocation2 + $0x1a9] sm:$0x1] %v5407_v2  ;;  %392 = vst [vmem:[#allocation2 + $0x19] sm:$0xff] %v316_v32  ;;  %v259_v0 = vmul.f32 %v5535_v14, %v223_v60  ;;  %v5603_v1 = vld [vmem:[%s6377_s2 + $0xc8] sm:$0xff]   ;;  %v224_v3 = vld [vmem:[%s5527_s18 + $0x60] sm:$0xff]  ;;  %v324_v8 = vmax.f32 %v292_v62, 0.0 }
  0x23   : > { %4456 = vmatpush3.bf16.msra.mxu1 %v5328_v11  ;;  %393 = vst [vmem:[#allocation2 + $0x21] sm:$0xff] %v317_v33  ;;  %394 = vst [vmem:[#allocation2 + $0x31] sm:$0xff] %v318_v36  ;;  %v225_v4 = vld [vmem:[%s5527_s18 + $0x68] sm:$0xff]  ;;  %v325_v9 = vmax.f32 %v293_v63, 0.0  ;;  %v260_v11 = vmul.f32 %v5535_v14, %v224_v3  ;;  %v227_v29 = vld [vmem:[%s5527_s18 + $0x78] sm:$0xff] }
  0x24   : > { %4648 = vmatpush3.bf16.msra.mxu0 %v5329_v12  ;;  %4457 = vmatprep.subr.bf16.mxu1 %v5330_v24  ;;  %395 = vst [vmem:[#allocation2 + $0x39] sm:$0xff] %v319_v41  ;;  %396 = vst [vmem:[#allocation2 + $0x49] sm:$0xff] %v320_v47  ;;  %v295_v10 = vadd.f32 %v5540_v15, %v259_v0  ;;  %v261_v19 = vmul.f32 %v5535_v14, %v225_v4  ;;  %v5340_v39 = vld [vmem:[%s6377_s2 + $0xd0] sm:$0xff]  }
  0x25   : > { %4649 = vmatprep.subr.bf16.mxu0 %v5331_v28  ;;  %397 = vst [vmem:[#allocation2 + $0x51] sm:$0xff] %v321_v53  ;;  %398 = vst [vmem:[#allocation2 + $0x61] sm:$0xff] %v322_v58  ;;  %v296_v23 = vadd.f32 %v5540_v15, %v260_v11  ;;  %v5635_v41 = vmul.f32 %v5535_v14, %v227_v29  ;;  %v5650_v53 = vld [vmem:[%s6377_s2 + $0xd8] sm:$0xff]   ;;  %v228_v29 = vld [vmem:[%s5527_s18 + $0x80] sm:$0xff] }
  0x26   : > { %399 = vst [vmem:[#allocation2 + $0x69] sm:$0xff] %v323_v59  ;;  %400 = vst [vmem:[#allocation2 + $0x79] sm:$0xff] %v324_v8  ;;  %v327_v22 = vmax.f32 %v295_v10, 0.0  ;;  %v297_v33 = vadd.f32 %v5540_v15, %v261_v19 }
  0x27   : > { %v424_v13 = vld [vmem:[#allocation2] sm:$0xff]  ;;  %4458 = vmatpush3.bf16.msra.mxu1 %v5330_v24  ;;  %401 = vst [vmem:[#allocation2 + $0x81] sm:$0xff] %v325_v9  ;;  %v328_v34 = vmax.f32 %v296_v23, 0.0 }
  0x28   : > { %v5543_v16 = vpack.c.bf16 %v5407_v2, %v424_v13  ;;  %4650 = vmatpush3.bf16.msra.mxu0 %v5331_v28  ;;  %4459 = vmatprep.subr.bf16.mxu1 %v5332_v40  ;;  %v294_v2 = vadd.f32 %v5540_v15, %v258_v61  ;;  %v226_v28 = vld [vmem:[%s5527_s18 + $0x70] sm:$0xff]  ;;  %403 = vst [vmem:[#allocation2 + $0x99] sm:$0xff] %v327_v22 }
  0x29   : > { %4651 = vmatprep.subr.bf16.mxu0 %v5333_v45  ;;  %v427_v5 = vld [vmem:[#allocation2 + $0x18] sm:$0xff]  ;;  %404 = vst [vmem:[#allocation2 + $0xa9] sm:$0xff] %v328_v34  ;;  %v230_v34 = vld [vmem:[%s5527_s18 + $0x90] sm:$0xff] }
  0x2a   : > { %4461 = vmatprep.mubr.bf16.mxu1 %v5543_v16  ;;  %v428_v6 = vld [vmem:[#allocation2 + $0x20] sm:$0xff]  ;;  %v429_v7 = vld [vmem:[#allocation2 + $0x28] sm:$0x3]  ;;  %v430_v17 = vld [vmem:[#allocation2 + $0x30] sm:$0xff]  ;;  %v326_v18 = vmax.f32 %v294_v2, 0.0 }
  0x2b   : > { %4460 = vmatpush3.bf16.msra.mxu1 %v5332_v40  ;;  %v5610_v12 = vpack.c.bf16 %v428_v6, %v427_v5  ;;  %v5612_v13 = vpack.c.bf16 %v429_v7, %v429_v7  ;;  %v431_v20 = vld [vmem:[#allocation2 + $0x38] sm:$0xff]  ;;  %v432_v21 = vld [vmem:[#allocation2 + $0x40] sm:$0x3]  ;;  %v433_v32 = vld [vmem:[#allocation2 + $0x48] sm:$0xff]  ;;  %v262_v40 = vmul.f32 %v5535_v14, %v226_v28 }
  0x2c   : > { %4652 = vmatpush3.bf16.msra.mxu0 %v5333_v45  ;;  %4493 = vmatprep.subr.bf16.mxu1 %v5334_v52  ;;  %402 = vst [vmem:[#allocation2 + $0x91] sm:$0xff] %v326_v18  ;;  %v5624_v30 = vpack.c.bf16 %v431_v20, %v430_v17  ;;  %v5626_v31 = vpack.c.bf16 %v432_v21, %v432_v21  ;;  %v434_v37 = vld [vmem:[#allocation2 + $0x50] sm:$0xff]  ;;  %v435_v38 = vld [vmem:[#allocation2 + $0x58] sm:$0x3]  ;;  %v436_v46 = vld [vmem:[#allocation2 + $0x60] sm:$0xff] }
  0x2d   : > { %4685 = vmatprep.subr.bf16.mxu0 %v5593_v57  ;;  %v1525_v24 = vshrl.u32 %v5610_v12, 16  ;;  %v1527_v25 = vshll.u32 %v5610_v12, 16  ;;  %v1532_v26 = vshll.u32 %v5612_v13, 16  ;;  %v2749_v27 = vrot.slane %v5612_v13, 1  ;;  %v437_v47 = vld [vmem:[#allocation2 + $0x68] sm:$0xff]  ;;  %v439_v63 = vld [vmem:[#allocation2 + $0x78] sm:$0xff] }
  0x2e   : > { %4462 = vmatmul.mubr.bf16.vlgmr.msra.gmra.mrb[0].mxu1 %v5610_v12  ;;  %v1537_v42 = vshrl.u32 %v5624_v30, 16  ;;  %v1539_v43 = vshll.u32 %v5624_v30, 16  ;;  %v1544_v44 = vshll.u32 %v5626_v31, 16  ;;  %v5641_v45 = vpack.c.bf16 %v434_v37, %v433_v32  ;;  %v438_v50 = vld [vmem:[#allocation2 + $0x70] sm:$0x3]  ;;  %v440_v0 = vld [vmem:[#allocation2 + $0x80] sm:$0xff] }
  0x2f   : > { %4494 = vmatpush3.bf16.msra.mxu1 %v5334_v52  ;;  %v1529_v35 = vrot.slane %v1527_v25, 1  ;;  %v1534_v36 = vrot.slane %v1532_v26, 1  ;;  %4465 = vmatprep.mubr.bf16.mxu1 %v5624_v30  ;;  %v5643_v49 = vpack.c.bf16 %v435_v38, %v435_v38  ;;  %v5645_v51 = vpack.c.bf16 %v437_v47, %v436_v46  ;;  %v441_v2 = vld [vmem:[#allocation2 + $0x88] sm:$0x3]  ;;  %v444_v17 = vld [vmem:[#allocation2 + $0xa0] sm:$0x3] }
  0x30   : > { %4495 = vmatprep.subr.bf16.mxu1 %v5603_v1  ;;  %v329_v52 = vmax.f32 %v297_v33, 0.0  ;;  %v1541_v54 = vrot.slane %v1539_v43, 1  ;;  %v1546_v55 = vrot.slane %v1544_v44, 1  ;;  %v1549_v56 = vshrl.u32 %v5641_v45, 16  ;;  %v5336_v7 = vld [vmem:[%s6377_s2 + $0x1c8] sm:$0xff]   ;;  %v5346_v33 = vld [vmem:[%s6377_s2 + $0xe0] sm:$0xff]  }
  0x31   : > { %v1530_v48 = vor.u32 %v1529_v35, %v1525_v24  ;;  %v1551_v58 = vshll.u32 %v5641_v45, 16  ;;  %v1556_v60 = vshll.u32 %v5643_v49, 16  ;;  %v5659_v61 = vpack.c.bf16 %v438_v50, %v438_v50  ;;  %v5683_v24 = vld [vmem:[%s6377_s2 + $0x1d0] sm:$0xff]   ;;  %v229_v32 = vld [vmem:[%s5527_s18 + $0x88] sm:$0xff] }
  0x32   : > { %v1561_v62 = vshrl.u32 %v5645_v51, 16  ;;  %405 = vst [vmem:[#allocation2 + $0xb1] sm:$0xff] %v329_v52  ;;  %v1542_v3 = vor.u32 %v1541_v54, %v1537_v42  ;;  %v5664_v5 = vpack.c.bf16 %v440_v0, %v439_v63  ;;  %v5671_v10 = vpack.c.bf16 %v441_v2, %v441_v2  ;;  %v445_v38 = vld [vmem:[#allocation2 + $0xa8] sm:$0xff] }
  0x33   : > { %4496 = vmatpush3.bf16.msra.mxu1 %v5603_v1  ;;  %v5656_v59 = vsel %vm1511_vm0, %v1530_v48, %v1534_v36  ;;  %v1553_v4 = vrot.slane %v1551_v58, 1  ;;  %v1563_v1 = vshll.u32 %v5645_v51, 16  ;;  %v442_v6 = vld [vmem:[#allocation2 + $0x90] sm:$0xff]  ;;  %v1558_v8 = vrot.slane %v1556_v60, 1  ;;  %v443_v11 = vld [vmem:[#allocation2 + $0x98] sm:$0xff]  ;;  %v5347_v60 = vld [vmem:[%s6377_s2 + $0xe8] sm:$0xff]  }
  0x34   : > { %4497 = vmatprep.subr.bf16.mxu1 %v5340_v39  ;;  %4653 = vmatprep.mubr.bf16.mxu0 %v5656_v59  ;;  %v1568_v9 = vshll.u32 %v5659_v61, 16  ;;  %v298_v18 = vadd.f32 %v5540_v15, %v262_v40  ;;  %v5675_v19 = vsel %vm1511_vm0, %v1542_v3, %v1546_v55  ;;  %v1573_v22 = vshrl.u32 %v5664_v5, 16  ;;  %v231_v58 = vld [vmem:[%s5527_s18 + $0x98] sm:$0xff]  ;;  %v232_v3 = vld [vmem:[%s5527_s18 + $0xa0] sm:$0xff] }
  0x35   : > { %v1554_v20 = vor.u32 %v1553_v4, %v1549_v56  ;;  %v1565_v21 = vrot.slane %v1563_v1, 1  ;;  %4654 = vmatmul.mubr.bf16.vlgmr.msra.gmra.mrb[0].mxu0 %v5675_v19  ;;  %v1575_v25 = vshll.u32 %v5664_v5, 16  ;;  %v1580_v26 = vshll.u32 %v5671_v10, 16  ;;  %v233_v4 = vld [vmem:[%s5527_s18 + $0xa8] sm:$0xff] }
  0x36   : > { %4466 = vmatmul.mubr.bf16.gmra.mrb[4].mxu1 %v5641_v45  ;;  %v1570_v23 = vrot.slane %v1568_v9, 1  ;;  %v5687_v28 = vpack.c.bf16 %v443_v11, %v442_v6  ;;  %4686 = vmatpush3.bf16.msra.mxu0 %v5593_v57  ;;  %v5700_v37 = vpack.c.bf16 %v444_v17, %v444_v17  ;;  %v330_v50 = vmax.f32 %v298_v18, 0.0 }
  0x37   : > { %4469 = vmatprep.mubr.bf16.mxu1 %v5645_v51  ;;  %4498 = vmatpush3.bf16.msra.mxu1 %v5340_v39  ;;  %v5698_v35 = vsel %vm1511_vm0, %v1554_v20, %v1558_v8  ;;  %v1566_v36 = vor.u32 %v1565_v21, %v1561_v62  ;;  %v299_v39 = vadd.f32 %v5540_v15, %v5635_v41  ;;  %v1577_v40 = vrot.slane %v1575_v25, 1  ;;  %v5723_v62 = vld [vmem:[%s6377_s2 + $0x1d8] sm:$0xff]   ;;  %v234_v20 = vld [vmem:[%s5527_s18 + $0xb0] sm:$0xff] }
  0x38   : > { %4499 = vmatprep.subr.bf16.mxu1 %v5650_v53  ;;  %4687 = vmatprep.subr.bf16.mxu0 %v5336_v7  ;;  %v1582_v42 = vrot.slane %v1580_v26, 1  ;;  %v1585_v43 = vshrl.u32 %v5687_v28, 16  ;;  %v1587_v57 = vshll.u32 %v5687_v28, 16  ;;  %v1592_v46 = vshll.u32 %v5700_v37, 16  ;;  %406 = vst [vmem:[#allocation2 + $0xc1] sm:$0xff] %v330_v50  ;;  %v235_v26 = vld [vmem:[%s5527_s18 + $0xb8] sm:$0xff] }
  0x39   : > { %4657 = vmatprep.mubr.bf16.mxu0 %v5698_v35  ;;  %v5708_v44 = vsel %vm1511_vm0, %v1566_v36, %v1570_v23  ;;  %v446_v47 = vld [vmem:[#allocation2 + $0xb0] sm:$0xff]  ;;  %v447_v48 = vld [vmem:[#allocation2 + $0xb8] sm:$0x3]  ;;  %v331_v52 = vmax.f32 %v299_v39, 0.0  ;;  %v1578_v41 = vor.u32 %v1577_v40, %v1573_v22  ;;  %v264_v63 = vmul.f32 %v5535_v14, %v228_v29  ;;  %v236_v29 = vld [vmem:[%s5527_s18 + $0xc0] sm:$0xff] }
  0x3a   : > { %v1589_v54 = vrot.slane %v1587_v57, 1  ;;  %v5712_v55 = vpack.c.bf16 %v446_v47, %v445_v38  ;;  %v5714_v56 = vpack.c.bf16 %v447_v48, %v447_v48  ;;  %4688 = vmatpush3.bf16.msra.mxu0 %v5336_v7  ;;  %v265_v0 = vmul.f32 %v5535_v14, %v229_v32  ;;  %v5349_v32 = vld [vmem:[%s6377_s2 + $0xf0] sm:$0xff]   ;;  %v237_v40 = vld [vmem:[%s5527_s18 + $0xc8] sm:$0xff] }
  0x3b   : > { %4500 = vmatpush3.bf16.msra.mxu1 %v5650_v53  ;;  %v1594_v53 = vrot.slane %v1592_v46, 1  ;;  %407 = vst [vmem:[#allocation2 + $0xc9] sm:$0xff] %v331_v52  ;;  %v266_v2 = vmul.f32 %v5535_v14, %v230_v34  ;;  %4689 = vmatprep.subr.bf16.mxu0 %v5683_v24  ;;  %v5732_v1 = vsel %vm1511_vm0, %v1578_v41, %v1582_v42  ;;  %v238_v46 = vld [vmem:[%s5527_s18 + $0xd0] sm:$0xff]  ;;  %v239_v41 = vld [vmem:[%s5527_s18 + $0xd8] sm:$0xff] }
  0x3c   : > { %4501 = vmatprep.subr.bf16.mxu1 %v5346_v33  ;;  %v1590_v6 = vor.u32 %v1589_v54, %v1585_v43  ;;  %v1597_v7 = vshrl.u32 %v5712_v55, 16  ;;  %v1599_v8 = vshll.u32 %v5712_v55, 16  ;;  %v1604_v9 = vshll.u32 %v5714_v56, 16  ;;  %v5351_v54 = vld [vmem:[%s6377_s2 + $0xf8] sm:$0xff]  }
  0x3d   : > { %v300_v11 = vadd.f32 %v5540_v15, %v264_v63  ;;  %v301_v17 = vadd.f32 %v5540_v15, %v265_v0  ;;  %v267_v18 = vmul.f32 %v5535_v14, %v231_v58  ;;  %4658 = vmatmul.mubr.bf16.gmra.mrb[4].mxu0 %v5708_v44  ;;  %v302_v23 = vadd.f32 %v5540_v15, %v266_v2  ;;  %v5775_v58 = vld [vmem:[%s6377_s2 + $0x1e8] sm:$0xff]  }
  0x3e   : > { %4470 = vmatmul.mubr.bf16.gmra.mrb[8].mxu1 %v5664_v5  ;;  %v5745_v21 = vsel %vm1511_vm0, %v1590_v6, %v1594_v53  ;;  %v1601_v22 = vrot.slane %v1599_v8, 1  ;;  %v268_v25 = vmul.f32 %v5535_v14, %v232_v3  ;;  %4690 = vmatpush3.bf16.msra.mxu0 %v5683_v24  ;;  %v1606_v34 = vrot.slane %v1604_v9, 1  ;;  %v240_v6 = vld [vmem:[%s5527_s18 + $0xe0] sm:$0xff] }
  0x3f   : > { %4473 = vmatprep.mubr.bf16.mxu1 %v5687_v28  ;;  %4502 = vmatpush3.bf16.msra.mxu1 %v5346_v33  ;;  %v5341_v33 = vld [vmem:[%s6377_s2 + $0x1e0] sm:$0xff]   ;;  %v332_v36 = vmax.f32 %v300_v11, 0.0  ;;  %v333_v38 = vmax.f32 %v301_v17, 0.0  ;;  %v303_v39 = vadd.f32 %v5540_v15, %v267_v18  ;;  %v334_v43 = vmax.f32 %v302_v23, 0.0 }
  0x40   : > { %4503 = vmatprep.subr.bf16.mxu1 %v5347_v60  ;;  %4661 = vmatprep.mubr.bf16.mxu0 %v5732_v1  ;;  %v1602_v42 = vor.u32 %v1601_v22, %v1597_v7  ;;  %v269_v24 = vmul.f32 %v5535_v14, %v233_v4  ;;  %v304_v57 = vadd.f32 %v5540_v15, %v268_v25  ;;  %v241_v22 = vld [vmem:[%s5527_s18 + $0xe8] sm:$0xff] }
  0x41   : > { %4691 = vmatprep.subr.bf16.mxu0 %v5723_v62  ;;  %408 = vst [vmem:[#allocation2 + $0xd9] sm:$0xff] %v332_v36  ;;  %409 = vst [vmem:[#allocation2 + $0xe1] sm:$0xff] %v333_v38  ;;  %v335_v47 = vmax.f32 %v303_v39, 0.0  ;;  %v270_v48 = vmul.f32 %v5535_v14, %v234_v20  ;;  %v271_v50 = vmul.f32 %v5535_v14, %v235_v26 }
  0x42   : > { %v272_v52 = vmul.f32 %v5535_v14, %v236_v29  ;;  %v5778_v53 = vsel %vm1511_vm0, %v1602_v42, %v1606_v34  ;;  %v449_v63 = vld [vmem:[#allocation2 + $0xc8] sm:$0xff]  ;;  %v450_v0 = vld [vmem:[#allocation2 + $0xd0] sm:$0x3]  ;;  %410 = vst [vmem:[#allocation2 + $0xf1] sm:$0xff] %v334_v43  ;;  %v305_v2 = vadd.f32 %v5540_v15, %v269_v24  ;;  %v336_v3 = vmax.f32 %v304_v57, 0.0  ;;  %4692 = vmatpush3.bf16.msra.mxu0 %v5723_v62 }
  0x43   : > { %4504 = vmatpush3.bf16.msra.mxu1 %v5347_v60  ;;  %v448_v60 = vld [vmem:[#allocation2 + $0xc0] sm:$0xff]  ;;  %v273_v4 = vmul.f32 %v5535_v14, %v237_v40  ;;  %v5786_v8 = vpack.c.bf16 %v450_v0, %v450_v0  ;;  %411 = vst [vmem:[#allocation2 + $0xf9] sm:$0xff] %v335_v47  ;;  %v306_v9 = vadd.f32 %v5540_v15, %v270_v48  ;;  %v5344_v57 = vld [vmem:[%s6377_s2 + $0x1f0] sm:$0xff]  }
  0x44   : > { %4505 = vmatprep.subr.bf16.mxu1 %v5349_v32  ;;  %v5784_v7 = vpack.c.bf16 %v449_v63, %v448_v60  ;;  %v307_v11 = vadd.f32 %v5540_v15, %v271_v50  ;;  %4693 = vmatprep.subr.bf16.mxu0 %v5341_v33  ;;  %v337_v17 = vmax.f32 %v305_v2, 0.0  ;;  %412 = vst [vmem:[#allocation2 + $0x109] sm:$0xff] %v336_v3  ;;  %v5804_v40 = vld [vmem:[%s6377_s2 + $0x180] sm:$0xff]   ;;  %v2748_v50 = vrot.slane %v5610_v12, 1 }
  0x45   : > { %v308_v18 = vadd.f32 %v5540_v15, %v272_v52  ;;  %v309_v20 = vadd.f32 %v5540_v15, %v273_v4  ;;  %v274_v62 = vmul.f32 %v5535_v14, %v238_v46  ;;  %v1616_v26 = vshll.u32 %v5786_v8, 16  ;;  %4662 = vmatmul.mubr.bf16.gmra.mrb[8].mxu0 %v5745_v21 }
  0x46   : > { %4474 = vmatmul.mubr.bf16.gmra.mrb[12].mxu1 %v5712_v55  ;;  %v1609_v23 = vshrl.u32 %v5784_v7, 16  ;;  %v1611_v25 = vshll.u32 %v5784_v7, 16  ;;  %v338_v29 = vmax.f32 %v306_v9, 0.0  ;;  %413 = vst [vmem:[#allocation2 + $0x111] sm:$0xff] %v337_v17  ;;  %v339_v34 = vmax.f32 %v307_v11, 0.0  ;;  %4694 = vmatpush3.bf16.msra.mxu0 %v5341_v33  ;;  %v5345_v17 = vld [vmem:[%s6377_s2 + $0x1f8] sm:$0xff]  }
  0x47   : > { %4477 = vmatprep.mubr.bf16.mxu1 %v5784_v7  ;;  %4506 = vmatpush3.bf16.msra.mxu1 %v5349_v32  ;;  %v340_v36 = vmax.f32 %v308_v18, 0.0  ;;  %v341_v38 = vmax.f32 %v309_v20, 0.0  ;;  %v275_v39 = vmul.f32 %v5535_v14, %v239_v41  ;;  %v1618_v43 = vrot.slane %v1616_v26, 1  ;;  %v242_v20 = vld [vmem:[%s5527_s18 + $0xf0] sm:$0xff] }
  0x48   : > { %4507 = vmatprep.subr.bf16.mxu1 %v5351_v54  ;;  %4665 = vmatprep.mubr.bf16.mxu0 %v5778_v53  ;;  %v1613_v42 = vrot.slane %v1611_v25, 1  ;;  %414 = vst [vmem:[#allocation2 + $0x121] sm:$0xff] %v338_v29  ;;  %v310_v32 = vadd.f32 %v5540_v15, %v274_v62  ;;  %v276_v24 = vmul.f32 %v5535_v14, %v240_v6  ;;  %v451_v46 = vld [vmem:[#allocation2 + $0xd8] sm:$0xff]  ;;  %v452_v47 = vld [vmem:[#allocation2 + $0xe0] sm:$0xff]  ;;  %415 = vst [vmem:[#allocation2 + $0x129] sm:$0xff] %v339_v34 }
  0x49   : > { %4695 = vmatprep.subr.bf16.mxu0 %v5775_v58  ;;  %416 = vst [vmem:[#allocation2 + $0x139] sm:$0xff] %v340_v36  ;;  %417 = vst [vmem:[#allocation2 + $0x141] sm:$0xff] %v341_v38  ;;  %v311_v33 = vadd.f32 %v5540_v15, %v275_v39  ;;  %v277_v48 = vmul.f32 %v5535_v14, %v241_v22  ;;  %v5816_v41 = vpack.c.bf16 %v452_v47, %v451_v46  ;;  %v454_v60 = vld [vmem:[#allocation2 + $0xf0] sm:$0xff]  ;;  %v243_v22 = vld [vmem:[%s5527_s18 + $0xf8] sm:$0xff]  ;;  %s6299_s18 = scalar_lea.vmem %s6378_s3, %s4227_s7  ;;  %s4022_s7 = sshll.u32 %s6397_s16, 1 }
  0x4a   : > { %v1614_v52 = vor.u32 %v1613_v42, %v1609_v23  ;;  %v342_v63 = vmax.f32 %v310_v32, 0.0  ;;  %v312_v0 = vadd.f32 %v5540_v15, %v276_v24  ;;  %v455_v2 = vld [vmem:[#allocation2 + $0xf8] sm:$0xff]  ;;  %v5824_v6 = vsel %vm2744_vm1, %v2748_v50, %v2749_v27  ;;  %4696 = vmatpush3.bf16.msra.mxu0 %v5775_v58  ;;  %v5348_v25 = vld [vmem:[%s6377_s2 + $0x80] sm:$0xff]   ;;  %v5350_v36 = vld [vmem:[%s6377_s2 + $0x88] sm:$0xff]   ;;  %s208_s29 = scalar_lea.vmem %s6379_s4, %s4022_s7 }
  0x4b   : > { %4508 = vmatpush3.bf16.msra.mxu1 %v5351_v54  ;;  %v343_v3 = vmax.f32 %v311_v33, 0.0  ;;  %v313_v4 = vadd.f32 %v5540_v15, %v277_v48  ;;  %v5830_v11 = vpack.c.bf16 %v455_v2, %v454_v60  ;;  %4697 = vmatprep.subr.bf16.mxu0 %v5344_v57  ;;  %v457_v27 = vld [vmem:[#allocation2 + $0x108] sm:$0xff]  ;;  %v278_v29 = vmul.f32 %v5535_v14, %v242_v20  ;;  %v5354_v33 = vld [vmem:[%s6377_s2 + $0x98] sm:$0xff]  }
  0x4c   : > { %4541 = vmatprep.subr.bf16.mxu1 %v5804_v40  ;;  %v5828_v9 = vsel %vm1511_vm0, %v1614_v52, %v1618_v43  ;;  %418 = vst [vmem:[#allocation2 + $0x151] sm:$0xff] %v342_v63  ;;  %v344_v54 = vmax.f32 %v312_v0, 0.0  ;;  %v279_v34 = vmul.f32 %v5535_v14, %v243_v22  ;;  %v456_v52 = vld [vmem:[#allocation2 + $0x100] sm:$0x3]  ;;  %v1623_v0 = vshll.u32 %v5816_v41, 16  ;;  %v5358_v20 = vld [vmem:[%s6377_s2 + $0xa8] sm:$0xff]  }
  0x4d   : > { %419 = vst [vmem:[#allocation2 + $0x159] sm:$0xff] %v343_v3  ;;  %v345_v13 = vmax.f32 %v313_v4, 0.0  ;;  %v458_v58 = vld [vmem:[#allocation2 + $0x110] sm:$0xff]  ;;  %4666 = vmatmul.mubr.bf16.gmra.mrb[12].mxu0 %v5828_v9  ;;  %v314_v43 = vadd.f32 %v5540_v15, %v278_v29  ;;  %v5876_v2 = vpack.c.bf16 %v456_v52, %v456_v52  ;;  %v1635_v4 = vshll.u32 %v5830_v11, 16 }
  0x4e   : > { %4478 = vmatmul.mubr.bf16.gmra.mrb[16].mxu1 %v5816_v41  ;;  %420 = vst [vmem:[#allocation2 + $0x169] sm:$0xff] %v344_v54  ;;  %4698 = vmatpush3.bf16.msra.mxu0 %v5344_v57  ;;  %v5841_v23 = vpack.c.bf16 %v458_v58, %v457_v27  ;;  %v315_v14 = vadd.f32 %v5540_v15, %v279_v34  ;;  %v5352_v57 = vld [vmem:[%s6377_s2 + $0x90] sm:$0xff]   ;;  %v453_v15 = vld [vmem:[#allocation2 + $0xe8] sm:$0x3]  ;;  %v5356_v54 = vld [vmem:[%s6377_s2 + $0xa0] sm:$0xff]   ;;  %v1625_v27 = vrot.slane %v1623_v0, 1 }
  0x4f   : > { %4481 = vmatprep.mubr.bf16.mxu1 %v5830_v11  ;;  %v460_v18 = vld [vmem:[#allocation2 + $0x120] sm:$0xff]  ;;  %421 = vst [vmem:[#allocation2 + $0x171] sm:$0xff] %v345_v13  ;;  %4701 = vmatprep.mubr.bf16.mxu0 %v5675_v19  ;;  %v461_v62 = vld [vmem:[#allocation2 + $0x128] sm:$0xff]  ;;  %v346_v47 = vmax.f32 %v314_v43, 0.0  ;;  %v5873_v63 = vpack.c.bf16 %v453_v15, %v453_v15  ;;  %v1621_v13 = vshrl.u32 %v5816_v41, 16  ;;  %v1637_v22 = vrot.slane %v1635_v4, 1 }
  0x50   : > { %4699 = vmatprep.subr.bf16.mxu0 %v5345_v17  ;;  %v5846_v26 = vpack.c.bf16 %v461_v62, %v460_v18  ;;  %v463_v38 = vld [vmem:[#allocation2 + $0x138] sm:$0xff]  ;;  %v464_v39 = vld [vmem:[#allocation2 + $0x140] sm:$0xff]  ;;  %v347_v48 = vmax.f32 %v315_v14, 0.0  ;;  %v1640_v18 = vshll.u32 %v5876_v2, 16  ;;  %v1633_v62 = vshrl.u32 %v5830_v11, 16 }
  0x51   : > { %v5859_v24 = vpack.c.bf16 %v464_v39, %v463_v38  ;;  %422 = vst [vmem:[#allocation2 + $0x181] sm:$0xff] %v346_v47  ;;  %v1628_v58 = vshll.u32 %v5873_v63, 16  ;;  %v462_v29 = vld [vmem:[#allocation2 + $0x130] sm:$0x3]  ;;  %v1647_v34 = vshll.u32 %v5841_v23, 16  ;;  %v1645_v47 = vshrl.u32 %v5841_v23, 16 }
  0x52   : > { %4700 = vmatpush3.bf16.msra.mxu0 %v5345_v17  ;;  %423 = vst [vmem:[#allocation2 + $0x189] sm:$0xff] %v347_v48  ;;  %v459_v17 = vld [vmem:[#allocation2 + $0x118] sm:$0x3]  ;;  %v1642_v39 = vrot.slane %v1640_v18, 1  ;;  %v5898_v43 = vpack.c.bf16 %v462_v29, %v462_v29  ;;  %v465_v14 = vld [vmem:[#allocation2 + $0x148] sm:$0x3] }
  0x53   : > { %4733 = vmatprep.subr.bf16.mxu0 %v5348_v25  ;;  %v466_v42 = vld [vmem:[#allocation2 + $0x150] sm:$0xff]  ;;  %v1630_v38 = vrot.slane %v1628_v58, 1  ;;  %v1649_v48 = vrot.slane %v1647_v34, 1  ;;  %v1657_v15 = vshrl.u32 %v5846_v26, 16  ;;  %v1669_v58 = vshrl.u32 %v5859_v24, 16 }
  0x54   : > { %v467_v32 = vld [vmem:[#allocation2 + $0x158] sm:$0xff]  ;;  %v1671_v18 = vshll.u32 %v5859_v24, 16 }
  0x55   : > { %4702 = vmatmul.mubr.bf16.vlgmr.msra.gmra.mrb[0].mxu0 %v5698_v35  ;;  %v5864_v46 = vpack.c.bf16 %v467_v32, %v466_v42  ;;  %v469_v50 = vld [vmem:[#allocation2 + $0x168] sm:$0xff]  ;;  %v1638_v42 = vor.u32 %v1637_v22, %v1633_v62  ;;  %v1659_v32 = vshll.u32 %v5846_v26, 16  ;;  %v5938_v22 = vld [vmem:[%s6377_s2 + $0x140] sm:$0xff]  }
  0x56   : > { %4482 = vmatmul.mubr.bf16.gmra.mrb[20].mxu1 %v5841_v23  ;;  %4705 = vmatprep.mubr.bf16.mxu0 %v5708_v44  ;;  %v470_v60 = vld [vmem:[#allocation2 + $0x170] sm:$0xff] }
  0x57   : > { %4485 = vmatprep.mubr.bf16.mxu1 %v5846_v26  ;;  %4734 = vmatpush3.bf16.msra.mxu0 %v5348_v25  ;;  %v5878_v3 = vpack.c.bf16 %v470_v60, %v469_v50  ;;  %v5893_v25 = vpack.c.bf16 %v459_v17, %v459_v17  ;;  %v5361_v50 = vld [vmem:[%s6377_s2 + $0xb8] sm:$0xff]   ;;  %v468_v60 = vld [vmem:[#allocation2 + $0x160] sm:$0x3]  ;;  %v5917_v0 = vsel %vm1511_vm0, %v1638_v42, %v1642_v39  ;;  %v1661_v4 = vrot.slane %v1659_v32, 1 }
  0x58   : > { %4735 = vmatprep.subr.bf16.mxu0 %v5350_v36  ;;  %v5932_v62 = vpack.c.bf16 %v468_v60, %v468_v60  ;;  %v1673_v32 = vrot.slane %v1671_v18, 1 }
  0x59   : > { %v1662_v29 = vor.u32 %v1661_v4, %v1657_v15  ;;  %v473_v42 = vld [vmem:[#allocation2 + $0x188] sm:$0xff]  ;;  %v474_v60 = vld [vmem:[#allocation2 + $0x190] sm:$0x3]  ;;  %v5362_v4 = vld [vmem:[%s6377_s2 + $0x1a0] sm:$0xff]  }
  0x5a   : > { %v1674_v18 = vor.u32 %v1673_v32, %v1669_v58 }
  0x5b   : > { %4736 = vmatpush3.bf16.msra.mxu0 %v5350_v36  ;;  %v1626_v36 = vor.u32 %v1625_v27, %v1621_v13  ;;  %v5923_v13 = vpack.c.bf16 %v465_v14, %v465_v14  ;;  %v5357_v27 = vld [vmem:[%s6377_s2 + $0x190] sm:$0xff]   ;;  %v1681_v14 = vshrl.u32 %v5864_v46, 16 }
  0x5c   : > { %4737 = vmatprep.subr.bf16.mxu0 %v5352_v57 }
  0x5d   : > { %4706 = vmatmul.mubr.bf16.gmra.mrb[4].mxu0 %v5732_v1  ;;  %v5914_v52 = vsel %vm1511_vm0, %v1626_v36, %v1630_v38  ;;  %v472_v36 = vld [vmem:[#allocation2 + $0x180] sm:$0xff]  ;;  %v5359_v38 = vld [vmem:[%s6377_s2 + $0x198] sm:$0xff]   ;;  %v1676_v39 = vshll.u32 %v5923_v13, 16 }
  0x5e   : > { %4486 = vmatmul.mubr.bf16.gmra.mrb[24].mxu1 %v5859_v24  ;;  %4709 = vmatprep.mubr.bf16.mxu0 %v5745_v21 }
  0x5f   : > { %4489 = vmatprep.mubr.bf16.mxu1 %v5864_v46  ;;  %4738 = vmatpush3.bf16.msra.mxu0 %v5352_v57  ;;  %v5360_v57 = vld [vmem:[%s6377_s2 + $0xb0] sm:$0xff]  }
  0x60   : > { %4739 = vmatprep.subr.bf16.mxu0 %v5354_v33 }
  0x63   : > { %4740 = vmatpush3.bf16.msra.mxu0 %v5354_v33  ;;  %v1652_v33 = vshll.u32 %v5893_v25, 16 }
  0x64   : > { %4741 = vmatprep.subr.bf16.mxu0 %v5356_v54 }
  0x65   : > { %4710 = vmatmul.mubr.bf16.gmra.mrb[8].mxu0 %v5778_v53  ;;  %v1654_v17 = vrot.slane %v1652_v33, 1 }
  0x66   : > { %4490 = vmatmul.mubr.bf16.gmra.mrb[28].mxu1 %v5878_v3  ;;  %4713 = vmatprep.mubr.bf16.mxu0 %v5828_v9 }
  0x67   : > { %4509 = vmatprep.mubr.bf16.mxu1 %v5610_v12  ;;  %4742 = vmatpush3.bf16.msra.mxu0 %v5356_v54  ;;  %v5355_v12 = vld [vmem:[%s6377_s2 + $0x188] sm:$0xff]   ;;  %v1664_v54 = vshll.u32 %v5898_v43, 16 }
  0x68   : > { %4743 = vmatprep.subr.bf16.mxu0 %v5358_v20 }
  0x69   : > { %v1666_v34 = vrot.slane %v1664_v54, 1  ;;  %v1695_v54 = vshll.u32 %v5878_v3, 16 }
  0x6b   : > { %4744 = vmatpush3.bf16.msra.mxu0 %v5358_v20  ;;  %v1650_v20 = vor.u32 %v1649_v48, %v1645_v47  ;;  %v1688_v48 = vshll.u32 %v5932_v62, 16  ;;  %v5950_v15 = vsel %vm1511_vm0, %v1662_v29, %v1666_v34  ;;  %v5965_v34 = vpack.c.bf16 %v474_v60, %v474_v60 }
  0x6c   : > { %4745 = vmatprep.subr.bf16.mxu0 %v5360_v57  ;;  %6388 = vst [vmem:[#allocation3_spill] sm:$0xff] %v5950_v15  ;;  %v1697_v58 = vrot.slane %v1695_v54, 1  ;;  %v5365_v54 = vld [vmem:[%s6377_s2 + $0x1b0] sm:$0xff]  }
  0x6d   : > { %4714 = vmatmul.mubr.bf16.gmra.mrb[12].mxu0 %v5914_v52  ;;  %v5946_v47 = vsel %vm1511_vm0, %v1650_v20, %v1654_v17  ;;  %v475_v17 = vld [vmem:[#allocation2 + $0x198] sm:$0xff]  ;;  %v1690_v29 = vrot.slane %v1688_v48, 1  ;;  %v2050_v60 = vshll.u32 %v5965_v34, 16 }
  0x6e   : > { %4510 = vmatmul.mubr.bf16.vlgmr.msra.gmra.mrb[0].mxu1 %v5624_v30  ;;  %4717 = vmatprep.mubr.bf16.mxu0 %v5917_v0 }
  0x6f   : > { %4542 = vmatpush3.bf16.msra.mxu1 %v5804_v40  ;;  %4513 = vmatprep.mubr.bf16.mxu1 %v5641_v45  ;;  %v1683_v40 = vshll.u32 %v5864_v46, 16 }
  0x70   : > { %4543 = vmatprep.subr.bf16.mxu1 %v5355_v12  ;;  %4746 = vmatpush3.bf16.msra.mxu0 %v5360_v57  ;;  %v471_v57 = vld [vmem:[#allocation2 + $0x178] sm:$0x3] }
  0x71   : > { %4747 = vmatprep.subr.bf16.mxu0 %v5361_v50  ;;  %v1685_v33 = vrot.slane %v1683_v40, 1  ;;  %v5963_v20 = vpack.c.bf16 %v471_v57, %v471_v57 }
  0x73   : > { %4544 = vmatpush3.bf16.msra.mxu1 %v5355_v12  ;;  %v5953_v12 = vpack.c.bf16 %v473_v42, %v472_v36  ;;  %v1686_v40 = vor.u32 %v1685_v33, %v1681_v14  ;;  %v1700_v32 = vshll.u32 %v5963_v20, 16  ;;  %v5976_v14 = vld [vmem:[#allocation2 + $0x8] sm:$0xff] }
  0x74   : > { %4545 = vmatprep.subr.bf16.mxu1 %v5357_v27  ;;  %4748 = vmatpush3.bf16.msra.mxu0 %v5361_v50  ;;  %v1678_v50 = vrot.slane %v1676_v39, 1  ;;  %v5363_v39 = vld [vmem:[%s6377_s2 + $0x1a8] sm:$0xff]   ;;  %6390 = vst [vmem:[#allocation5_spill] sm:$0xff] %v5976_v14  ;;  %v5979_v57 = vpack.c.bf16 %v5976_v14, %v475_v17  ;;  %v2052_v14 = vrot.slane %v2050_v60, 1  ;;  %v2745_v60 = vrot.slane %v5543_v16, 1 }
  0x75   : > { %4781 = vmatprep.subr.bf16.mxu0 %v5938_v22  ;;  %4718 = vmatmul.mubr.bf16.gmra.mrb[16].mxu0 %v5946_v47  ;;  %v2045_v36 = vshll.u32 %v5953_v12, 16  ;;  %v2043_v33 = vshrl.u32 %v5953_v12, 16 }
  0x76   : > { %4514 = vmatmul.mubr.bf16.gmra.mrb[4].mxu1 %v5645_v51  ;;  %4721 = vmatprep.mubr.bf16.mxu0 %v5950_v15  ;;  %v5973_v42 = vsel %vm1511_vm0, %v1674_v18, %v1678_v50  ;;  %v477_v50 = vld [vmem:[#allocation2 + $0x1a8] sm:$0x3]  ;;  %v1702_v18 = vrot.slane %v1700_v32, 1  ;;  %v426_v15 = vld [vmem:[#allocation2 + $0x10] sm:$0x3] }
  0x77   : > { %4517 = vmatprep.mubr.bf16.mxu1 %v5664_v5  ;;  %4546 = vmatpush3.bf16.msra.mxu1 %v5357_v27  ;;  %v1693_v27 = vshrl.u32 %v5878_v3, 16  ;;  %6389 = vst [vmem:[#allocation4_spill] sm:$0xff] %v5973_v42  ;;  %v2047_v48 = vrot.slane %v2045_v36, 1 }
  0x78   : > { %4547 = vmatprep.subr.bf16.mxu1 %v5359_v38 }
  0x79   : > { %v1698_v17 = vor.u32 %v1697_v58, %v1693_v27  ;;  %v2048_v36 = vor.u32 %v2047_v48, %v2043_v33  ;;  %v6008_v33 = vpack.c.bf16 %v426_v15, %v426_v15 }
  0x7b   : > { %4548 = vmatpush3.bf16.msra.mxu1 %v5359_v38  ;;  %v5982_v38 = vsel %vm1511_vm0, %v1686_v40, %v1690_v29  ;;  %v5993_v40 = vpack.c.bf16 %v477_v50, %v477_v50  ;;  %v2380_v29 = vshll.u32 %v5979_v57, 16  ;;  %v6005_v32 = vsel %vm1511_vm0, %v2048_v36, %v2052_v14 }
  0x7c   : > { %4549 = vmatprep.subr.bf16.mxu1 %v5362_v4  ;;  %6391 = vst [vmem:[#allocation6_spill] sm:$0xff] %v5982_v38  ;;  %v2746_v15 = vrot.slane %v6008_v33, 1  ;;  %v2754_v36 = vrot.slane %v5641_v45, 1 }
  0x7d   : > { %4722 = vmatmul.mubr.bf16.gmra.mrb[20].mxu0 %v5973_v42  ;;  %v6000_v42 = vsel %vm1511_vm0, %v1698_v17, %v1702_v18  ;;  %v2382_v27 = vrot.slane %v2380_v29, 1  ;;  %v2385_v58 = vshll.u32 %v5993_v40, 16  ;;  %v2752_v17 = vrot.slane %v5626_v31, 1  ;;  %v5366_v29 = vld [vmem:[%s6377_s2 + $0x148] sm:$0xff]  }
  0x7e   : > { %4518 = vmatmul.mubr.bf16.gmra.mrb[8].mxu1 %v5687_v28  ;;  %4725 = vmatprep.mubr.bf16.mxu0 %v5982_v38  ;;  %v2378_v38 = vshrl.u32 %v5979_v57, 16  ;;  %v2757_v31 = vrot.slane %v5645_v51, 1 }
  0x7f   : > { %4521 = vmatprep.mubr.bf16.mxu1 %v5712_v55  ;;  %4550 = vmatpush3.bf16.msra.mxu1 %v5362_v4  ;;  %v5367_v4 = vld [vmem:[%s6377_s2 + $0x1b8] sm:$0xff]   ;;  %v2387_v14 = vrot.slane %v2385_v58, 1  ;;  %v5368_v58 = vld [vmem:[%s6377_s2 + $0x150] sm:$0xff]  }
  0x80   : > { %4551 = vmatprep.subr.bf16.mxu1 %v5363_v39  ;;  %v2383_v48 = vor.u32 %v2382_v27, %v2378_v38  ;;  %v2751_v38 = vrot.slane %v5624_v30, 1  ;;  %v2758_v27 = vrot.slane %v5659_v61, 1  ;;  %v2760_v61 = vrot.slane %v5664_v5, 1 }
  0x82   : > { %v2388_v50 = vsel %vm1511_vm0, %v2383_v48, %v2387_v14  ;;  %v6028_v18 = vsel %vm2744_vm1, %v2751_v38, %v2752_v17  ;;  %v6049_v14 = vsel %vm2744_vm1, %v2757_v31, %v2758_v27  ;;  %v2767_v17 = vrot.slane %v5714_v56, 1  ;;  %v5373_v27 = vld [vmem:[%s6377_s2 + $0x50] sm:$0xff]  }
  0x83   : > { %4552 = vmatpush3.bf16.msra.mxu1 %v5363_v39  ;;  %v6015_v39 = vld [vmem:[%s6377_s2 + $0x40] sm:$0xff]  }
  0x84   : > { %4553 = vmatprep.subr.bf16.mxu1 %v5365_v54 }
  0x85   : > { %4726 = vmatmul.mubr.bf16.gmra.mrb[24].mxu0 %v6000_v42 }
  0x86   : > { %4522 = vmatmul.mubr.bf16.gmra.mrb[12].mxu1 %v5784_v7  ;;  %4729 = vmatprep.mubr.bf16.mxu0 %v6005_v32 }
  0x87   : > { %4525 = vmatprep.mubr.bf16.mxu1 %v5816_v41  ;;  %4554 = vmatpush3.bf16.msra.mxu1 %v5365_v54  ;;  %v2747_v54 = vsel %vm2744_vm1, %v2745_v60, %v2746_v15  ;;  %v2763_v60 = vrot.slane %v5687_v28, 1  ;;  %v2764_v15 = vrot.slane %v5700_v37, 1  ;;  %v2766_v37 = vrot.slane %v5712_v55, 1 }
  0x88   : > { %4555 = vmatprep.subr.bf16.mxu1 %v5367_v4 }
  0x89   : > { %v6069_v38 = vsel %vm2744_vm1, %v2763_v60, %v2764_v15  ;;  %v6089_v31 = vsel %vm2744_vm1, %v2766_v37, %v2767_v17  ;;  %v2778_v60 = vrot.slane %v5841_v23, 1  ;;  %v2779_v15 = vrot.slane %v5893_v25, 1  ;;  %v5381_v25 = vld [vmem:[%s6377_s2 + $0x70] sm:$0xff]  }
  0x8a   : > { %v2785_v17 = vrot.slane %v5923_v13, 1  ;;  %v2790_v13 = vrot.slane %v5878_v3, 1 }
  0x8b   : > { %4556 = vmatpush3.bf16.msra.mxu1 %v5367_v4  ;;  %v2755_v4 = vrot.slane %v5643_v49, 1  ;;  %v5370_v49 = vld [vmem:[%s6377_s2 + $0x158] sm:$0xff]  }
  0x8c   : > { %4589 = vmatprep.subr.bf16.mxu1 %v6015_v39 }
  0x8d   : > { %4730 = vmatmul.mubr.bf16.gmra.mrb[28].mxu0 %v2388_v50  ;;  %v6046_v48 = vsel %vm2744_vm1, %v2754_v36, %v2755_v4  ;;  %v5372_v50 = vld [vmem:[%s6377_s2 + $0x160] sm:$0xff]   ;;  %v2770_v36 = vrot.slane %v5786_v8, 1  ;;  %v5376_v4 = vld [vmem:[%s6377_s2 + $0x170] sm:$0xff]   ;;  %v5377_v8 = vld [vmem:[%s6377_s2 + $0x178] sm:$0xff]  }
  0x8e   : > { %4526 = vmatmul.mubr.bf16.gmra.mrb[16].mxu1 %v5830_v11  ;;  %4749 = vmatprep.mubr.bf16.mxu0 %v2747_v54 }
  0x8f   : > { %4529 = vmatprep.mubr.bf16.mxu1 %v5841_v23 }
  0x95   : > { %4750 = vmatmul.mubr.bf16.vlgmr.msra.gmra.mrb[0].mxu0 %v5824_v6 }
  0x96   : > { %4530 = vmatmul.mubr.bf16.gmra.mrb[20].mxu1 %v5846_v26  ;;  %4753 = vmatprep.mubr.bf16.mxu0 %v6028_v18 }
  0x97   : > { %4533 = vmatprep.mubr.bf16.mxu1 %v5859_v24  ;;  %4782 = vmatpush3.bf16.msra.mxu0 %v5938_v22  ;;  %v2761_v22 = vrot.slane %v5671_v10, 1  ;;  %v5374_v10 = vld [vmem:[%s6377_s2 + $0x168] sm:$0xff]  }
  0x98   : > { %4783 = vmatprep.subr.bf16.mxu0 %v5366_v29 }
  0x99   : > { %v6066_v54 = vsel %vm2744_vm1, %v2760_v61, %v2761_v22  ;;  %v5375_v61 = vld [vmem:[%s6377_s2 + $0x58] sm:$0xff]  }
  0x9b   : > { %4784 = vmatpush3.bf16.msra.mxu0 %v5366_v29  ;;  %v2769_v29 = vrot.slane %v5784_v7, 1 }
  0x9c   : > { %4785 = vmatprep.subr.bf16.mxu0 %v5368_v58 }
  0x9d   : > { %4754 = vmatmul.mubr.bf16.gmra.mrb[4].mxu0 %v6046_v48  ;;  %v6092_v56 = vsel %vm2744_vm1, %v2769_v29, %v2770_v36  ;;  %v2787_v29 = vrot.slane %v5864_v46, 1 }
  0x9e   : > { %4534 = vmatmul.mubr.bf16.gmra.mrb[24].mxu1 %v5864_v46  ;;  %4757 = vmatprep.mubr.bf16.mxu0 %v6049_v14 }
  0x9f   : > { %4537 = vmatprep.mubr.bf16.mxu1 %v5878_v3  ;;  %4786 = vmatpush3.bf16.msra.mxu0 %v5368_v58  ;;  %v2773_v58 = vrot.slane %v5873_v63, 1 }
  0xa0   : > { %4787 = vmatprep.subr.bf16.mxu0 %v5370_v49 }
  0xa3   : > { %4788 = vmatpush3.bf16.msra.mxu0 %v5370_v49  ;;  %v2775_v49 = vrot.slane %v5830_v11, 1 }
  0xa4   : > { %4789 = vmatprep.subr.bf16.mxu0 %v5372_v50 }
  0xa5   : > { %4758 = vmatmul.mubr.bf16.gmra.mrb[8].mxu0 %v6066_v54 }
  0xa6   : > { %4538 = vmatmul.mubr.bf16.gmra.mrb[28].mxu1 %v5953_v12  ;;  %4761 = vmatprep.mubr.bf16.mxu0 %v6069_v38 }
  0xa7   : > { %4557 = vmatprep.mubr.bf16.mxu1 %v5624_v30  ;;  %4790 = vmatpush3.bf16.msra.mxu0 %v5372_v50  ;;  %v5371_v30 = vld [vmem:[%s6377_s2 + $0x48] sm:$0xff]   ;;  %v2781_v50 = vrot.slane %v5846_v26, 1 }
  0xa8   : > { %4791 = vmatprep.subr.bf16.mxu0 %v5374_v10 }
  0xab   : > { %4792 = vmatpush3.bf16.msra.mxu0 %v5374_v10  ;;  %v6136_v10 = vsel %vm2744_vm1, %v2778_v60, %v2779_v15  ;;  %v6395_v15 = vld [vmem:[#allocation5_spill] sm:$0xff] }
  0xac   : > { %4793 = vmatprep.subr.bf16.mxu0 %v5376_v4 }
  0xad   : > { %4762 = vmatmul.mubr.bf16.gmra.mrb[12].mxu0 %v6089_v31 }
  0xae   : > { %4558 = vmatmul.mubr.bf16.vlgmr.msra.gmra.mrb[0].mxu1 %v5641_v45  ;;  %4765 = vmatprep.mubr.bf16.mxu0 %v6092_v56  ;;  %v2772_v45 = vrot.slane %v5816_v41, 1 }
  0xaf   : > { %4590 = vmatpush3.bf16.msra.mxu1 %v6015_v39  ;;  %4561 = vmatprep.mubr.bf16.mxu1 %v5645_v51  ;;  %v2776_v39 = vrot.slane %v5876_v2, 1  ;;  %v5380_v51 = vld [vmem:[%s6377_s2 + $0x200] sm:$0xff]  }
  0xb0   : > { %4591 = vmatprep.subr.bf16.mxu1 %v5371_v30  ;;  %4794 = vmatpush3.bf16.msra.mxu0 %v5376_v4  ;;  %v6116_v22 = vsel %vm2744_vm1, %v2772_v45, %v2773_v58  ;;  %v5378_v2 = vld [vmem:[%s6377_s2 + $0x60] sm:$0xff]   ;;  %v5388_v45 = vld [vmem:[%s6377_s2 + $0x230] sm:$0xff]   ;;  %v5389_v58 = vld [vmem:[%s6377_s2 + $0x238] sm:$0xff]  }
  0xb1   : > { %4795 = vmatprep.subr.bf16.mxu0 %v5377_v8  ;;  %v6119_v63 = vsel %vm2744_vm1, %v2775_v49, %v2776_v39  ;;  %v5392_v49 = vld [vmem:[%s6377_s2 + $0x108] sm:$0xff]   ;;  %v5395_v39 = vld [vmem:[%s6377_s2 + $0x120] sm:$0xff]  }
  0xb3   : > { %4592 = vmatpush3.bf16.msra.mxu1 %v5371_v30  ;;  %v5391_v30 = vld [vmem:[%s6377_s2 + $0x100] sm:$0xff]  }
  0xb4   : > { %4593 = vmatprep.subr.bf16.mxu1 %v5373_v27  ;;  %4796 = vmatpush3.bf16.msra.mxu0 %v5377_v8 }
  0xb5   : > { %4829 = vmatprep.subr.bf16.mxu0 %v5380_v51  ;;  %4766 = vmatmul.mubr.bf16.gmra.mrb[16].mxu0 %v6116_v22 }
  0xb6   : > { %4562 = vmatmul.mubr.bf16.gmra.mrb[4].mxu1 %v5664_v5  ;;  %4769 = vmatprep.mubr.bf16.mxu0 %v6119_v63  ;;  %v2782_v5 = vrot.slane %v5898_v43, 1  ;;  %v2784_v43 = vrot.slane %v5859_v24, 1 }
  0xb7   : > { %4565 = vmatprep.mubr.bf16.mxu1 %v5687_v28  ;;  %4594 = vmatpush3.bf16.msra.mxu1 %v5373_v27  ;;  %v5379_v28 = vld [vmem:[%s6377_s2 + $0x68] sm:$0xff]  }
  0xb8   : > { %4595 = vmatprep.subr.bf16.mxu1 %v5375_v61  ;;  %v6139_v37 = vsel %vm2744_vm1, %v2781_v50, %v2782_v5  ;;  %v6156_v36 = vsel %vm2744_vm1, %v2784_v43, %v2785_v17 }
  0xbb   : > { %4596 = vmatpush3.bf16.msra.mxu1 %v5375_v61 }
  0xbc   : > { %4597 = vmatprep.subr.bf16.mxu1 %v5378_v2 }
  0xbd   : > { %4770 = vmatmul.mubr.bf16.gmra.mrb[20].mxu0 %v6136_v10 }
  0xbe   : > { %4566 = vmatmul.mubr.bf16.gmra.mrb[8].mxu1 %v5712_v55  ;;  %4773 = vmatprep.mubr.bf16.mxu0 %v6139_v37  ;;  %v2788_v55 = vrot.slane %v5932_v62, 1  ;;  %v2791_v62 = vrot.slane %v5963_v20, 1  ;;  %v1515_v20 = vshll.u32 %v5543_v16, 16 }
  0xbf   : > { %4569 = vmatprep.mubr.bf16.mxu1 %v5784_v7  ;;  %4598 = vmatpush3.bf16.msra.mxu1 %v5378_v2  ;;  %v5383_v7 = vld [vmem:[%s6377_s2 + $0x78] sm:$0xff]  }
  0xc0   : > { %4599 = vmatprep.subr.bf16.mxu1 %v5379_v28  ;;  %v6159_v4 = vsel %vm2744_vm1, %v2787_v29, %v2788_v55 }
  0xc3   : > { %4600 = vmatpush3.bf16.msra.mxu1 %v5379_v28 }
  0xc4   : > { %4601 = vmatprep.subr.bf16.mxu1 %v5381_v25 }
  0xc5   : > { %4774 = vmatmul.mubr.bf16.gmra.mrb[24].mxu0 %v6156_v36 }
  0xc6   : > { %4570 = vmatmul.mubr.bf16.gmra.mrb[12].mxu1 %v5816_v41  ;;  %4777 = vmatprep.mubr.bf16.mxu0 %v6159_v4  ;;  %v6171_v41 = vsel %vm2744_vm1, %v2790_v13, %v2791_v62 }
  0xc7   : > { %4573 = vmatprep.mubr.bf16.mxu1 %v5830_v11  ;;  %4602 = vmatpush3.bf16.msra.mxu1 %v5381_v25  ;;  %v5382_v11 = vld [vmem:[%s6377_s2 + $0x208] sm:$0xff]  }
  0xc8   : > { %4603 = vmatprep.subr.bf16.mxu1 %v5383_v7 }
  0xcb   : > { %4604 = vmatpush3.bf16.msra.mxu1 %v5383_v7 }
  0xcc   : > { %4877 = vmatprep.subr.bf16.mxu1 %v5391_v30 }
  0xcd   : > { %4778 = vmatmul.mubr.bf16.gmra.mrb[28].mxu0 %v6171_v41 }
  0xce   : > { %4574 = vmatmul.mubr.bf16.gmra.mrb[16].mxu1 %v5841_v23  ;;  %4797 = vmatprep.mubr.bf16.mxu0 %v5824_v6  ;;  %v5384_v6 = vld [vmem:[%s6377_s2 + $0x210] sm:$0xff]   ;;  %v1513_v23 = vshrl.u32 %v5543_v16, 16  ;;  %v5386_v16 = vld [vmem:[%s6377_s2 + $0x220] sm:$0xff]  }
  0xcf   : > { %4577 = vmatprep.mubr.bf16.mxu1 %v5846_v26  ;;  %v1517_v26 = vrot.slane %v1515_v20, 1 }
  0xd1   : > { %v1518_v8 = vor.u32 %v1517_v26, %v1513_v23 }
  0xd5   : > { %4798 = vmatmul.mubr.bf16.vlgmr.msra.gmra.mrb[0].mxu0 %v6028_v18 }
  0xd6   : > { %4578 = vmatmul.mubr.bf16.gmra.mrb[20].mxu1 %v5859_v24  ;;  %4801 = vmatprep.mubr.bf16.mxu0 %v6046_v48  ;;  %v1520_v24 = vshll.u32 %v6008_v33, 16  ;;  %v5387_v33 = vld [vmem:[%s6377_s2 + $0x228] sm:$0xff]  }
  0xd7   : > { %4581 = vmatprep.mubr.bf16.mxu1 %v5864_v46  ;;  %4830 = vmatpush3.bf16.msra.mxu0 %v5380_v51  ;;  %v5385_v46 = vld [vmem:[%s6377_s2 + $0x218] sm:$0xff]   ;;  %v3134_v51 = vrot.slane %v5965_v34, 1 }
  0xd8   : > { %4831 = vmatprep.subr.bf16.mxu0 %v5382_v11  ;;  %v1522_v27 = vrot.slane %v1520_v24, 1 }
  0xdb   : > { %4832 = vmatpush3.bf16.msra.mxu0 %v5382_v11 }
  0xdc   : > { %4833 = vmatprep.subr.bf16.mxu0 %v5384_v6 }
  0xdd   : > { %4802 = vmatmul.mubr.bf16.gmra.mrb[4].mxu0 %v6049_v14 }
  0xde   : > { %4582 = vmatmul.mubr.bf16.gmra.mrb[24].mxu1 %v5878_v3  ;;  %4805 = vmatprep.mubr.bf16.mxu0 %v6066_v54  ;;  %v1523_v3 = vsel %vm1511_vm0, %v1518_v8, %v1522_v27 }
  0xdf   : > { %4585 = vmatprep.mubr.bf16.mxu1 %v5953_v12  ;;  %4834 = vmatpush3.bf16.msra.mxu0 %v5384_v6 }
  0xe0   : > { %4835 = vmatprep.subr.bf16.mxu0 %v5385_v46 }
  0xe3   : > { %4836 = vmatpush3.bf16.msra.mxu0 %v5385_v46 }
  0xe4   : > { %4837 = vmatprep.subr.bf16.mxu0 %v5386_v16 }
  0xe5   : > { %4806 = vmatmul.mubr.bf16.gmra.mrb[8].mxu0 %v6069_v38 }
  0xe6   : > { %4586 = vmatmul.mubr.bf16.gmra.mrb[28].mxu1 %v5979_v57  ;;  %4809 = vmatprep.mubr.bf16.mxu0 %v6089_v31 }
  0xe7   : > { %4605 = vmatprep.mubr.bf16.mxu1 %v1523_v3  ;;  %4838 = vmatpush3.bf16.msra.mxu0 %v5386_v16 }
  0xe8   : > { %4839 = vmatprep.subr.bf16.mxu0 %v5387_v33 }
  0xeb   : > { %4840 = vmatpush3.bf16.msra.mxu0 %v5387_v33 }
  0xec   : > { %4841 = vmatprep.subr.bf16.mxu0 %v5388_v45 }
  0xed   : > { %4810 = vmatmul.mubr.bf16.gmra.mrb[12].mxu0 %v6092_v56 }
  0xee   : > { %4606 = vmatmul.mubr.bf16.vlgmr.msra.gmra.mrb[0].mxu1 %v5656_v59  ;;  %4813 = vmatprep.mubr.bf16.mxu0 %v6116_v22  ;;  %v5393_v59 = vld [vmem:[%s6377_s2 + $0x110] sm:$0xff]  }
  0xef   : > { %4885 = vmatpush3.bf16.msra.mxu1 %v5391_v30  ;;  %4609 = vmatprep.mubr.bf16.mxu1 %v5675_v19  ;;  %v5394_v19 = vld [vmem:[%s6377_s2 + $0x118] sm:$0xff]  }
  0xf0   : > { %4878 = vmatprep.subr.bf16.mxu1 %v5392_v49  ;;  %4842 = vmatpush3.bf16.msra.mxu0 %v5388_v45 }
  0xf1   : > { %4843 = vmatprep.subr.bf16.mxu0 %v5389_v58 }
  0xf3   : > { %4886 = vmatpush3.bf16.msra.mxu1 %v5392_v49 }
  0xf4   : > { %4879 = vmatprep.subr.bf16.mxu1 %v5393_v59  ;;  %4844 = vmatpush3.bf16.msra.mxu0 %v5389_v58 }
  0xf5   : > { %4814 = vmatmul.mubr.bf16.gmra.mrb[16].mxu0 %v6119_v63 }
  0xf6   : > { %4610 = vmatmul.mubr.bf16.gmra.mrb[4].mxu1 %v5698_v35  ;;  %4817 = vmatprep.mubr.bf16.mxu0 %v6136_v10  ;;  %v5396_v35 = vld [vmem:[%s6377_s2 + $0x128] sm:$0xff]  }
  0xf7   : > { %4613 = vmatprep.mubr.bf16.mxu1 %v5708_v44  ;;  %4887 = vmatpush3.bf16.msra.mxu1 %v5393_v59  ;;  %v5397_v44 = vld [vmem:[%s6377_s2 + $0x130] sm:$0xff]  }
  0xf8   : > { %4880 = vmatprep.subr.bf16.mxu1 %v5394_v19 }
  0xfb   : > { %4888 = vmatpush3.bf16.msra.mxu1 %v5394_v19 }
  0xfc   : > { %4881 = vmatprep.subr.bf16.mxu1 %v5395_v39 }
  0xfd   : > { %4818 = vmatmul.mubr.bf16.gmra.mrb[20].mxu0 %v6139_v37 }
  0xfe   : > { %4614 = vmatmul.mubr.bf16.gmra.mrb[8].mxu1 %v5732_v1  ;;  %4821 = vmatprep.mubr.bf16.mxu0 %v6156_v36  ;;  %v5398_v1 = vld [vmem:[%s6377_s2 + $0x138] sm:$0xff]  }
  0xff   : > { %4617 = vmatprep.mubr.bf16.mxu1 %v5745_v21  ;;  %4889 = vmatpush3.bf16.msra.mxu1 %v5395_v39  ;;  %v3133_v21 = vrot.slane %v5953_v12, 1  ;;  %v6394_v12 = vld [vmem:[#allocation6_spill] sm:$0xff] }
 0x100   : > { %4882 = vmatprep.subr.bf16.mxu1 %v5396_v35 }
 0x101   : > { %v3135_v61 = vsel %vm2744_vm1, %v3133_v21, %v3134_v51 }
 0x103   : > { %4890 = vmatpush3.bf16.msra.mxu1 %v5396_v35 }
 0x104   : > { %4883 = vmatprep.subr.bf16.mxu1 %v5397_v44 }
 0x105   : > { %4822 = vmatmul.mubr.bf16.gmra.mrb[24].mxu0 %v6159_v4 }
 0x106   : > { %4618 = vmatmul.mubr.bf16.gmra.mrb[12].mxu1 %v5778_v53  ;;  %4825 = vmatprep.mubr.bf16.mxu0 %v6171_v41  ;;  %v6392_v53 = vld [vmem:[#allocation3_spill] sm:$0xff] }
 0x107   : > { %4621 = vmatprep.mubr.bf16.mxu1 %v5828_v9  ;;  %4891 = vmatpush3.bf16.msra.mxu1 %v5397_v44  ;;  %v6393_v9 = vld [vmem:[#allocation4_spill] sm:$0xff] }
 0x108   : > { %4884 = vmatprep.subr.bf16.mxu1 %v5398_v1 }
 0x10b   : > { %4892 = vmatpush3.bf16.msra.mxu1 %v5398_v1 }
 0x10d   : > { %4826 = vmatmul.mubr.bf16.gmra.mrb[28].mxu0 %v3135_v61 }
 0x10e   : > { %4622 = vmatmul.mubr.bf16.gmra.mrb[16].mxu1 %v5914_v52  ;;  %4845 = vmatprep.mubr.bf16.mxu0 %v6028_v18 }
 0x10f   : > { %4625 = vmatprep.mubr.bf16.mxu1 %v5917_v0 }
 0x115   : > { %4846 = vmatmul.mubr.bf16.vlgmr.msra.gmra.mrb[0].mxu0 %v6046_v48 }
 0x116   : > { %4626 = vmatmul.mubr.bf16.gmra.mrb[20].mxu1 %v5946_v47  ;;  %4849 = vmatprep.mubr.bf16.mxu0 %v6049_v14 }
 0x117   : > { %4629 = vmatprep.mubr.bf16.mxu1 %v6392_v53 }
 0x11d   : > { %4850 = vmatmul.mubr.bf16.gmra.mrb[4].mxu0 %v6066_v54 }
 0x11e   : > { %4630 = vmatmul.mubr.bf16.gmra.mrb[24].mxu1 %v6393_v9  ;;  %4853 = vmatprep.mubr.bf16.mxu0 %v6069_v38 }
 0x11f   : > { %4633 = vmatprep.mubr.bf16.mxu1 %v6394_v12 }
 0x125   : > { %4854 = vmatmul.mubr.bf16.gmra.mrb[8].mxu0 %v6089_v31 }
 0x126   : > { %4634 = vmatmul.mubr.bf16.gmra.mrb[28].mxu1 %v6000_v42  ;;  %4857 = vmatprep.mubr.bf16.mxu0 %v6092_v56 }
 0x127   : > { %4669 = vmatprep.mubr.bf16.mxu1 %v5914_v52  ;;  %v3461_v52 = vrot.slane %v5979_v57, 1 }
 0x12d   : > { %4858 = vmatmul.mubr.bf16.gmra.mrb[12].mxu0 %v6116_v22 }
 0x12e   : > { %4670 = vmatmul.mubr.bf16.vlgmr.msra.gmra.mrb[16].mxu1 %v5917_v0  ;;  %4861 = vmatprep.mubr.bf16.mxu0 %v6119_v63  ;;  %v3462_v0 = vrot.slane %v5993_v40, 1 }
 0x12f   : > { %4673 = vmatprep.mubr.bf16.mxu1 %v5946_v47 }
 0x130   : > { %v3463_v47 = vsel %vm2744_vm1, %v3461_v52, %v3462_v0 }
 0x135   : > { %4862 = vmatmul.mubr.bf16.gmra.mrb[16].mxu0 %v6136_v10 }
 0x136   : > { %4674 = vmatmul.mubr.bf16.gmra.mrb[20].mxu1 %v6392_v53  ;;  %4865 = vmatprep.mubr.bf16.mxu0 %v6139_v37 }
 0x137   : > { %4677 = vmatprep.mubr.bf16.mxu1 %v6393_v9 }
 0x13d   : > { %4866 = vmatmul.mubr.bf16.gmra.mrb[20].mxu0 %v6156_v36 }
 0x13e   : > { %4678 = vmatmul.mubr.bf16.gmra.mrb[24].mxu1 %v6394_v12  ;;  %4869 = vmatprep.mubr.bf16.mxu0 %v6159_v4 }
 0x13f   : > { %4681 = vmatprep.mubr.bf16.mxu1 %v6000_v42 }
 0x145   : > { %4870 = vmatmul.mubr.bf16.gmra.mrb[24].mxu0 %v6171_v41 }
 0x146   : > { %4682 = vmatmul.mubr.bf16.gmra.mrb[28].mxu1 %v6005_v32  ;;  %4873 = vmatprep.mubr.bf16.mxu0 %v3135_v61 }
 0x14d   : > { %4874 = vmatmul.mubr.bf16.gmra.mrb[28].mxu0 %v3463_v47 }
 0x1c1   : > { %v4607_v34 = vpop.f32.mrb[0].mxu1 }
 0x1c2   : > { %v1851_v18 = vpop.f32.mrb[1].mxu1  ;;  %v4895_v50 = vadd.f32 %v6395_v15, %v4607_v34 }
 0x1c3   : > { %v4608_v42 = vpop.f32.mrb[2].mxu1  ;;  %v4901_v5 = vadd.f32 %v6395_v15, %v1851_v18 }
 0x1c4   : > { %v1854_v48 = vpop.f32.mrb[3].mxu1  ;;  %v4907_v10 = vadd.f32 %v6395_v15, %v4608_v42 }
 0x1c5   : > { %v4913_v43 = vadd.f32 %v6395_v15, %v1854_v48 }
 0x1c9   : > { %v4611_v14 = vpop.f32.mrb[4].mxu1 }
 0x1ca   : > { %v1867_v54 = vpop.f32.mrb[5].mxu1  ;;  %v4919_v30 = vadd.f32 %v6395_v15, %v4611_v14 }
 0x1cb   : > { %v4612_v38 = vpop.f32.mrb[6].mxu1  ;;  %v4925_v41 = vadd.f32 %v6395_v15, %v1867_v54 }
 0x1cc   : > { %v1870_v31 = vpop.f32.mrb[7].mxu1  ;;  %v4931_v26 = vadd.f32 %v6395_v15, %v4612_v38 }
 0x1cd   : > { %v4937_v24 = vadd.f32 %v6395_v15, %v1870_v31 }
 0x1d1   : > { %v4615_v32 = vpop.f32.mrb[8].mxu1 }
 0x1d2   : > { %v1883_v56 = vpop.f32.mrb[9].mxu1  ;;  %v4943_v51 = vadd.f32 %v6395_v15, %v4615_v32 }
 0x1d3   : > { %v4616_v22 = vpop.f32.mrb[10].mxu1  ;;  %v4949_v61 = vadd.f32 %v6395_v15, %v1883_v56 }
 0x1d4   : > { %v1886_v63 = vpop.f32.mrb[11].mxu1  ;;  %v4955_v0 = vadd.f32 %v6395_v15, %v4616_v22 }
 0x1d5   : > { %v4961_v47 = vadd.f32 %v6395_v15, %v1886_v63 }
 0x1d9   : > { %v6285_v2 = vpop.f32.mrb[12].mxu1 }
 0x1da   : > { %v6287_v57 = vpop.f32.mrb[13].mxu1 }
 0x1db   : > { %v6289_v40 = vpop.f32.mrb[14].mxu1 }
 0x1dc   : > { %v6291_v60 = vpop.f32.mrb[15].mxu1 }
 0x1e8   : > { %v4847_v28 = vpop.f32.mrb[0].mxu0 }
 0x1e9   : > { %v4898_v37 = vadd.f32 %v4895_v50, %v4847_v28  ;;  %v3596_v25 = vpop.f32.mrb[1].mxu0 }
 0x1ea   : > { %v4904_v17 = vadd.f32 %v4901_v5, %v3596_v25  ;;  %v4848_v29 = vpop.f32.mrb[2].mxu0  ;;  %v4967_v25 = vadd.f32 %v6395_v15, %v6285_v2 }
 0x1eb   : > { %3757 = vst [vmem:[%s6299_s18 + $0x10] sm:$0xff] %v4898_v37  ;;  %v4910_v55 = vadd.f32 %v4907_v10, %v4848_v29  ;;  %v3599_v7 = vpop.f32.mrb[3].mxu0  ;;  %v3859_v11 = vmul.f32 %v4898_v37, %v4898_v37 }
 0x1ec   : > { %3755 = vst [vmem:[%s6299_s18] sm:$0xff] %v4904_v17  ;;  %v4916_v36 = vadd.f32 %v4913_v43, %v3599_v7  ;;  %v3857_v4 = vmul.f32 %v4904_v17, %v4904_v17 }
 0x1ed   : > { %3758 = vst [vmem:[%s6299_s18 + $0x18] sm:$0xff] %v4910_v55  ;;  %v3860_v27 = vmul.f32 %v4910_v55, %v4910_v55 }
 0x1ee   : > { %3756 = vst [vmem:[%s6299_s18 + $0x8] sm:$0xff] %v4916_v36  ;;  %v3819_v13 = vadd.f32 %v4916_v36, %v4904_v17  ;;  %v3858_v62 = vmul.f32 %v4916_v36, %v4916_v36  ;;  %v4973_v17 = vadd.f32 %v6395_v15, %v6287_v57 }
 0x1f0   : > { %v3820_v20 = vadd.f32 %v4898_v37, %v3819_v13  ;;  %v3889_v6 = vadd.f32 %v3858_v62, %v3857_v4  ;;  %v4851_v23 = vpop.f32.mrb[4].mxu0  ;;  %v4979_v13 = vadd.f32 %v6395_v15, %v6289_v40  ;;  %v4985_v62 = vadd.f32 %v6395_v15, %v6291_v60 }
 0x1f1   : > { %v4922_v46 = vadd.f32 %v4919_v30, %v4851_v23  ;;  %v3612_v8 = vpop.f32.mrb[5].mxu0 }
 0x1f2   : > { %v3890_v16 = vadd.f32 %v3889_v6, %v3859_v11  ;;  %v4928_v3 = vadd.f32 %v4925_v41, %v3612_v8  ;;  %v3821_v33 = vadd.f32 %v4910_v55, %v3820_v20  ;;  %v4852_v45 = vpop.f32.mrb[6].mxu0 }
 0x1f3   : > { %3761 = vst [vmem:[%s6299_s18 + $0x30] sm:$0xff] %v4922_v46  ;;  %v4934_v58 = vadd.f32 %v4931_v26, %v4852_v45  ;;  %v3615_v49 = vpop.f32.mrb[7].mxu0  ;;  %v3863_v53 = vmul.f32 %v4922_v46, %v4922_v46 }
 0x1f4   : > { %3759 = vst [vmem:[%s6299_s18 + $0x20] sm:$0xff] %v4928_v3  ;;  %v3822_v59 = vadd.f32 %v4928_v3, %v3821_v33  ;;  %v3861_v19 = vmul.f32 %v4928_v3, %v4928_v3  ;;  %v3891_v39 = vadd.f32 %v3890_v16, %v3860_v27  ;;  %v4940_v35 = vadd.f32 %v4937_v24, %v3615_v49 }
 0x1f5   : > { %3762 = vst [vmem:[%s6299_s18 + $0x38] sm:$0xff] %v4934_v58  ;;  %v3864_v42 = vmul.f32 %v4934_v58, %v4934_v58 }
 0x1f6   : > { %v3892_v44 = vadd.f32 %v3891_v39, %v3861_v19  ;;  %3760 = vst [vmem:[%s6299_s18 + $0x28] sm:$0xff] %v4940_v35  ;;  %v3823_v1 = vadd.f32 %v4940_v35, %v3822_v59  ;;  %v3862_v21 = vmul.f32 %v4940_v35, %v4940_v35 }
 0x1f8   : > { %v3824_v9 = vadd.f32 %v4922_v46, %v3823_v1  ;;  %v3893_v12 = vadd.f32 %v3892_v44, %v3862_v21  ;;  %v4855_v52 = vpop.f32.mrb[8].mxu0 }
 0x1f9   : > { %v4946_v34 = vadd.f32 %v4943_v51, %v4855_v52  ;;  %v3628_v18 = vpop.f32.mrb[9].mxu0 }
 0x1fa   : > { %v3894_v48 = vadd.f32 %v3893_v12, %v3863_v53  ;;  %v4952_v14 = vadd.f32 %v4949_v61, %v3628_v18  ;;  %v3825_v54 = vadd.f32 %v4934_v58, %v3824_v9  ;;  %v4856_v38 = vpop.f32.mrb[10].mxu0 }
 0x1fb   : > { %3765 = vst [vmem:[%s6299_s18 + $0x50] sm:$0xff] %v4946_v34  ;;  %v4958_v31 = vadd.f32 %v4955_v0, %v4856_v38  ;;  %v3631_v32 = vpop.f32.mrb[11].mxu0  ;;  %v3867_v29 = vmul.f32 %v4946_v34, %v4946_v34 }
 0x1fc   : > { %3763 = vst [vmem:[%s6299_s18 + $0x40] sm:$0xff] %v4952_v14  ;;  %v3826_v56 = vadd.f32 %v4952_v14, %v3825_v54  ;;  %v3865_v50 = vmul.f32 %v4952_v14, %v4952_v14  ;;  %v3895_v5 = vadd.f32 %v3894_v48, %v3864_v42  ;;  %v4964_v28 = vadd.f32 %v4961_v47, %v3631_v32 }
 0x1fd   : > { %3766 = vst [vmem:[%s6299_s18 + $0x58] sm:$0xff] %v4958_v31  ;;  %v3868_v11 = vmul.f32 %v4958_v31, %v4958_v31 }
 0x1fe   : > { %v3896_v22 = vadd.f32 %v3895_v5, %v3865_v50  ;;  %3764 = vst [vmem:[%s6299_s18 + $0x48] sm:$0xff] %v4964_v28  ;;  %v3827_v63 = vadd.f32 %v4964_v28, %v3826_v56  ;;  %v3866_v10 = vmul.f32 %v4964_v28, %v4964_v28 }
 0x200   : > { %v3828_v55 = vadd.f32 %v4946_v34, %v3827_v63  ;;  %v3897_v7 = vadd.f32 %v3896_v22, %v3866_v10  ;;  %v4859_v36 = vpop.f32.mrb[12].mxu0 }
 0x201   : > { %v4671_v37 = vpop.f32.mrb[16].mxu1  ;;  %v4970_v30 = vadd.f32 %v4967_v25, %v4859_v36  ;;  %v3644_v2 = vpop.f32.mrb[13].mxu0 }
 0x202   : > { %v2250_v43 = vpop.f32.mrb[17].mxu1  ;;  %v3898_v57 = vadd.f32 %v3897_v7, %v3867_v29  ;;  %v4976_v20 = vadd.f32 %v4973_v17, %v3644_v2  ;;  %v3829_v6 = vadd.f32 %v4958_v31, %v3828_v55  ;;  %v4860_v23 = vpop.f32.mrb[14].mxu0  ;;  %v4991_v60 = vadd.f32 %v6395_v15, %v4671_v37 }
 0x203   : > { %v4672_v4 = vpop.f32.mrb[18].mxu1  ;;  %3769 = vst [vmem:[%s6299_s18 + $0x70] sm:$0xff] %v4970_v30  ;;  %v4982_v26 = vadd.f32 %v4979_v13, %v4860_v23  ;;  %v3647_v24 = vpop.f32.mrb[15].mxu0  ;;  %v4997_v45 = vadd.f32 %v6395_v15, %v2250_v43  ;;  %v3871_v19 = vmul.f32 %v4970_v30, %v4970_v30 }
 0x204   : > { %v2253_v41 = vpop.f32.mrb[19].mxu1  ;;  %3767 = vst [vmem:[%s6299_s18 + $0x60] sm:$0xff] %v4976_v20  ;;  %v3830_v46 = vadd.f32 %v4976_v20, %v3829_v6  ;;  %v3869_v8 = vmul.f32 %v4976_v20, %v4976_v20  ;;  %v3899_v40 = vadd.f32 %v3898_v57, %v3868_v11  ;;  %v4988_v27 = vadd.f32 %v4985_v62, %v3647_v24 }
 0x205   : > { %3770 = vst [vmem:[%s6299_s18 + $0x78] sm:$0xff] %v4982_v26  ;;  %v5003_v49 = vadd.f32 %v6395_v15, %v4672_v4  ;;  %v5009_v1 = vadd.f32 %v6395_v15, %v2253_v41  ;;  %v3872_v9 = vmul.f32 %v4982_v26, %v4982_v26 }
 0x206   : > { %v3900_v16 = vadd.f32 %v3899_v40, %v3869_v8  ;;  %3768 = vst [vmem:[%s6299_s18 + $0x68] sm:$0xff] %v4988_v27  ;;  %v3831_v3 = vadd.f32 %v4988_v27, %v3830_v46  ;;  %v3870_v33 = vmul.f32 %v4988_v27, %v4988_v27 }
 0x208   : > { %v3832_v39 = vadd.f32 %v4970_v30, %v3831_v3  ;;  %v3901_v35 = vadd.f32 %v3900_v16, %v3870_v33  ;;  %v4863_v44 = vpop.f32.mrb[16].mxu0 }
 0x209   : > { %v4675_v58 = vpop.f32.mrb[20].mxu1  ;;  %v4994_v51 = vadd.f32 %v4991_v60, %v4863_v44  ;;  %v3660_v61 = vpop.f32.mrb[17].mxu0 }
 0x20a   : > { %v2266_v59 = vpop.f32.mrb[21].mxu1  ;;  %v3902_v12 = vadd.f32 %v3901_v35, %v3871_v19  ;;  %v5000_v52 = vadd.f32 %v4997_v45, %v3660_v61  ;;  %v3833_v0 = vadd.f32 %v4982_v26, %v3832_v39  ;;  %v4864_v47 = vpop.f32.mrb[18].mxu0  ;;  %v5015_v38 = vadd.f32 %v6395_v15, %v4675_v58 }
 0x20b   : > { %v4676_v21 = vpop.f32.mrb[22].mxu1  ;;  %3773 = vst [vmem:[%s6299_s18 + $0x90] sm:$0xff] %v4994_v51  ;;  %v5006_v34 = vadd.f32 %v5003_v49, %v4864_v47  ;;  %v3663_v18 = vpop.f32.mrb[19].mxu0  ;;  %v5021_v50 = vadd.f32 %v6395_v15, %v2266_v59  ;;  %v3875_v63 = vmul.f32 %v4994_v51, %v4994_v51 }
 0x20c   : > { %v2269_v53 = vpop.f32.mrb[23].mxu1  ;;  %3771 = vst [vmem:[%s6299_s18 + $0x80] sm:$0xff] %v5000_v52  ;;  %v3834_v42 = vadd.f32 %v5000_v52, %v3833_v0  ;;  %v3873_v48 = vmul.f32 %v5000_v52, %v5000_v52  ;;  %v3903_v14 = vadd.f32 %v3902_v12, %v3872_v9  ;;  %v5012_v54 = vadd.f32 %v5009_v1, %v3663_v18 }
 0x20d   : > { %3774 = vst [vmem:[%s6299_s18 + $0x98] sm:$0xff] %v5006_v34  ;;  %v5027_v28 = vadd.f32 %v6395_v15, %v4676_v21  ;;  %v5033_v43 = vadd.f32 %v6395_v15, %v2269_v53  ;;  %v3876_v36 = vmul.f32 %v5006_v34, %v5006_v34 }
 0x20e   : > { %v3904_v31 = vadd.f32 %v3903_v14, %v3873_v48  ;;  %3772 = vst [vmem:[%s6299_s18 + $0x88] sm:$0xff] %v5012_v54  ;;  %v3835_v32 = vadd.f32 %v5012_v54, %v3834_v42  ;;  %v3874_v56 = vmul.f32 %v5012_v54, %v5012_v54 }
 0x210   : > { %v3836_v10 = vadd.f32 %v4994_v51, %v3835_v32  ;;  %v3905_v37 = vadd.f32 %v3904_v31, %v3874_v56  ;;  %v4867_v25 = vpop.f32.mrb[20].mxu0 }
 0x211   : > { %v4679_v5 = vpop.f32.mrb[24].mxu1  ;;  %v5018_v29 = vadd.f32 %v5015_v38, %v4867_v25  ;;  %v3676_v55 = vpop.f32.mrb[21].mxu0 }
 0x212   : > { %v2282_v22 = vpop.f32.mrb[25].mxu1  ;;  %v3906_v4 = vadd.f32 %v3905_v37, %v3875_v63  ;;  %v5024_v13 = vadd.f32 %v5021_v50, %v3676_v55  ;;  %v3837_v62 = vadd.f32 %v5006_v34, %v3836_v10  ;;  %v4868_v30 = vpop.f32.mrb[22].mxu0  ;;  %v5039_v23 = vadd.f32 %v6395_v15, %v4679_v5 }
 0x213   : > { %v4680_v17 = vpop.f32.mrb[26].mxu1  ;;  %3777 = vst [vmem:[%s6299_s18 + $0xb0] sm:$0xff] %v5018_v29  ;;  %v5030_v2 = vadd.f32 %v5027_v28, %v4868_v30  ;;  %v3679_v41 = vpop.f32.mrb[23].mxu0  ;;  %v5045_v8 = vadd.f32 %v6395_v15, %v2282_v22  ;;  %v3879_v16 = vmul.f32 %v5018_v29, %v5018_v29 }
 0x214   : > { %v2285_v7 = vpop.f32.mrb[27].mxu1  ;;  %3775 = vst [vmem:[%s6299_s18 + $0xa0] sm:$0xff] %v5024_v13  ;;  %v3838_v11 = vadd.f32 %v5024_v13, %v3837_v62  ;;  %v3877_v57 = vmul.f32 %v5024_v13, %v5024_v13  ;;  %v3907_v20 = vadd.f32 %v3906_v4, %v3876_v36  ;;  %v5036_v6 = vadd.f32 %v5033_v43, %v3679_v41 }
 0x215   : > { %3778 = vst [vmem:[%s6299_s18 + $0xb8] sm:$0xff] %v5030_v2  ;;  %v5051_v27 = vadd.f32 %v6395_v15, %v4680_v17  ;;  %v5057_v58 = vadd.f32 %v6395_v15, %v2285_v7  ;;  %v3880_v35 = vmul.f32 %v5030_v2, %v5030_v2 }
 0x216   : > { %v3908_v26 = vadd.f32 %v3907_v20, %v3877_v57  ;;  %3776 = vst [vmem:[%s6299_s18 + $0xa8] sm:$0xff] %v5036_v6  ;;  %v3839_v24 = vadd.f32 %v5036_v6, %v3838_v11  ;;  %v3878_v46 = vmul.f32 %v5036_v6, %v5036_v6 }
 0x218   : > { %v3840_v3 = vadd.f32 %v5018_v29, %v3839_v24  ;;  %v3909_v33 = vadd.f32 %v3908_v26, %v3878_v46  ;;  %v4871_v45 = vpop.f32.mrb[24].mxu0 }
 0x219   : > { %v4683_v40 = vpop.f32.mrb[28].mxu1  ;;  %v5042_v59 = vadd.f32 %v5039_v23, %v4871_v45  ;;  %v3692_v19 = vpop.f32.mrb[25].mxu0 }
 0x21a   : > { %v2298_v60 = vpop.f32.mrb[29].mxu1  ;;  %v3910_v44 = vadd.f32 %v3909_v33, %v3879_v16  ;;  %v5048_v1 = vadd.f32 %v5045_v8, %v3692_v19  ;;  %v3841_v21 = vadd.f32 %v5030_v2, %v3840_v3  ;;  %v4872_v51 = vpop.f32.mrb[26].mxu0  ;;  %v5063_v47 = vadd.f32 %v6395_v15, %v4683_v40 }
 0x21b   : > { %v4684_v49 = vpop.f32.mrb[30].mxu1  ;;  %3781 = vst [vmem:[%s6299_s18 + $0xd0] sm:$0xff] %v5042_v59  ;;  %v5054_v61 = vadd.f32 %v5051_v27, %v4872_v51  ;;  %v3695_v53 = vpop.f32.mrb[27].mxu0  ;;  %v5069_v48 = vadd.f32 %v6395_v15, %v2298_v60  ;;  %v3883_v54 = vmul.f32 %v5042_v59, %v5042_v59 }
 0x21c   : > { %v2301_v39 = vpop.f32.mrb[31].mxu1  ;;  %3779 = vst [vmem:[%s6299_s18 + $0xc0] sm:$0xff] %v5048_v1  ;;  %v3842_v9 = vadd.f32 %v5048_v1, %v3841_v21  ;;  %v3881_v12 = vmul.f32 %v5048_v1, %v5048_v1  ;;  %v3911_v52 = vadd.f32 %v3910_v44, %v3880_v35  ;;  %v5060_v0 = vadd.f32 %v5057_v58, %v3695_v53 }
 0x21d   : > { %3782 = vst [vmem:[%s6299_s18 + $0xd8] sm:$0xff] %v5054_v61  ;;  %v5075_v14 = vadd.f32 %v6395_v15, %v4684_v49  ;;  %v5081_v56 = vadd.f32 %v6395_v15, %v2301_v39  ;;  %v3884_v28 = vmul.f32 %v5054_v61, %v5054_v61 }
 0x21e   : > { %v3912_v34 = vadd.f32 %v3911_v52, %v3881_v12  ;;  %3780 = vst [vmem:[%s6299_s18 + $0xc8] sm:$0xff] %v5060_v0  ;;  %v3843_v18 = vadd.f32 %v5060_v0, %v3842_v9  ;;  %v3882_v42 = vmul.f32 %v5060_v0, %v5060_v0 }
 0x220   : > { %v3844_v38 = vadd.f32 %v5042_v59, %v3843_v18  ;;  %v3913_v31 = vadd.f32 %v3912_v34, %v3882_v42  ;;  %v4875_v32 = vpop.f32.mrb[28].mxu0 }
 0x221   : > { %v5066_v50 = vadd.f32 %v5063_v47, %v4875_v32  ;;  %v3708_v5 = vpop.f32.mrb[29].mxu0 }
 0x222   : > { %v3914_v22 = vadd.f32 %v3913_v31, %v3883_v54  ;;  %v5072_v63 = vadd.f32 %v5069_v48, %v3708_v5  ;;  %v3845_v10 = vadd.f32 %v5054_v61, %v3844_v38  ;;  %v4876_v37 = vpop.f32.mrb[30].mxu0 }
 0x223   : > { %3785 = vst [vmem:[%s6299_s18 + $0xf0] sm:$0xff] %v5066_v50  ;;  %v5078_v25 = vadd.f32 %v5075_v14, %v4876_v37  ;;  %v3711_v43 = vpop.f32.mrb[31].mxu0  ;;  %v3887_v13 = vmul.f32 %v5066_v50, %v5066_v50 }
 0x224   : > { %3783 = vst [vmem:[%s6299_s18 + $0xe0] sm:$0xff] %v5072_v63  ;;  %v3846_v17 = vadd.f32 %v5072_v63, %v3845_v10  ;;  %v3885_v29 = vmul.f32 %v5072_v63, %v5072_v63  ;;  %v3915_v55 = vadd.f32 %v3914_v22, %v3884_v28  ;;  %v5084_v7 = vadd.f32 %v5081_v56, %v3711_v43 }
 0x225   : > { %3786 = vst [vmem:[%s6299_s18 + $0xf8] sm:$0xff] %v5078_v25  ;;  %v3888_v2 = vmul.f32 %v5078_v25, %v5078_v25 }
 0x226   : > { %v3916_v36 = vadd.f32 %v3915_v55, %v3885_v29  ;;  %3784 = vst [vmem:[%s6299_s18 + $0xe8] sm:$0xff] %v5084_v7  ;;  %v3847_v15 = vadd.f32 %v5084_v7, %v3846_v17  ;;  %v3886_v4 = vmul.f32 %v5084_v7, %v5084_v7 }
 0x228   : > { %v3848_v62 = vadd.f32 %v5066_v50, %v3847_v15  ;;  %v3917_v30 = vadd.f32 %v3916_v36, %v3886_v4 }
 0x22a   : > { %v3849_v41 = vadd.f32 %v5078_v25, %v3848_v62  ;;  %v3918_v11 = vadd.f32 %v3917_v30, %v3887_v13 }
 0x22c   : > { %v3850_v57 = vrot.slane %v3849_v41, 4  ;;  %v3919_v20 = vadd.f32 %v3918_v11, %v3888_v2 }
 0x22e   : > { %v3851_v6 = vadd.f32 %v3850_v57, %v3849_v41  ;;  %v3920_v23 = vrot.slane %v3919_v20, 4 }
 0x230   : > { %v3852_v26 = vrot.slane %v3851_v6, 2  ;;  %v3921_v24 = vadd.f32 %v3920_v23, %v3919_v20 }
 0x232   : > { %v3853_v46 = vadd.f32 %v3852_v26, %v3851_v6  ;;  %v3922_v8 = vrot.slane %v3921_v24, 2 }
 0x234   : > { %v3854_v40 = vrot.slane %v3853_v46, 1  ;;  %v3923_v27 = vadd.f32 %v3922_v8, %v3921_v24 }
 0x236   : > { %v3855_v60 = vadd.f32 %v3854_v40, %v3853_v46  ;;  %v3924_v16 = vrot.slane %v3923_v27, 1 }
 0x238   : > { %3856 = vst [vmem:[%s208_s29] sm:$0x1] %v3855_v60  ;;  %v3925_v3 = vadd.f32 %v3924_v16, %v3923_v27 }
 0x23a   : > { %3926 = vst [vmem:[%s208_s29 + $0x1] sm:$0x1] %v3925_v3 }
 0x23b PF: > { %s15_s15 = sadd.s32 1, %s5405_s15  }
 0x23c   : > { %p12_p4 = scmp.ge.s32.totalorder %s15_s15, 4  }
 0x23e   :  { %14 = sbr.rel (!%p12_p4) target bundleno = 1 (0x1), region = 84 }

</bundles_post_ra>
